<compile_context>
chip_gen: v7x
topology: tpu7x:2x2x1
jax: 0.10.0
libtpu: 0.0.40
codegen_flags: <defaults>
</compile_context>

<pallas_src>
import functools
import math

import jax
import jax.numpy as jnp
from jax import lax
from jax.experimental import pallas as pl
from jax.experimental.pallas import tpu as pltpu


# --------------------------- BN folding (host) --------------------------------

def _fold_bn(gamma, beta, mean, var, conv_bias, eps=1e-5):
    inv_std = gamma / jnp.sqrt(var + eps)
    scale = inv_std
    shift = beta + inv_std * (conv_bias - mean)
    return (scale.reshape(1, -1).astype(jnp.float32),
            shift.reshape(1, -1).astype(jnp.float32))


def _pad_and_flatten(x_nhwc):
    """(N,H,W,C) -> zero-pad to (N,H+3,W+2,C) and flatten rows -> (N,(H+3)*(W+2),C).

    Height gets (1,2) padding (bottom has one extra zero row) so that every
    shifted tap window  rows[off : off + H*(W+2)]  with off = kh*(W+2)+kw
    stays in bounds; the extra rows only feed the (discarded) garbage columns.
    """
    N, H, W, C = x_nhwc.shape
    xp = jnp.pad(x_nhwc, ((0, 0), (1, 2), (1, 1), (0, 0)))
    return xp.reshape(N, (H + 3) * (W + 2), C)


# ------------------- in-kernel 3x3 tap accumulation (MXU) ---------------------

def _conv_taps_accumulate(x_ref, w_ref, H, Wp, cout):
    """x_ref: ((H+3)*Wp, cin) bf16 padded image (row-flattened).
       w_ref: (9, cin, cout) bf16.
       Returns extended conv output (H*Wp, cout) f32; columns >= W of each
       padded row are garbage and are masked / sliced off by the caller."""
    hw = H * Wp
    acc = jnp.zeros((hw, cout), jnp.float32)
    for kh in range(3):
        for kw in range(3):
            off = kh * Wp + kw
            win = x_ref[pl.ds(off, hw), :]                 # shifted window
            acc = acc + jnp.dot(win, w_ref[kh * 3 + kw],
                                preferred_element_type=jnp.float32)
    return acc


# --------------------- Conv3x3 + BN + ReLU (layer 1) --------------------------

def _conv_bn_relu_kernel(x_ref, w_ref, scale_ref, shift_ref, o_ref, *,
                         H, Wp, cout):
    acc = _conv_taps_accumulate(x_ref, w_ref, H, Wp, cout)
    y = jnp.maximum(acc * scale_ref[...] + shift_ref[...], 0.0)
    o_ref[...] = y.astype(o_ref.dtype)


def conv3x3_bn_relu(x_nhwc, w_hwio, scale, shift, *, out_dtype=jnp.bfloat16):
    N, H, W, cin = x_nhwc.shape
    cout = w_hwio.shape[-1]
    Wp = W + 2
    rows_in = (H + 3) * Wp
    rows_out = H * Wp

    x_flat = _pad_and_flatten(x_nhwc.astype(jnp.bfloat16))
    w = w_hwio.reshape(9, cin, cout).astype(jnp.bfloat16)

    kern = functools.partial(_conv_bn_relu_kernel, H=H, Wp=Wp, cout=cout)
    out = pl.pallas_call(
        kern,
        out_shape=jax.ShapeDtypeStruct((N, rows_out, cout), out_dtype),
        grid_spec=pltpu.PrefetchScalarGridSpec(
            num_scalar_prefetch=0,
            grid=(N,),
            in_specs=[
                pl.BlockSpec((None, rows_in, cin), lambda n: (n, 0, 0)),
                pl.BlockSpec((9, cin, cout), lambda n: (0, 0, 0)),
                pl.BlockSpec((1, cout), lambda n: (0, 0)),
                pl.BlockSpec((1, cout), lambda n: (0, 0)),
            ],
            out_specs=pl.BlockSpec((None, rows_out, cout), lambda n: (n, 0, 0)),
        ),
        compiler_params=pltpu.CompilerParams(
            dimension_semantics=("parallel",)),
    )(x_flat, w, scale, shift)
    # drop the width-padding garbage columns -> (N, H, W, cout)
    return out.reshape(N, H, Wp, cout)[:, :, :W, :]


# ----------- Conv3x3 + BN + ReLU + GlobalAvgPool + Linear (fused) -------------

def _conv_bn_relu_pool_fc_kernel(x_ref, w_ref, scale_ref, shift_ref, mask_ref,
                                 wc_ref, bc_ref, o_ref, *, H, W, Wp, cout):
    acc = _conv_taps_accumulate(x_ref, w_ref, H, Wp, cout)
    y = jnp.maximum(acc * scale_ref[...] + shift_ref[...], 0.0)   # (H*Wp, cout)
    # masked global average over the H*W valid pixels
    pooled = jnp.sum(y * mask_ref[...], axis=0, keepdims=True) * (1.0 / (H * W))
    logits = jnp.dot(pooled, wc_ref[...],
                     preferred_element_type=jnp.float32) + bc_ref[...]
    o_ref[...] = logits


def conv3x3_bn_relu_pool_fc(x_nhwc, w_hwio, scale, shift, wc, bc):
    N, H, W, cin = x_nhwc.shape
    cout = w_hwio.shape[-1]
    nclass = wc.shape[-1]
    Wp = W + 2
    rows_in = (H + 3) * Wp
    rows_out = H * Wp

    x_flat = _pad_and_flatten(x_nhwc.astype(jnp.bfloat16))
    w = w_hwio.reshape(9, cin, cout).astype(jnp.bfloat16)
    col = jnp.arange(rows_out, dtype=jnp.int32) % Wp
    mask = (col < W).astype(jnp.float32).reshape(rows_out, 1)
    wc_f = wc.astype(jnp.float32)
    bc_f = bc.reshape(1, nclass).astype(jnp.float32)

    kern = functools.partial(_conv_bn_relu_pool_fc_kernel,
                             H=H, W=W, Wp=Wp, cout=cout)
    out = pl.pallas_call(
        kern,
        out_shape=jax.ShapeDtypeStruct((N, 1, nclass), jnp.float32),
        grid_spec=pltpu.PrefetchScalarGridSpec(
            num_scalar_prefetch=0,
            grid=(N,),
            in_specs=[
                pl.BlockSpec((None, rows_in, cin), lambda n: (n, 0, 0)),
                pl.BlockSpec((9, cin, cout), lambda n: (0, 0, 0)),
                pl.BlockSpec((1, cout), lambda n: (0, 0)),
                pl.BlockSpec((1, cout), lambda n: (0, 0)),
                pl.BlockSpec((rows_out, 1), lambda n: (0, 0)),
                pl.BlockSpec((cout, nclass), lambda n: (0, 0)),
                pl.BlockSpec((1, nclass), lambda n: (0, 0)),
            ],
            out_specs=pl.BlockSpec((None, 1, nclass), lambda n: (n, 0, 0)),
        ),
        compiler_params=pltpu.CompilerParams(
            dimension_semantics=("parallel",)),
    )(x_flat, w, scale, shift, mask, wc_f, bc_f)
    return out.reshape(N, nclass)


# ------------------------------- forward --------------------------------------

def test_model_forward(x_nchw, params):
    x = jnp.transpose(x_nchw, (0, 2, 3, 1))                 # NCHW -> NHWC
    w1, b1, g1, be1, m1, v1 = params['conv1']
    w2, b2, g2, be2, m2, v2 = params['conv2']
    wc, bc = params['fc']
    s1, sh1 = _fold_bn(g1, be1, m1, v1, b1)
    s2, sh2 = _fold_bn(g2, be2, m2, v2, b2)
    h = conv3x3_bn_relu(x, w1, s1, sh1)                     # (N,H,W,64) bf16
    return conv3x3_bn_relu_pool_fc(h, w2, s2, sh2, wc, bc)  # (N,10) f32


# --------------------------- f32 reference (XLA) -------------------------------

def reference_forward(x_nchw, params, eps=1e-5):
    x = jnp.transpose(x_nchw, (0, 2, 3, 1)).astype(jnp.float32)

    def conv_bn_relu_ref(h, w, b, g, be, m, v):
        y = lax.conv_general_dilated(h, w, window_strides=(1, 1),
                                     padding='SAME',
                                     dimension_numbers=('NHWC', 'HWIO', 'NHWC'))
        y = y + b
        y = g * (y - m) / jnp.sqrt(v + eps) + be
        return jnp.maximum(y, 0.0)

    h = conv_bn_relu_ref(x, *params['conv1'])
    h = conv_bn_relu_ref(h, *params['conv2'])
    pooled = jnp.mean(h, axis=(1, 2))
    wc, bc = params['fc']
    return pooled @ wc + bc


# --------------------------------- main ----------------------------------------

if __name__ == "__main__":
    key = jax.random.PRNGKey(0)
    keys = jax.random.split(key, 16)
    N, H, W = 2, 16, 16
    x = jax.random.normal(keys[0], (N, 3, H, W), jnp.float32)

    def conv_params(kw_, kb_, kg_, kbe_, km_, kv_, cin, cout):
        std = math.sqrt(2.0 / (9 * cin))
        w = std * jax.random.normal(kw_, (3, 3, cin, cout), jnp.float32)
        b = 0.01 * jax.random.normal(kb_, (cout,), jnp.float32)
        gamma = 1.0 + 0.1 * jax.random.normal(kg_, (cout,), jnp.float32)
        beta = 0.1 * jax.random.normal(kbe_, (cout,), jnp.float32)
        mean = 0.1 * jax.random.normal(km_, (cout,), jnp.float32)
        var = jax.random.uniform(kv_, (cout,), jnp.float32, minval=0.5, maxval=1.5)
        return (w, b, gamma, beta, mean, var)

    params = {
        'conv1': conv_params(*keys[1:7], 3, 64),
        'conv2': conv_params(*keys[7:13], 64, 64),
        'fc': (math.sqrt(1.0 / 64) * jax.random.normal(keys[13], (64, 10), jnp.float32),
               0.01 * jax.random.normal(keys[14], (10,), jnp.float32)),
    }

    out = jax.jit(test_model_forward)(x, params)
    out = jax.block_until_ready(out)
    assert out.shape == (N, 10)
    assert bool(jnp.all(jnp.isfinite(out)))

    ref = jax.block_until_ready(reference_forward(x, params))
    max_err = float(jnp.max(jnp.abs(out - ref)))
    assert max_err < 0.2, f"max abs err vs f32 reference: {max_err}"

    print("KERNEL_OK")
</pallas_src>

<mosaic_0001>
module attributes {stable_mosaic.version = 11 : i64} {
  func.func @_conv_bn_relu_kernel(%arg0: i32, %arg1: memref<1x342x3xbf16, #tpu.memory_space<vmem>>, %arg2: memref<9x3x64xbf16, #tpu.memory_space<vmem>>, %arg3: memref<1x64xf32, #tpu.memory_space<vmem>>, %arg4: memref<1x64xf32, #tpu.memory_space<vmem>>, %arg5: memref<1x288x64xbf16, #tpu.memory_space<vmem>>) attributes {dimension_semantics = [#tpu.dimension_semantics<parallel>], iteration_bounds = array<i64: 2>, scalar_prefetch = 0 : i64, scratch_operands = 0 : i64, tpu.core_type = #tpu.core_type<tc>, window_params = [{transform_indices = @transform_0, window_bounds = array<i64: 1, 342, 3>}, {pipeline_mode = #tpu.pipeline_mode<synchronous>, transform_indices = @transform_1, window_bounds = array<i64: 9, 3, 64>}, {pipeline_mode = #tpu.pipeline_mode<synchronous>, transform_indices = @transform_2, window_bounds = array<i64: 1, 64>}, {pipeline_mode = #tpu.pipeline_mode<synchronous>, transform_indices = @transform_3, window_bounds = array<i64: 1, 64>}, {transform_indices = @transform_4, window_bounds = array<i64: 1, 288, 64>}]} {
    %cst = arith.constant 0.000000e+00 : f32
    %0 = vector.broadcast %cst : f32 to vector<288x64xf32>
    %c0 = arith.constant 0 : index
    %c0_0 = arith.constant 0 : index
    %c0_1 = arith.constant 0 : index
    %1 = vector.load %arg1[%c0, %c0_0, %c0_1] : memref<1x342x3xbf16, #tpu.memory_space<vmem>>, vector<1x288x3xbf16>
    %2 = vector.shape_cast %1 : vector<1x288x3xbf16> to vector<288x3xbf16>
    %c0_2 = arith.constant 0 : index
    %c0_3 = arith.constant 0 : index
    %c0_4 = arith.constant 0 : index
    %3 = vector.load %arg2[%c0_2, %c0_3, %c0_4] : memref<9x3x64xbf16, #tpu.memory_space<vmem>>, vector<1x3x64xbf16>
    %4 = vector.shape_cast %3 : vector<1x3x64xbf16> to vector<3x64xbf16>
    %cst_5 = arith.constant dense<0.000000e+00> : vector<288x64xf32>
    %5 = tpu.matmul %2, %4, %cst_5 {dimension_numbers = #tpu.dot_dimension_numbers<[1], [0], [0], [1], [0, 0, 1, 1], [], []>} : vector<288x3xbf16>, vector<3x64xbf16>, vector<288x64xf32> -> vector<288x64xf32>
    %6 = arith.addf %0, %5 : vector<288x64xf32>
    %c0_6 = arith.constant 0 : index
    %c1 = arith.constant 1 : index
    %c0_7 = arith.constant 0 : index
    %7 = vector.load %arg1[%c0_6, %c1, %c0_7] : memref<1x342x3xbf16, #tpu.memory_space<vmem>>, vector<1x288x3xbf16>
    %8 = vector.shape_cast %7 : vector<1x288x3xbf16> to vector<288x3xbf16>
    %c1_8 = arith.constant 1 : index
    %c0_9 = arith.constant 0 : index
    %c0_10 = arith.constant 0 : index
    %9 = vector.load %arg2[%c1_8, %c0_9, %c0_10] : memref<9x3x64xbf16, #tpu.memory_space<vmem>>, vector<1x3x64xbf16>
    %10 = vector.shape_cast %9 : vector<1x3x64xbf16> to vector<3x64xbf16>
    %cst_11 = arith.constant dense<0.000000e+00> : vector<288x64xf32>
    %11 = tpu.matmul %8, %10, %cst_11 {dimension_numbers = #tpu.dot_dimension_numbers<[1], [0], [0], [1], [0, 0, 1, 1], [], []>} : vector<288x3xbf16>, vector<3x64xbf16>, vector<288x64xf32> -> vector<288x64xf32>
    %12 = arith.addf %6, %11 : vector<288x64xf32>
    %c0_12 = arith.constant 0 : index
    %c2 = arith.constant 2 : index
    %c0_13 = arith.constant 0 : index
    %13 = vector.load %arg1[%c0_12, %c2, %c0_13] : memref<1x342x3xbf16, #tpu.memory_space<vmem>>, vector<1x288x3xbf16>
    %14 = vector.shape_cast %13 : vector<1x288x3xbf16> to vector<288x3xbf16>
    %c2_14 = arith.constant 2 : index
    %c0_15 = arith.constant 0 : index
    %c0_16 = arith.constant 0 : index
    %15 = vector.load %arg2[%c2_14, %c0_15, %c0_16] : memref<9x3x64xbf16, #tpu.memory_space<vmem>>, vector<1x3x64xbf16>
    %16 = vector.shape_cast %15 : vector<1x3x64xbf16> to vector<3x64xbf16>
    %cst_17 = arith.constant dense<0.000000e+00> : vector<288x64xf32>
    %17 = tpu.matmul %14, %16, %cst_17 {dimension_numbers = #tpu.dot_dimension_numbers<[1], [0], [0], [1], [0, 0, 1, 1], [], []>} : vector<288x3xbf16>, vector<3x64xbf16>, vector<288x64xf32> -> vector<288x64xf32>
    %18 = arith.addf %12, %17 : vector<288x64xf32>
    %c0_18 = arith.constant 0 : index
    %c18 = arith.constant 18 : index
    %c0_19 = arith.constant 0 : index
    %19 = vector.load %arg1[%c0_18, %c18, %c0_19] : memref<1x342x3xbf16, #tpu.memory_space<vmem>>, vector<1x288x3xbf16>
    %20 = vector.shape_cast %19 : vector<1x288x3xbf16> to vector<288x3xbf16>
    %c3 = arith.constant 3 : index
    %c0_20 = arith.constant 0 : index
    %c0_21 = arith.constant 0 : index
    %21 = vector.load %arg2[%c3, %c0_20, %c0_21] : memref<9x3x64xbf16, #tpu.memory_space<vmem>>, vector<1x3x64xbf16>
    %22 = vector.shape_cast %21 : vector<1x3x64xbf16> to vector<3x64xbf16>
    %cst_22 = arith.constant dense<0.000000e+00> : vector<288x64xf32>
    %23 = tpu.matmul %20, %22, %cst_22 {dimension_numbers = #tpu.dot_dimension_numbers<[1], [0], [0], [1], [0, 0, 1, 1], [], []>} : vector<288x3xbf16>, vector<3x64xbf16>, vector<288x64xf32> -> vector<288x64xf32>
    %24 = arith.addf %18, %23 : vector<288x64xf32>
    %c0_23 = arith.constant 0 : index
    %c19 = arith.constant 19 : index
    %c0_24 = arith.constant 0 : index
    %25 = vector.load %arg1[%c0_23, %c19, %c0_24] : memref<1x342x3xbf16, #tpu.memory_space<vmem>>, vector<1x288x3xbf16>
    %26 = vector.shape_cast %25 : vector<1x288x3xbf16> to vector<288x3xbf16>
    %c4 = arith.constant 4 : index
    %c0_25 = arith.constant 0 : index
    %c0_26 = arith.constant 0 : index
    %27 = vector.load %arg2[%c4, %c0_25, %c0_26] : memref<9x3x64xbf16, #tpu.memory_space<vmem>>, vector<1x3x64xbf16>
    %28 = vector.shape_cast %27 : vector<1x3x64xbf16> to vector<3x64xbf16>
    %cst_27 = arith.constant dense<0.000000e+00> : vector<288x64xf32>
    %29 = tpu.matmul %26, %28, %cst_27 {dimension_numbers = #tpu.dot_dimension_numbers<[1], [0], [0], [1], [0, 0, 1, 1], [], []>} : vector<288x3xbf16>, vector<3x64xbf16>, vector<288x64xf32> -> vector<288x64xf32>
    %30 = arith.addf %24, %29 : vector<288x64xf32>
    %c0_28 = arith.constant 0 : index
    %c20 = arith.constant 20 : index
    %c0_29 = arith.constant 0 : index
    %31 = vector.load %arg1[%c0_28, %c20, %c0_29] : memref<1x342x3xbf16, #tpu.memory_space<vmem>>, vector<1x288x3xbf16>
    %32 = vector.shape_cast %31 : vector<1x288x3xbf16> to vector<288x3xbf16>
    %c5 = arith.constant 5 : index
    %c0_30 = arith.constant 0 : index
    %c0_31 = arith.constant 0 : index
    %33 = vector.load %arg2[%c5, %c0_30, %c0_31] : memref<9x3x64xbf16, #tpu.memory_space<vmem>>, vector<1x3x64xbf16>
    %34 = vector.shape_cast %33 : vector<1x3x64xbf16> to vector<3x64xbf16>
    %cst_32 = arith.constant dense<0.000000e+00> : vector<288x64xf32>
    %35 = tpu.matmul %32, %34, %cst_32 {dimension_numbers = #tpu.dot_dimension_numbers<[1], [0], [0], [1], [0, 0, 1, 1], [], []>} : vector<288x3xbf16>, vector<3x64xbf16>, vector<288x64xf32> -> vector<288x64xf32>
    %36 = arith.addf %30, %35 : vector<288x64xf32>
    %c0_33 = arith.constant 0 : index
    %c36 = arith.constant 36 : index
    %c0_34 = arith.constant 0 : index
    %37 = vector.load %arg1[%c0_33, %c36, %c0_34] : memref<1x342x3xbf16, #tpu.memory_space<vmem>>, vector<1x288x3xbf16>
    %38 = vector.shape_cast %37 : vector<1x288x3xbf16> to vector<288x3xbf16>
    %c6 = arith.constant 6 : index
    %c0_35 = arith.constant 0 : index
    %c0_36 = arith.constant 0 : index
    %39 = vector.load %arg2[%c6, %c0_35, %c0_36] : memref<9x3x64xbf16, #tpu.memory_space<vmem>>, vector<1x3x64xbf16>
    %40 = vector.shape_cast %39 : vector<1x3x64xbf16> to vector<3x64xbf16>
    %cst_37 = arith.constant dense<0.000000e+00> : vector<288x64xf32>
    %41 = tpu.matmul %38, %40, %cst_37 {dimension_numbers = #tpu.dot_dimension_numbers<[1], [0], [0], [1], [0, 0, 1, 1], [], []>} : vector<288x3xbf16>, vector<3x64xbf16>, vector<288x64xf32> -> vector<288x64xf32>
    %42 = arith.addf %36, %41 : vector<288x64xf32>
    %c0_38 = arith.constant 0 : index
    %c37 = arith.constant 37 : index
    %c0_39 = arith.constant 0 : index
    %43 = vector.load %arg1[%c0_38, %c37, %c0_39] : memref<1x342x3xbf16, #tpu.memory_space<vmem>>, vector<1x288x3xbf16>
    %44 = vector.shape_cast %43 : vector<1x288x3xbf16> to vector<288x3xbf16>
    %c7 = arith.constant 7 : index
    %c0_40 = arith.constant 0 : index
    %c0_41 = arith.constant 0 : index
    %45 = vector.load %arg2[%c7, %c0_40, %c0_41] : memref<9x3x64xbf16, #tpu.memory_space<vmem>>, vector<1x3x64xbf16>
    %46 = vector.shape_cast %45 : vector<1x3x64xbf16> to vector<3x64xbf16>
    %cst_42 = arith.constant dense<0.000000e+00> : vector<288x64xf32>
    %47 = tpu.matmul %44, %46, %cst_42 {dimension_numbers = #tpu.dot_dimension_numbers<[1], [0], [0], [1], [0, 0, 1, 1], [], []>} : vector<288x3xbf16>, vector<3x64xbf16>, vector<288x64xf32> -> vector<288x64xf32>
    %48 = arith.addf %42, %47 : vector<288x64xf32>
    %c0_43 = arith.constant 0 : index
    %c38 = arith.constant 38 : index
    %c0_44 = arith.constant 0 : index
    %49 = vector.load %arg1[%c0_43, %c38, %c0_44] : memref<1x342x3xbf16, #tpu.memory_space<vmem>>, vector<1x288x3xbf16>
    %50 = vector.shape_cast %49 : vector<1x288x3xbf16> to vector<288x3xbf16>
    %c8 = arith.constant 8 : index
    %c0_45 = arith.constant 0 : index
    %c0_46 = arith.constant 0 : index
    %51 = vector.load %arg2[%c8, %c0_45, %c0_46] : memref<9x3x64xbf16, #tpu.memory_space<vmem>>, vector<1x3x64xbf16>
    %52 = vector.shape_cast %51 : vector<1x3x64xbf16> to vector<3x64xbf16>
    %cst_47 = arith.constant dense<0.000000e+00> : vector<288x64xf32>
    %53 = tpu.matmul %50, %52, %cst_47 {dimension_numbers = #tpu.dot_dimension_numbers<[1], [0], [0], [1], [0, 0, 1, 1], [], []>} : vector<288x3xbf16>, vector<3x64xbf16>, vector<288x64xf32> -> vector<288x64xf32>
    %54 = arith.addf %48, %53 : vector<288x64xf32>
    %c0_48 = arith.constant 0 : index
    %c0_49 = arith.constant 0 : index
    %55 = vector.load %arg3[%c0_48, %c0_49] : memref<1x64xf32, #tpu.memory_space<vmem>>, vector<1x64xf32>
    %56 = vector.broadcast %55 : vector<1x64xf32> to vector<288x64xf32>
    %57 = arith.mulf %54, %56 : vector<288x64xf32>
    %c0_50 = arith.constant 0 : index
    %c0_51 = arith.constant 0 : index
    %58 = vector.load %arg4[%c0_50, %c0_51] : memref<1x64xf32, #tpu.memory_space<vmem>>, vector<1x64xf32>
    %59 = vector.broadcast %58 : vector<1x64xf32> to vector<288x64xf32>
    %60 = arith.addf %57, %59 : vector<288x64xf32>
    %cst_52 = arith.constant 0.000000e+00 : f32
    %61 = vector.broadcast %cst_52 : f32 to vector<288x64xf32>
    %62 = arith.maximumf %60, %61 : vector<288x64xf32>
    %63 = arith.truncf %62 : vector<288x64xf32> to vector<288x64xbf16>
    %c0_53 = arith.constant 0 : index
    %c0_54 = arith.constant 0 : index
    %c0_55 = arith.constant 0 : index
    %64 = vector.load %arg5[%c0_53, %c0_54, %c0_55] : memref<1x288x64xbf16, #tpu.memory_space<vmem>>, vector<1x288x64xbf16>
    %65 = vector.shape_cast %64 : vector<1x288x64xbf16> to vector<288x64xbf16>
    %66 = vector.shape_cast %63 : vector<288x64xbf16> to vector<1x288x64xbf16>
    tpu.vector_store %arg5[%c0_53, %c0_54, %c0_55], %66 {strides = array<i32>} : memref<1x288x64xbf16, #tpu.memory_space<vmem>>, vector<1x288x64xbf16>,
    return
  }
  func.func @transform_0(%arg0: i32) -> (i32, i32, i32) {
    %c0_i32 = arith.constant 0 : i32
    %c0_i32_0 = arith.constant 0 : i32
    %c0_i32_1 = arith.constant 0 : i32
    return %arg0, %c0_i32, %c0_i32_0 : i32, i32, i32
  }
  func.func @transform_1(%arg0: i32) -> (i32, i32, i32) {
    %c0_i32 = arith.constant 0 : i32
    %c0_i32_0 = arith.constant 0 : i32
    %c0_i32_1 = arith.constant 0 : i32
    %c0_i32_2 = arith.constant 0 : i32
    return %c0_i32, %c0_i32_0, %c0_i32_1 : i32, i32, i32
  }
  func.func @transform_2(%arg0: i32) -> (i32, i32) {
    %c0_i32 = arith.constant 0 : i32
    %c0_i32_0 = arith.constant 0 : i32
    %c0_i32_1 = arith.constant 0 : i32
    return %c0_i32, %c0_i32_0 : i32, i32
  }
  func.func @transform_3(%arg0: i32) -> (i32, i32) {
    %c0_i32 = arith.constant 0 : i32
    %c0_i32_0 = arith.constant 0 : i32
    %c0_i32_1 = arith.constant 0 : i32
    return %c0_i32, %c0_i32_0 : i32, i32
  }
  func.func @transform_4(%arg0: i32) -> (i32, i32, i32) {
    %c0_i32 = arith.constant 0 : i32
    %c0_i32_0 = arith.constant 0 : i32
    %c0_i32_1 = arith.constant 0 : i32
    return %arg0, %c0_i32, %c0_i32_0 : i32, i32, i32
  }
}

module attributes {stable_mosaic.version = 11 : i64} {
  func.func @_conv_bn_relu_pool_fc_kernel(%arg0: i32, %arg1: memref<1x342x64xbf16, #tpu.memory_space<vmem>>, %arg2: memref<9x64x64xbf16, #tpu.memory_space<vmem>>, %arg3: memref<1x64xf32, #tpu.memory_space<vmem>>, %arg4: memref<1x64xf32, #tpu.memory_space<vmem>>, %arg5: memref<288x1xf32, #tpu.memory_space<vmem>>, %arg6: memref<64x10xf32, #tpu.memory_space<vmem>>, %arg7: memref<1x10xf32, #tpu.memory_space<vmem>>, %arg8: memref<1x1x10xf32, #tpu.memory_space<vmem>>) attributes {dimension_semantics = [#tpu.dimension_semantics<parallel>], iteration_bounds = array<i64: 2>, scalar_prefetch = 0 : i64, scratch_operands = 0 : i64, tpu.core_type = #tpu.core_type<tc>, window_params = [{transform_indices = @transform_0, window_bounds = array<i64: 1, 342, 64>}, {pipeline_mode = #tpu.pipeline_mode<synchronous>, transform_indices = @transform_1, window_bounds = array<i64: 9, 64, 64>}, {pipeline_mode = #tpu.pipeline_mode<synchronous>, transform_indices = @transform_2, window_bounds = array<i64: 1, 64>}, {pipeline_mode = #tpu.pipeline_mode<synchronous>, transform_indices = @transform_3, window_bounds = array<i64: 1, 64>}, {pipeline_mode = #tpu.pipeline_mode<synchronous>, transform_indices = @transform_4, window_bounds = array<i64: 288, 1>}, {pipeline_mode = #tpu.pipeline_mode<synchronous>, transform_indices = @transform_5, window_bounds = array<i64: 64, 10>}, {pipeline_mode = #tpu.pipeline_mode<synchronous>, transform_indices = @transform_6, window_bounds = array<i64: 1, 10>}, {transform_indices = @transform_7, window_bounds = array<i64: 1, 1, 10>}]} {
    %cst = arith.constant 0.000000e+00 : f32
    %0 = vector.broadcast %cst : f32 to vector<288x64xf32>
    %c0 = arith.constant 0 : index
    %c0_0 = arith.constant 0 : index
    %c0_1 = arith.constant 0 : index
    %1 = vector.load %arg1[%c0, %c0_0, %c0_1] : memref<1x342x64xbf16, #tpu.memory_space<vmem>>, vector<1x288x64xbf16>
    %2 = vector.shape_cast %1 : vector<1x288x64xbf16> to vector<288x64xbf16>
    %c0_2 = arith.constant 0 : index
    %c0_3 = arith.constant 0 : index
    %c0_4 = arith.constant 0 : index
    %3 = vector.load %arg2[%c0_2, %c0_3, %c0_4] : memref<9x64x64xbf16, #tpu.memory_space<vmem>>, vector<1x64x64xbf16>
    %4 = vector.shape_cast %3 : vector<1x64x64xbf16> to vector<64x64xbf16>
    %cst_5 = arith.constant dense<0.000000e+00> : vector<288x64xf32>
    %5 = tpu.matmul %2, %4, %cst_5 {dimension_numbers = #tpu.dot_dimension_numbers<[1], [0], [0], [1], [0, 0, 1, 1], [], []>} : vector<288x64xbf16>, vector<64x64xbf16>, vector<288x64xf32> -> vector<288x64xf32>
    %6 = arith.addf %0, %5 : vector<288x64xf32>
    %c0_6 = arith.constant 0 : index
    %c1 = arith.constant 1 : index
    %c0_7 = arith.constant 0 : index
    %7 = vector.load %arg1[%c0_6, %c1, %c0_7] : memref<1x342x64xbf16, #tpu.memory_space<vmem>>, vector<1x288x64xbf16>
    %8 = vector.shape_cast %7 : vector<1x288x64xbf16> to vector<288x64xbf16>
    %c1_8 = arith.constant 1 : index
    %c0_9 = arith.constant 0 : index
    %c0_10 = arith.constant 0 : index
    %9 = vector.load %arg2[%c1_8, %c0_9, %c0_10] : memref<9x64x64xbf16, #tpu.memory_space<vmem>>, vector<1x64x64xbf16>
    %10 = vector.shape_cast %9 : vector<1x64x64xbf16> to vector<64x64xbf16>
    %cst_11 = arith.constant dense<0.000000e+00> : vector<288x64xf32>
    %11 = tpu.matmul %8, %10, %cst_11 {dimension_numbers = #tpu.dot_dimension_numbers<[1], [0], [0], [1], [0, 0, 1, 1], [], []>} : vector<288x64xbf16>, vector<64x64xbf16>, vector<288x64xf32> -> vector<288x64xf32>
    %12 = arith.addf %6, %11 : vector<288x64xf32>
    %c0_12 = arith.constant 0 : index
    %c2 = arith.constant 2 : index
    %c0_13 = arith.constant 0 : index
    %13 = vector.load %arg1[%c0_12, %c2, %c0_13] : memref<1x342x64xbf16, #tpu.memory_space<vmem>>, vector<1x288x64xbf16>
    %14 = vector.shape_cast %13 : vector<1x288x64xbf16> to vector<288x64xbf16>
    %c2_14 = arith.constant 2 : index
    %c0_15 = arith.constant 0 : index
    %c0_16 = arith.constant 0 : index
    %15 = vector.load %arg2[%c2_14, %c0_15, %c0_16] : memref<9x64x64xbf16, #tpu.memory_space<vmem>>, vector<1x64x64xbf16>
    %16 = vector.shape_cast %15 : vector<1x64x64xbf16> to vector<64x64xbf16>
    %cst_17 = arith.constant dense<0.000000e+00> : vector<288x64xf32>
    %17 = tpu.matmul %14, %16, %cst_17 {dimension_numbers = #tpu.dot_dimension_numbers<[1], [0], [0], [1], [0, 0, 1, 1], [], []>} : vector<288x64xbf16>, vector<64x64xbf16>, vector<288x64xf32> -> vector<288x64xf32>
    %18 = arith.addf %12, %17 : vector<288x64xf32>
    %c0_18 = arith.constant 0 : index
    %c18 = arith.constant 18 : index
    %c0_19 = arith.constant 0 : index
    %19 = vector.load %arg1[%c0_18, %c18, %c0_19] : memref<1x342x64xbf16, #tpu.memory_space<vmem>>, vector<1x288x64xbf16>
    %20 = vector.shape_cast %19 : vector<1x288x64xbf16> to vector<288x64xbf16>
    %c3 = arith.constant 3 : index
    %c0_20 = arith.constant 0 : index
    %c0_21 = arith.constant 0 : index
    %21 = vector.load %arg2[%c3, %c0_20, %c0_21] : memref<9x64x64xbf16, #tpu.memory_space<vmem>>, vector<1x64x64xbf16>
    %22 = vector.shape_cast %21 : vector<1x64x64xbf16> to vector<64x64xbf16>
    %cst_22 = arith.constant dense<0.000000e+00> : vector<288x64xf32>
    %23 = tpu.matmul %20, %22, %cst_22 {dimension_numbers = #tpu.dot_dimension_numbers<[1], [0], [0], [1], [0, 0, 1, 1], [], []>} : vector<288x64xbf16>, vector<64x64xbf16>, vector<288x64xf32> -> vector<288x64xf32>
    %24 = arith.addf %18, %23 : vector<288x64xf32>
    %c0_23 = arith.constant 0 : index
    %c19 = arith.constant 19 : index
    %c0_24 = arith.constant 0 : index
    %25 = vector.load %arg1[%c0_23, %c19, %c0_24] : memref<1x342x64xbf16, #tpu.memory_space<vmem>>, vector<1x288x64xbf16>
    %26 = vector.shape_cast %25 : vector<1x288x64xbf16> to vector<288x64xbf16>
    %c4 = arith.constant 4 : index
    %c0_25 = arith.constant 0 : index
    %c0_26 = arith.constant 0 : index
    %27 = vector.load %arg2[%c4, %c0_25, %c0_26] : memref<9x64x64xbf16, #tpu.memory_space<vmem>>, vector<1x64x64xbf16>
    %28 = vector.shape_cast %27 : vector<1x64x64xbf16> to vector<64x64xbf16>
    %cst_27 = arith.constant dense<0.000000e+00> : vector<288x64xf32>
    %29 = tpu.matmul %26, %28, %cst_27 {dimension_numbers = #tpu.dot_dimension_numbers<[1], [0], [0], [1], [0, 0, 1, 1], [], []>} : vector<288x64xbf16>, vector<64x64xbf16>, vector<288x64xf32> -> vector<288x64xf32>
    %30 = arith.addf %24, %29 : vector<288x64xf32>
    %c0_28 = arith.constant 0 : index
    %c20 = arith.constant 20 : index
    %c0_29 = arith.constant 0 : index
    %31 = vector.load %arg1[%c0_28, %c20, %c0_29] : memref<1x342x64xbf16, #tpu.memory_space<vmem>>, vector<1x288x64xbf16>
    %32 = vector.shape_cast %31 : vector<1x288x64xbf16> to vector<288x64xbf16>
    %c5 = arith.constant 5 : index
    %c0_30 = arith.constant 0 : index
    %c0_31 = arith.constant 0 : index
    %33 = vector.load %arg2[%c5, %c0_30, %c0_31] : memref<9x64x64xbf16, #tpu.memory_space<vmem>>, vector<1x64x64xbf16>
    %34 = vector.shape_cast %33 : vector<1x64x64xbf16> to vector<64x64xbf16>
    %cst_32 = arith.constant dense<0.000000e+00> : vector<288x64xf32>
    %35 = tpu.matmul %32, %34, %cst_32 {dimension_numbers = #tpu.dot_dimension_numbers<[1], [0], [0], [1], [0, 0, 1, 1], [], []>} : vector<288x64xbf16>, vector<64x64xbf16>, vector<288x64xf32> -> vector<288x64xf32>
    %36 = arith.addf %30, %35 : vector<288x64xf32>
    %c0_33 = arith.constant 0 : index
    %c36 = arith.constant 36 : index
    %c0_34 = arith.constant 0 : index
    %37 = vector.load %arg1[%c0_33, %c36, %c0_34] : memref<1x342x64xbf16, #tpu.memory_space<vmem>>, vector<1x288x64xbf16>
    %38 = vector.shape_cast %37 : vector<1x288x64xbf16> to vector<288x64xbf16>
    %c6 = arith.constant 6 : index
    %c0_35 = arith.constant 0 : index
    %c0_36 = arith.constant 0 : index
    %39 = vector.load %arg2[%c6, %c0_35, %c0_36] : memref<9x64x64xbf16, #tpu.memory_space<vmem>>, vector<1x64x64xbf16>
    %40 = vector.shape_cast %39 : vector<1x64x64xbf16> to vector<64x64xbf16>
    %cst_37 = arith.constant dense<0.000000e+00> : vector<288x64xf32>
    %41 = tpu.matmul %38, %40, %cst_37 {dimension_numbers = #tpu.dot_dimension_numbers<[1], [0], [0], [1], [0, 0, 1, 1], [], []>} : vector<288x64xbf16>, vector<64x64xbf16>, vector<288x64xf32> -> vector<288x64xf32>
    %42 = arith.addf %36, %41 : vector<288x64xf32>
    %c0_38 = arith.constant 0 : index
    %c37 = arith.constant 37 : index
    %c0_39 = arith.constant 0 : index
    %43 = vector.load %arg1[%c0_38, %c37, %c0_39] : memref<1x342x64xbf16, #tpu.memory_space<vmem>>, vector<1x288x64xbf16>
    %44 = vector.shape_cast %43 : vector<1x288x64xbf16> to vector<288x64xbf16>
    %c7 = arith.constant 7 : index
    %c0_40 = arith.constant 0 : index
    %c0_41 = arith.constant 0 : index
    %45 = vector.load %arg2[%c7, %c0_40, %c0_41] : memref<9x64x64xbf16, #tpu.memory_space<vmem>>, vector<1x64x64xbf16>
    %46 = vector.shape_cast %45 : vector<1x64x64xbf16> to vector<64x64xbf16>
    %cst_42 = arith.constant dense<0.000000e+00> : vector<288x64xf32>
    %47 = tpu.matmul %44, %46, %cst_42 {dimension_numbers = #tpu.dot_dimension_numbers<[1], [0], [0], [1], [0, 0, 1, 1], [], []>} : vector<288x64xbf16>, vector<64x64xbf16>, vector<288x64xf32> -> vector<288x64xf32>
    %48 = arith.addf %42, %47 : vector<288x64xf32>
    %c0_43 = arith.constant 0 : index
    %c38 = arith.constant 38 : index
    %c0_44 = arith.constant 0 : index
    %49 = vector.load %arg1[%c0_43, %c38, %c0_44] : memref<1x342x64xbf16, #tpu.memory_space<vmem>>, vector<1x288x64xbf16>
    %50 = vector.shape_cast %49 : vector<1x288x64xbf16> to vector<288x64xbf16>
    %c8 = arith.constant 8 : index
    %c0_45 = arith.constant 0 : index
    %c0_46 = arith.constant 0 : index
    %51 = vector.load %arg2[%c8, %c0_45, %c0_46] : memref<9x64x64xbf16, #tpu.memory_space<vmem>>, vector<1x64x64xbf16>
    %52 = vector.shape_cast %51 : vector<1x64x64xbf16> to vector<64x64xbf16>
    %cst_47 = arith.constant dense<0.000000e+00> : vector<288x64xf32>
    %53 = tpu.matmul %50, %52, %cst_47 {dimension_numbers = #tpu.dot_dimension_numbers<[1], [0], [0], [1], [0, 0, 1, 1], [], []>} : vector<288x64xbf16>, vector<64x64xbf16>, vector<288x64xf32> -> vector<288x64xf32>
    %54 = arith.addf %48, %53 : vector<288x64xf32>
    %c0_48 = arith.constant 0 : index
    %c0_49 = arith.constant 0 : index
    %55 = vector.load %arg3[%c0_48, %c0_49] : memref<1x64xf32, #tpu.memory_space<vmem>>, vector<1x64xf32>
    %56 = vector.broadcast %55 : vector<1x64xf32> to vector<288x64xf32>
    %57 = arith.mulf %54, %56 : vector<288x64xf32>
    %c0_50 = arith.constant 0 : index
    %c0_51 = arith.constant 0 : index
    %58 = vector.load %arg4[%c0_50, %c0_51] : memref<1x64xf32, #tpu.memory_space<vmem>>, vector<1x64xf32>
    %59 = vector.broadcast %58 : vector<1x64xf32> to vector<288x64xf32>
    %60 = arith.addf %57, %59 : vector<288x64xf32>
    %cst_52 = arith.constant 0.000000e+00 : f32
    %61 = vector.broadcast %cst_52 : f32 to vector<288x64xf32>
    %62 = arith.maximumf %60, %61 : vector<288x64xf32>
    %c0_53 = arith.constant 0 : index
    %c0_54 = arith.constant 0 : index
    %63 = vector.load %arg5[%c0_53, %c0_54] : memref<288x1xf32, #tpu.memory_space<vmem>>, vector<288x1xf32>
    %64 = vector.broadcast %63 : vector<288x1xf32> to vector<288x64xf32>
    %65 = arith.mulf %62, %64 : vector<288x64xf32>
    %cst_55 = arith.constant dense<0.000000e+00> : vector<64xf32>
    %66 = vector.multi_reduction <add>, %65, %cst_55 [0] : vector<288x64xf32> to vector<64xf32>
    %67 = vector.shape_cast %66 : vector<64xf32> to vector<1x64xf32>
    %cst_56 = arith.constant 3.906250e-03 : f32
    %68 = vector.broadcast %cst_56 : f32 to vector<1x64xf32>
    %69 = arith.mulf %67, %68 : vector<1x64xf32>
    %c0_57 = arith.constant 0 : index
    %c0_58 = arith.constant 0 : index
    %70 = vector.load %arg6[%c0_57, %c0_58] : memref<64x10xf32, #tpu.memory_space<vmem>>, vector<64x10xf32>
    %cst_59 = arith.constant dense<0.000000e+00> : vector<1x10xf32>
    %71 = tpu.matmul %69, %70, %cst_59 {dimension_numbers = #tpu.dot_dimension_numbers<[1], [0], [0], [1], [0, 0, 1, 1], [], []>} : vector<1x64xf32>, vector<64x10xf32>, vector<1x10xf32> -> vector<1x10xf32>
    %c0_60 = arith.constant 0 : index
    %c0_61 = arith.constant 0 : index
    %72 = vector.load %arg7[%c0_60, %c0_61] : memref<1x10xf32, #tpu.memory_space<vmem>>, vector<1x10xf32>
    %73 = arith.addf %71, %72 : vector<1x10xf32>
    %c0_62 = arith.constant 0 : index
    %c0_63 = arith.constant 0 : index
    %c0_64 = arith.constant 0 : index
    %74 = vector.load %arg8[%c0_62, %c0_63, %c0_64] : memref<1x1x10xf32, #tpu.memory_space<vmem>>, vector<1x1x10xf32>
    %75 = vector.shape_cast %74 : vector<1x1x10xf32> to vector<1x10xf32>
    %76 = vector.shape_cast %73 : vector<1x10xf32> to vector<1x1x10xf32>
    tpu.vector_store %arg8[%c0_62, %c0_63, %c0_64], %76 {strides = array<i32>} : memref<1x1x10xf32, #tpu.memory_space<vmem>>, vector<1x1x10xf32>,
    return
  }
  func.func @transform_0(%arg0: i32) -> (i32, i32, i32) {
    %c0_i32 = arith.constant 0 : i32
    %c0_i32_0 = arith.constant 0 : i32
    %c0_i32_1 = arith.constant 0 : i32
    return %arg0, %c0_i32, %c0_i32_0 : i32, i32, i32
  }
  func.func @transform_1(%arg0: i32) -> (i32, i32, i32) {
    %c0_i32 = arith.constant 0 : i32
    %c0_i32_0 = arith.constant 0 : i32
    %c0_i32_1 = arith.constant 0 : i32
    %c0_i32_2 = arith.constant 0 : i32
    return %c0_i32, %c0_i32_0, %c0_i32_1 : i32, i32, i32
  }
  func.func @transform_2(%arg0: i32) -> (i32, i32) {
    %c0_i32 = arith.constant 0 : i32
    %c0_i32_0 = arith.constant 0 : i32
    %c0_i32_1 = arith.constant 0 : i32
    return %c0_i32, %c0_i32_0 : i32, i32
  }
  func.func @transform_3(%arg0: i32) -> (i32, i32) {
    %c0_i32 = arith.constant 0 : i32
    %c0_i32_0 = arith.constant 0 : i32
    %c0_i32_1 = arith.constant 0 : i32
    return %c0_i32, %c0_i32_0 : i32, i32
  }
  func.func @transform_4(%arg0: i32) -> (i32, i32) {
    %c0_i32 = arith.constant 0 : i32
    %c0_i32_0 = arith.constant 0 : i32
    %c0_i32_1 = arith.constant 0 : i32
    return %c0_i32, %c0_i32_0 : i32, i32
  }
  func.func @transform_5(%arg0: i32) -> (i32, i32) {
    %c0_i32 = arith.constant 0 : i32
    %c0_i32_0 = arith.constant 0 : i32
    %c0_i32_1 = arith.constant 0 : i32
    return %c0_i32, %c0_i32_0 : i32, i32
  }
  func.func @transform_6(%arg0: i32) -> (i32, i32) {
    %c0_i32 = arith.constant 0 : i32
    %c0_i32_0 = arith.constant 0 : i32
    %c0_i32_1 = arith.constant 0 : i32
    return %c0_i32, %c0_i32_0 : i32, i32
  }
  func.func @transform_7(%arg0: i32) -> (i32, i32, i32) {
    %c0_i32 = arith.constant 0 : i32
    %c0_i32_0 = arith.constant 0 : i32
    %c0_i32_1 = arith.constant 0 : i32
    return %arg0, %c0_i32, %c0_i32_0 : i32, i32, i32
  }
}

</mosaic_0001>

<bundles_post_ra>
// kernel: test_model_forward.2
= control target key start
LH: loop header
LB: loop body
LE: loop exit
PB: predicated region body
PF: predicated region fallthrough
CT: control target
= control target key end

     0   :  { %s5243_s15 = smov 0   ;;  %s6252_s0 = inlined_call_operand.vmem [shape: bf16[2,342,3], index: 0, kind: input, shape index: {}]   ;;  %s6253_s1 = inlined_call_operand.vmem [shape: bf16[9,3,64], index: 1, kind: input, shape index: {}]   ;;  %s6254_s2 = inlined_call_operand.vmem [shape: f32[1,64], index: 2, kind: input, shape index: {}]   ;;  %s6255_s3 = inlined_call_operand.vmem [shape: f32[1,64], index: 3, kind: input, shape index: {}]   ;;  %s6256_s4 = inlined_call_operand.vmem [shape: bf16[2,288,64], index: 4, kind: output, shape index: {}]  }
   0x1 LB: > { %s4008_s16 = sadd.s32 4294967295, %s5215_s15   ;;  %p4012_p0 = scmp.ge.s32.totalorder %s5215_s15, 1  ;;  %s5215_s15 = sphi %s5243_s15, %s14_s15  }
   0x2   : > { %p162_p1 = scmp.lt.s32.totalorder %s5215_s15, 3 }
   0x4   : > { %p163_p2 = pnand %p4012_p0, %p162_p1 }
   0x5   : > { %vm536_vm0 = vcmask (!%p163_p2), 1040384   ;;  %vm537_vm1 = vcmask (!%p163_p2), 1041408   ;;  %v4129_v0 = vld [vmem:[%s6253_s1 + $0x8] sm:$0x3] (!%p163_p2)  ;;  %p188_p3 = scmp.lt.s32.totalorder (!%p163_p2), %s4008_s16, 1  ;;  %v5217_v1 = vmov (!%p163_p2), 65535  }
   0x6   : > { %166 = sbr.rel (%p163_p2) target bundleno = 577 (0x241), region = 36  ;;  %v538_v2 = vsel (!%p163_p2), %vm536_vm0, 4294967295, %v5217_v1  ;;  %v4015_v3 = vld [vmem:[%s6253_s1 + $0x2] sm:$0x3] (!%p163_p2)  ;;  %v4149_v5 = vld [vmem:[%s6253_s1 + $0xa] sm:$0x3] (!%p163_p2) }
   0x7   : > { %v5257_v4 = vsel (!%p163_p2), %vm537_vm1, %v538_v2, 0  ;;  %v235_v9 = vld [vmem:[%s6253_s1] sm:$0x3] (!%p163_p2)  ;;  %vm332_vm2 = vsmask.f32 (!%p163_p2), 7424  ;;  %vm481_vm3 = vcmask (!%p163_p2), 23552  }
   0x8   : > { %v5265_v6 = vand.u32 (!%p163_p2), %v4129_v0, %v5257_v4  ;;  %v541_v7 = vand.u32 (!%p163_p2), %v4015_v3, %v5257_v4  ;;  %v5269_v8 = vand.u32 (!%p163_p2), %v4149_v5, %v5257_v4  ;;  %v5276_v10 = vand.u32 (!%p163_p2), %v5257_v4, %v235_v9  ;;  %v4169_v11 = vld [vmem:[%s6253_s1 + $0xc] sm:$0x3] (!%p163_p2)  ;;  %v4071_v17 = vld [vmem:[%s6253_s1 + $0x4] sm:$0x3] (!%p163_p2) }
   0x9   : > { %vm1695_vm4 = vsmask.f32 (!%p163_p2), 6400  ;;  %v5321_v26 = vand.u32 (!%p163_p2), %v4169_v11, %v5257_v4  ;;  %v5332_v35 = vand.u32 (!%p163_p2), %v4071_v17, %v5257_v4  ;;  %vm2142_vm5 = vcmask (!%p163_p2), 1045504  }
   0xa   : > { %4646 = vmatprep.subr.bf16.mxu0 (!%p163_p2), %v5265_v6  ;;  %4494 = vmatprep.subr.bf16.mxu1 (!%p163_p2), %v541_v7  ;;  %vm942_vm6 = vcmask (!%p163_p2), 1046528   ;;  %vm2895_vm7 = vsmask.f32 (!%p163_p2), 5376  ;;  %vm3342_vm8 = vcmask (!%p163_p2), 1044480   ;;  %vm3916_vm9 = vcmask (!%p163_p2), 519168  }
   0xb   : > { %4647 = vmatpush3.bf16.msra.mxu0 (!%p163_p2), %v5265_v6  ;;  %4495 = vmatpush3.bf16.msra.mxu1 (!%p163_p2), %v541_v7 }
   0xc   : > { %4684 = vmatprep.subr.bf16.mxu0 (!%p163_p2), %v5269_v8  ;;  %4532 = vmatprep.subr.bf16.mxu1 (!%p163_p2), %v5276_v10 }
   0xd   : > { %s6258_s16 = smov (!%p188_p3, %s4008_s16), 1 }
   0xe   : > { %s5126_s25 = smul.u32 172, %s6258_s16 }
   0xf   : > { %s5127_s19 = smul.u32 144, %s6258_s16 }
  0x10   : > { %s5283_s28 = scalar_lea.vmem %s6252_s0, %s5126_s25 }
  0x11   : > { %v199_v12 = vld [vmem:[%s5283_s28] sm:$0xf]  ;;  %v5290_v13 = vld [vmem:[%s5283_s28 + $0x4] sm:$0xf]  ;;  %v5298_v15 = vld [vmem:[%s5283_s28 + $0x8] sm:$0xff]   ;;  %s6098_s22 = scalar_lea.vmem %s6256_s4, %s5127_s19 }
  0x12   : > { %v5295_v14 = vcombine.low %v199_v12, %v5290_v13  ;;  %v1250_v16 = vld [vmem:[%s5283_s28 + $0x8] sm:$0xe]  ;;  %v5305_v18 = vld [vmem:[%s5283_s28 + $0xc] sm:$0xf]  ;;  %v341_v21 = vshll.u32 %v5298_v15, 16  ;;  %v345_v22 = vshrl.u32 %v5298_v15, 16 }
  0x13   : > { %v5312_v23 = vld [vmem:[%s5283_s28 + $0x10] sm:$0xff]   ;;  %v5318_v25 = vcombine.low %v1250_v16, %v5305_v18  ;;  %v5329_v34 = vld [vmem:[%s5283_s28 + $0x18] sm:$0xff]   ;;  %v5338_v41 = vld [vmem:[%s5283_s28 + $0x20] sm:$0xff]  }
  0x14   : > { %v334_v19 = vshrl.u32 %v5295_v14, 16  ;;  %v336_v20 = vshll.u32 %v5295_v14, 16  ;;  %v5315_v24 = vld [vmem:[%s5283_s28 + $0x10] sm:$0xff]   ;;  %v343_v28 = vrot.slane %v341_v21, 1  ;;  %v1705_v29 = vshrl.u32 %v5312_v23, 16  ;;  %v5335_v40 = vld [vmem:[%s5283_s28 + $0x18] sm:$0xff]  }
  0x15   : > { %v1708_v30 = vshll.u32 %v5312_v23, 16  ;;  %v1697_v31 = vshrl.u32 %v5318_v25, 16  ;;  %v1700_v32 = vshll.u32 %v5318_v25, 16  ;;  %v349_v33 = vshll.u32 %v5315_v24, 16  ;;  %v5348_v54 = vld [vmem:[%s5283_s28 + $0x20] sm:$0xff]   ;;  %v5351_v55 = vld [vmem:[%s5283_s28 + $0x28] sm:$0xff]  }
  0x16   : > { %v338_v27 = vrot.slane %v336_v20, 1  ;;  %v347_v37 = vor.u32 %v345_v22, %v343_v28  ;;  %v1707_v38 = vrot.slane %v1705_v29, 1  ;;  %v1714_v45 = vshrl.u32 %v5329_v34, 16  ;;  %v5357_v60 = vld [vmem:[%s5283_s28 + $0x28] sm:$0xff]   ;;  %v5364_v1 = vld [vmem:[%s5283_s28 + $0x30] sm:$0xff]  }
  0x17   : > { %v1710_v39 = vrot.slane %v1708_v30, 2  ;;  %v1699_v42 = vrot.slane %v1697_v31, 1  ;;  %v1702_v43 = vrot.slane %v1700_v32, 2  ;;  %v351_v44 = vrot.slane %v349_v33, 1  ;;  %v5369_v9 = vld [vmem:[%s5283_s28 + $0x30] sm:$0xff]   ;;  %v5382_v30 = vld [vmem:[%s5283_s28 + $0x38] sm:$0xff]  }
  0x18   : > { %v339_v36 = vor.u32 %v338_v27, %v334_v19  ;;  %v1717_v48 = vshll.u32 %v5329_v34, 16  ;;  %v353_v49 = vshrl.u32 %v5315_v24, 16  ;;  %v1716_v52 = vrot.slane %v1714_v45, 1 }
  0x19   : > { %v1711_v47 = vor.u32 %v1710_v39, %v1707_v38  ;;  %v1703_v50 = vor.u32 %v1702_v43, %v1699_v42  ;;  %v352_v51 = vsel %vm332_vm2, %v347_v37, %v351_v44  ;;  %v357_v53 = vshll.u32 %v5335_v40, 16  ;;  %v5391_v43 = vld [vmem:[%s5283_s28 + $0x38] sm:$0xff]  }
  0x1a   : > { %v344_v46 = vsel %vm332_vm2, %v339_v36, %v343_v28  ;;  %v1719_v56 = vrot.slane %v1717_v48, 2  ;;  %v355_v57 = vor.u32 %v353_v49, %v351_v44  ;;  %v1723_v58 = vshrl.u32 %v5338_v41, 16 }
  0x1b   : > { %4496 = vmatprep.mubr.msk.bf16.mxu1 %vm481_vm3, %v344_v46  ;;  %v1726_v59 = vshll.u32 %v5338_v41, 16  ;;  %v1712_v61 = vsel %vm1695_vm4, %v1703_v50, %v1711_v47  ;;  %v359_v62 = vrot.slane %v357_v53, 1  ;;  %v361_v63 = vshrl.u32 %v5335_v40, 16 }
  0x1c   : > { %4497 = vmatmul.mubr.msk.bf16.vlgmr.msra.gmra.mrb[0].mxu1 %vm481_vm3, %v352_v51  ;;  %v365_v0 = vshll.u32 %v5348_v54, 16  ;;  %4648 = vmatprep.mubr.msk.bf16.mxu0 %vm481_vm3, %v1712_v61  ;;  %v1720_v2 = vor.u32 %v1719_v56, %v1716_v52  ;;  %v1725_v3 = vrot.slane %v1723_v58, 1  ;;  %v1732_v7 = vshrl.u32 %v5351_v55, 16  ;;  %v5401_v51 = vld [vmem:[%s5283_s28 + $0x40] sm:$0xff]  }
  0x1d   : > { %4533 = vmatpush3.bf16.msra.mxu1 %v5276_v10  ;;  %v1728_v5 = vrot.slane %v1726_v59, 2  ;;  %v360_v11 = vsel %vm332_vm2, %v355_v57, %v359_v62  ;;  %v363_v12 = vor.u32 %v361_v63, %v359_v62  ;;  %v1735_v10 = vshll.u32 %v5351_v55, 16  ;;  %v5406_v58 = vld [vmem:[%s5283_s28 + $0x40] sm:$0xff]  }
  0x1e   : > { %4570 = vmatprep.subr.bf16.mxu1 %v5332_v35  ;;  %v367_v16 = vrot.slane %v365_v0, 1  ;;  %v1721_v17 = vsel %vm1695_vm4, %v1711_v47, %v1720_v2  ;;  %4500 = vmatprep.mubr.msk.bf16.mxu1 %vm481_vm3, %v360_v11  ;;  %v1734_v20 = vrot.slane %v1732_v7, 1  ;;  %v369_v21 = vshrl.u32 %v5348_v54, 16  ;;  %v5414_v7 = vld [vmem:[%s5283_s28 + $0x48] sm:$0xff]  }
  0x1f   : > { %v1729_v19 = vor.u32 %v1728_v5, %v1725_v3  ;;  %4649 = vmatmul.mubr.msk.bf16.vlgmr.msra.gmra.mrb[0].mxu0 %vm481_vm3, %v1721_v17  ;;  %v1737_v27 = vrot.slane %v1735_v10, 2  ;;  %v373_v28 = vshll.u32 %v5357_v60, 16  ;;  %v1741_v29 = vshrl.u32 %v5364_v1, 16  ;;  %v5417_v11 = vld [vmem:[%s5283_s28 + $0x48] sm:$0xff]  }
  0x20   : > { %v368_v22 = vsel %vm332_vm2, %v363_v12, %v367_v16  ;;  %4685 = vmatpush3.bf16.msra.mxu0 %v5269_v8  ;;  %v371_v32 = vor.u32 %v369_v21, %v367_v16  ;;  %v1744_v33 = vshll.u32 %v5364_v1, 16  ;;  %v377_v36 = vshrl.u32 %v5357_v60, 16  ;;  %v5426_v21 = vld [vmem:[%s5283_s28 + $0x50] sm:$0xff]  }
  0x21   : > { %v1730_v31 = vsel %vm1695_vm4, %v1720_v2, %v1729_v19  ;;  %v1738_v37 = vor.u32 %v1737_v27, %v1734_v20  ;;  %v375_v38 = vrot.slane %v373_v28, 1  ;;  %v1743_v39 = vrot.slane %v1741_v29, 1  ;;  %4722 = vmatprep.subr.bf16.mxu0 %v5321_v26 }
  0x22   : > { %4652 = vmatprep.mubr.msk.bf16.mxu0 %vm481_vm3, %v1730_v31  ;;  %v381_v42 = vshll.u32 %v5369_v9, 16  ;;  %v1746_v8 = vrot.slane %v1744_v33, 2  ;;  %v1750_v44 = vshrl.u32 %v5382_v30, 16  ;;  %v1753_v45 = vshll.u32 %v5382_v30, 16  ;;  %v5434_v33 = vld [vmem:[%s5283_s28 + $0x50] sm:$0xff]  }
  0x23   : > { %v385_v46 = vshrl.u32 %v5369_v9, 16  ;;  %v1739_v47 = vsel %vm1695_vm4, %v1729_v19, %v1738_v37  ;;  %v376_v48 = vsel %vm332_vm2, %v371_v32, %v375_v38  ;;  %v379_v49 = vor.u32 %v377_v36, %v375_v38  ;;  %v5439_v38 = vld [vmem:[%s5283_s28 + $0x58] sm:$0xff]  }
  0x24   : > { %4501 = vmatmul.mubr.msk.bf16.gmra.mrb[4].mxu1 %vm481_vm3, %v368_v22  ;;  %v383_v50 = vrot.slane %v381_v42, 1  ;;  %v1747_v52 = vor.u32 %v1746_v8, %v1743_v39  ;;  %v1752_v53 = vrot.slane %v1750_v44, 1  ;;  %v1755_v56 = vrot.slane %v1753_v45, 2 }
  0x25   : > { %4504 = vmatprep.mubr.msk.bf16.mxu1 %vm481_vm3, %v376_v48  ;;  %v389_v57 = vshll.u32 %v5391_v43, 16  ;;  %v1759_v62 = vshrl.u32 %v5401_v51, 16  ;;  %v1762_v63 = vshll.u32 %v5401_v51, 16  ;;  %v393_v5 = vshrl.u32 %v5391_v43, 16 }
  0x26   : > { %v384_v59 = vsel %vm332_vm2, %v379_v49, %v383_v50  ;;  %v387_v61 = vor.u32 %v385_v46, %v383_v50  ;;  %v1748_v0 = vsel %vm1695_vm4, %v1738_v37, %v1747_v52  ;;  %v1756_v2 = vor.u32 %v1755_v56, %v1752_v53  ;;  %v5444_v49 = vld [vmem:[%s5283_s28 + $0x58] sm:$0xff]  }
  0x27   : > { %v391_v3 = vrot.slane %v389_v57, 1  ;;  %4653 = vmatmul.mubr.msk.bf16.gmra.mrb[4].mxu0 %vm481_vm3, %v1739_v47  ;;  %v1761_v12 = vrot.slane %v1759_v62, 1  ;;  %v1764_v16 = vrot.slane %v1762_v63, 2  ;;  %v397_v10 = vshll.u32 %v5406_v58, 16 }
  0x28   : > { %v401_v17 = vshrl.u32 %v5406_v58, 16  ;;  %4656 = vmatprep.mubr.msk.bf16.mxu0 %vm481_vm3, %v1748_v0  ;;  %v1768_v20 = vshrl.u32 %v5414_v7, 16  ;;  %v1771_v27 = vshll.u32 %v5414_v7, 16  ;;  %v405_v28 = vshll.u32 %v5417_v11, 16 }
  0x29   : > { %v392_v19 = vsel %vm332_vm2, %v387_v61, %v391_v3  ;;  %v1765_v22 = vor.u32 %v1764_v16, %v1761_v12  ;;  %v399_v29 = vrot.slane %v397_v10, 1  ;;  %v1777_v31 = vshrl.u32 %v5426_v21, 16 }
  0x2a   : > { %v1780_v32 = vshll.u32 %v5426_v21, 16  ;;  %v1757_v36 = vsel %vm1695_vm4, %v1747_v52, %v1756_v2  ;;  %v395_v37 = vor.u32 %v393_v5, %v391_v3  ;;  %v1770_v39 = vrot.slane %v1768_v20, 1  ;;  %v5458_v3 = vld [vmem:[%s5283_s28 + $0x60] sm:$0xff]   ;;  %v5463_v20 = vld [vmem:[%s5283_s28 + $0x68] sm:$0xff]  }
  0x2b   : > { %v1773_v42 = vrot.slane %v1771_v27, 2  ;;  %v403_v8 = vor.u32 %v401_v17, %v399_v29  ;;  %v407_v44 = vrot.slane %v405_v28, 1  ;;  %v1766_v45 = vsel %vm1695_vm4, %v1756_v2, %v1765_v22  ;;  %v2136_v2 = vld [vmem:[%s5283_s28 + $0x8] sm:$0xc] }
  0x2c   : > { %4505 = vmatmul.mubr.msk.bf16.gmra.mrb[8].mxu1 %vm481_vm3, %v384_v59  ;;  %v1779_v46 = vrot.slane %v1777_v31, 1  ;;  %v1782_v47 = vrot.slane %v1780_v32, 2  ;;  %v413_v48 = vshll.u32 %v5434_v33, 16  ;;  %v400_v50 = vsel %vm332_vm2, %v395_v37, %v399_v29 }
  0x2d   : > { %4508 = vmatprep.mubr.msk.bf16.mxu1 %vm481_vm3, %v392_v19  ;;  %v409_v52 = vshrl.u32 %v5417_v11, 16  ;;  %v1786_v53 = vshrl.u32 %v5439_v38, 16  ;;  %v1789_v56 = vshll.u32 %v5439_v38, 16  ;;  %v1774_v57 = vor.u32 %v1773_v42, %v1770_v39 }
  0x2e   : > { %v408_v59 = vsel %vm332_vm2, %v403_v8, %v407_v44  ;;  %v417_v61 = vshrl.u32 %v5434_v33, 16  ;;  %v421_v62 = vshll.u32 %v5444_v49, 16  ;;  %v1783_v63 = vor.u32 %v1782_v47, %v1779_v46 }
  0x2f   : > { %4657 = vmatmul.mubr.msk.bf16.gmra.mrb[8].mxu0 %vm481_vm3, %v1757_v36  ;;  %v415_v0 = vrot.slane %v413_v48, 1  ;;  %v411_v5 = vor.u32 %v409_v52, %v407_v44  ;;  %v1788_v12 = vrot.slane %v1786_v53, 1  ;;  %v1791_v16 = vrot.slane %v1789_v56, 2  ;;  %v5480_v44 = vld [vmem:[%s5283_s28 + $0x70] sm:$0xff]  }
  0x30   : > { %4660 = vmatprep.mubr.msk.bf16.mxu0 %vm481_vm3, %v1766_v45  ;;  %v1775_v10 = vsel %vm1695_vm4, %v1765_v22, %v1774_v57  ;;  %v423_v19 = vrot.slane %v421_v62, 1  ;;  %v1784_v27 = vsel %vm1695_vm4, %v1774_v57, %v1783_v63  ;;  %v4150_v28 = vcombine.low %v2136_v2, %v5305_v18  ;;  %v5501_v2 = vld [vmem:[%s5283_s28 + $0x80] sm:$0xff]  }
  0x31   : > { %v419_v17 = vor.u32 %v417_v61, %v415_v0  ;;  %v429_v29 = vshll.u32 %v5458_v3, 16  ;;  %v416_v31 = vsel %vm332_vm2, %v411_v5, %v415_v0  ;;  %v425_v32 = vshrl.u32 %v5444_v49, 16 }
  0x32   : > { %v5472_v22 = vor.u32 %v1791_v16, %v1788_v12  ;;  %v433_v37 = vshrl.u32 %v5458_v3, 16  ;;  %v437_v39 = vshll.u32 %v5463_v20, 16  ;;  %v2143_v18 = vrot.slane %v4150_v28, 2 }
  0x33   : > { %v424_v36 = vsel %vm332_vm2, %v419_v17, %v423_v19  ;;  %v2144_v42 = vrot.slane %v5312_v23, 2  ;;  %v431_v8 = vrot.slane %v429_v29, 1  ;;  %v427_v45 = vor.u32 %v425_v32, %v423_v19  ;;  %v5509_v17 = vld [vmem:[%s5283_s28 + $0x88] sm:$0xff]  }
  0x34   : > { %4509 = vmatmul.mubr.msk.bf16.gmra.mrb[12].mxu1 %vm481_vm3, %v400_v50  ;;  %v1793_v46 = vsel %vm1695_vm4, %v1783_v63, %v5472_v22  ;;  %v439_v48 = vrot.slane %v437_v39, 1  ;;  %v5486_v50 = vld [vmem:[%s5283_s28 + $0x78] sm:$0xff]   ;;  %v445_v23 = vshll.u32 %v5480_v44, 16  ;;  %v2146_v56 = vrot.slane %v5329_v34, 2  ;;  %v4207_v34 = vld [vmem:[%s6253_s1 + $0xe] sm:$0x3] }
  0x35   : > { %4512 = vmatprep.mubr.msk.bf16.mxu1 %vm481_vm3, %v408_v59  ;;  %v435_v47 = vor.u32 %v433_v37, %v431_v8  ;;  %v2145_v52 = vsel %vm2142_vm5, %v2143_v18, %v2144_v42  ;;  %v432_v53 = vsel %vm332_vm2, %v427_v45, %v431_v8  ;;  %v441_v57 = vshrl.u32 %v5463_v20, 16 }
  0x36   : > { %v449_v61 = vshrl.u32 %v5480_v44, 16  ;;  %v453_v62 = vshll.u32 %v5486_v50, 16  ;;  %v2148_v63 = vrot.slane %v5338_v41, 2  ;;  %v447_v0 = vrot.slane %v445_v23, 1 }
  0x37   : > { %4661 = vmatmul.mubr.msk.bf16.gmra.mrb[12].mxu0 %vm481_vm3, %v1775_v10  ;;  %v440_v59 = vsel %vm332_vm2, %v435_v47, %v439_v48  ;;  %v443_v5 = vor.u32 %v441_v57, %v439_v48  ;;  %v2147_v12 = vsel %vm2142_vm5, %v2144_v42, %v2146_v56  ;;  %v5513_v19 = vand.u32 %v4207_v34, %v5257_v4  ;;  %v5530_v42 = vld [vmem:[%s5283_s28 + $0x90] ss:$0 sps:$4 sm:$0x11]   ;;  %v5557_v34 = vld [vmem:[%s5283_s28 + $0x60] sm:$0xff]  }
  0x38   : > { %4664 = vmatprep.mubr.msk.bf16.mxu0 %vm481_vm3, %v1784_v27  ;;  %v451_v16 = vor.u32 %v449_v61, %v447_v0  ;;  %v455_v10 = vrot.slane %v453_v62, 1  ;;  %v2149_v41 = vsel %vm2142_vm5, %v2146_v56, %v2148_v63  ;;  %v461_v27 = vshll.u32 %v5501_v2, 16 }
  0x39   : > { %v448_v28 = vsel %vm332_vm2, %v443_v5, %v447_v0  ;;  %v2150_v29 = vrot.slane %v5351_v55, 2  ;;  %v469_v37 = vshll.u32 %v5509_v17, 16  ;;  %v2152_v39 = vrot.slane %v5364_v1, 2  ;;  %v4091_v5 = vld [vmem:[%s6253_s1 + $0x6] sm:$0x3] }
  0x3a   : > { %v456_v32 = vsel %vm332_vm2, %v451_v16, %v455_v10  ;;  %v463_v18 = vrot.slane %v461_v27, 1  ;;  %v473_v47 = vshrl.u32 %v5509_v17, 16  ;;  %v477_v48 = vshll.u32 %v5530_v42, 16  ;;  %v5576_v16 = vld [vmem:[%s5283_s28 + $0x68] sm:$0xff]  }
  0x3b   : > { %v471_v45 = vrot.slane %v469_v37, 1 }
  0x3c   : > { %4513 = vmatmul.mubr.msk.bf16.gmra.mrb[16].mxu1 %vm481_vm3, %v416_v31  ;;  %v457_v31 = vshrl.u32 %v5486_v50, 16  ;;  %v479_v57 = vrot.slane %v477_v48, 1 }
  0x3d   : > { %4516 = vmatprep.mubr.msk.bf16.mxu1 %vm481_vm3, %v424_v36  ;;  %v465_v36 = vshrl.u32 %v5501_v2, 16  ;;  %v475_v56 = vor.u32 %v473_v47, %v471_v45  ;;  %v5629_v47 = vld [vmem:[%s5283_s28 + $0x98] ss:$0 sps:$4 sm:$0x33]  }
  0x3e   : > { %v459_v55 = vor.u32 %v457_v31, %v455_v10  ;;  %v5581_v10 = vld [vmem:[%s5283_s28 + $0x70] sm:$0xff]   ;;  %v5597_v31 = vld [vmem:[%s5283_s28 + $0x80] sm:$0xff]  }
  0x3f   : > { %4665 = vmatmul.mubr.msk.bf16.gmra.mrb[16].mxu0 %vm481_vm3, %v1793_v46  ;;  %v467_v8 = vor.u32 %v465_v36, %v463_v18  ;;  %v2153_v46 = vsel %vm2142_vm5, %v2150_v29, %v2152_v39  ;;  %v480_v62 = vsel %vm332_vm2, %v475_v56, %v479_v57  ;;  %v2168_v27 = vrot.slane %v5581_v10, 2 }
  0x40   : > { %4686 = vmatprep.mubr.msk.bf16.mxu0 %vm481_vm3, %v2145_v52  ;;  %v464_v1 = vsel %vm332_vm2, %v459_v55, %v463_v18  ;;  %v2154_v52 = vrot.slane %v5382_v30, 2  ;;  %v2158_v30 = vrot.slane %v5414_v7, 2  ;;  %v2162_v7 = vrot.slane %v5439_v38, 2  ;;  %v5613_v55 = vld [vmem:[%s5283_s28 + $0x90] sm:$0xff]  }
  0x41   : > { %v472_v23 = vsel %vm332_vm2, %v467_v8, %v471_v45  ;;  %v2172_v36 = vrot.slane %v5597_v31, 2  ;;  %v2176_v8 = vrot.slane %v5613_v55, 2  ;;  %v2450_v45 = vld [vmem:[%s5283_s28 + $0x10] sm:$0xc] }
  0x44   : > { %4517 = vmatmul.mubr.msk.bf16.gmra.mrb[20].mxu1 %vm481_vm3, %v432_v53  ;;  %v2156_v53 = vrot.slane %v5401_v51, 2  ;;  %v2160_v51 = vrot.slane %v5426_v21, 2  ;;  %v5566_v21 = vand.u32 %v4091_v5, %v5257_v4 }
  0x45   : > { %4520 = vmatprep.mubr.msk.bf16.mxu1 %vm481_vm3, %v440_v59  ;;  %v2155_v59 = vsel %vm2142_vm5, %v2152_v39, %v2154_v52  ;;  %v5609_v39 = vld [vmem:[%s5283_s28 + $0x88] sm:$0xff]  }
  0x46   : > { %v2157_v61 = vsel %vm2142_vm5, %v2154_v52, %v2156_v53  ;;  %v2161_v0 = vsel %vm2142_vm5, %v2158_v30, %v2160_v51 }
  0x47   : > { %4687 = vmatmul.mubr.msk.bf16.vlgmr.msra.gmra.mrb[0].mxu0 %vm481_vm3, %v2147_v12  ;;  %v2163_v12 = vsel %vm2142_vm5, %v2160_v51, %v2162_v7 }
  0x48   : > { %4723 = vmatpush3.bf16.msra.mxu0 %v5321_v26  ;;  %4690 = vmatprep.mubr.msk.bf16.mxu0 %vm481_vm3, %v2149_v41  ;;  %v2151_v26 = vsel %vm2142_vm5, %v2148_v63, %v2150_v29  ;;  %v2159_v63 = vsel %vm2142_vm5, %v2156_v53, %v2158_v30  ;;  %v2166_v41 = vrot.slane %v5576_v16, 2  ;;  %v2178_v53 = vrot.slane %v5629_v47, 2  ;;  %v5653_v30 = vld [vmem:[%s5283_s28 + $0x28] sm:$0xff]  }
  0x49   : > { %4760 = vmatprep.subr.bf16.mxu0 %v5513_v19 }
  0x4a   : > { %v2169_v29 = vsel %vm2142_vm5, %v2166_v41, %v2168_v27 }
  0x4c   : > { %4521 = vmatmul.mubr.msk.bf16.gmra.mrb[24].mxu1 %vm481_vm3, %v448_v28  ;;  %v5593_v28 = vld [vmem:[%s5283_s28 + $0x78] sm:$0xff]  }
  0x4d   : > { %4524 = vmatprep.mubr.msk.bf16.mxu1 %vm481_vm3, %v456_v32  ;;  %v2170_v32 = vrot.slane %v5593_v28, 2 }
  0x4f   : > { %4691 = vmatmul.mubr.msk.bf16.gmra.mrb[4].mxu0 %vm481_vm3, %v2151_v26  ;;  %v2171_v37 = vsel %vm2142_vm5, %v2168_v27, %v2170_v32  ;;  %v2173_v18 = vsel %vm2142_vm5, %v2170_v32, %v2172_v36  ;;  %v2174_v26 = vrot.slane %v5609_v39, 2  ;;  %v936_v32 = vld [vmem:[%s5283_s28] sm:$0xe] }
  0x50   : > { %4694 = vmatprep.mubr.msk.bf16.mxu0 %vm481_vm3, %v2153_v46  ;;  %v5623_v46 = vld [vmem:[%s5283_s28 + $0x14] sm:$0xf] }
  0x51   : > { %v2177_v48 = vsel %vm2142_vm5, %v2174_v26, %v2176_v8  ;;  %v5633_v52 = vcombine.low %v2450_v45, %v5623_v46 }
  0x53   : > { %v2582_v56 = vrot.slane %v5633_v52, 2 }
  0x54   : > { %4525 = vmatmul.mubr.msk.bf16.gmra.mrb[28].mxu1 %vm481_vm3, %v464_v1  ;;  %v2175_v1 = vsel %vm2142_vm5, %v2172_v36, %v2174_v26 }
  0x55   : > { %4528 = vmatprep.mubr.msk.bf16.mxu1 %vm481_vm3, %v472_v23  ;;  %v5636_v23 = vld [vmem:[%s5283_s28 + $0x18] sm:$0xff]  }
  0x56   : > { %v2583_v57 = vrot.slane %v5636_v23, 2 }
  0x57   : > { %4695 = vmatmul.mubr.msk.bf16.gmra.mrb[8].mxu0 %vm481_vm3, %v2155_v59  ;;  %v2179_v59 = vsel %vm2142_vm5, %v2176_v8, %v2178_v53  ;;  %v5707_v8 = vld [vmem:[%s5283_s28 + $0x50] sm:$0xff]  }
  0x58   : > { %4698 = vmatprep.mubr.msk.bf16.mxu0 %vm481_vm3, %v2157_v61  ;;  %v5649_v61 = vld [vmem:[%s5283_s28 + $0x20] sm:$0xff]   ;;  %v2597_v53 = vrot.slane %v5707_v8, 2 }
  0x59   : > { %v2585_v51 = vrot.slane %v5649_v61, 2 }
  0x5b   : > { %v2586_v5 = vsel %vm2142_vm5, %v2583_v57, %v2585_v51 }
  0x5c   : > { %4529 = vmatmul.mubr.msk.bf16.gmra.mrb[32].mxu1 %vm481_vm3, %v480_v62  ;;  %v2584_v62 = vsel %vm2142_vm5, %v2582_v56, %v2583_v57 }
  0x5d   : > { %4534 = vmatprep.mubr.msk.bf16.mxu1 %vm481_vm3, %v5295_v14  ;;  %v2164_v14 = vrot.slane %v5557_v34, 2 }
  0x5f   : > { %4699 = vmatmul.mubr.msk.bf16.gmra.mrb[12].mxu0 %vm481_vm3, %v2159_v63  ;;  %v2165_v38 = vsel %vm2142_vm5, %v2162_v7, %v2164_v14  ;;  %v2587_v63 = vrot.slane %v5653_v30, 2  ;;  %v5668_v7 = vld [vmem:[%s5283_s28 + $0x30] sm:$0xff]  }
  0x60   : > { %4702 = vmatprep.mubr.msk.bf16.mxu0 %vm481_vm3, %v2161_v0  ;;  %v4227_v0 = vld [vmem:[%s6253_s1 + $0x10] sm:$0x3] }
  0x64   : > { %4535 = vmatmul.mubr.msk.bf16.vlgmr.msra.gmra.mrb[0].mxu1 %vm481_vm3, %v5298_v15 }
  0x65   : > { %4538 = vmatprep.mubr.msk.bf16.mxu1 %vm481_vm3, %v5315_v24  ;;  %4571 = vmatpush3.bf16.msra.mxu1 %v5332_v35  ;;  %v2167_v35 = vsel %vm2142_vm5, %v2164_v14, %v2166_v41  ;;  %v2588_v14 = vsel %vm2142_vm5, %v2585_v51, %v2587_v63  ;;  %v2589_v41 = vrot.slane %v5668_v7, 2  ;;  %v948_v51 = vrot.slane %v5335_v40, 1 }
  0x66   : > { %4608 = vmatprep.subr.bf16.mxu1 %v5566_v21 }
  0x67   : > { %4703 = vmatmul.mubr.msk.bf16.gmra.mrb[16].mxu0 %vm481_vm3, %v2163_v12  ;;  %v5672_v12 = vld [vmem:[%s5283_s28 + $0x38] sm:$0xff]  }
  0x68   : > { %4706 = vmatprep.mubr.msk.bf16.mxu0 %vm481_vm3, %v2165_v38  ;;  %v5675_v38 = vand.u32 %v4227_v0, %v5257_v4  ;;  %v2591_v27 = vrot.slane %v5672_v12, 2  ;;  %v2590_v4 = vsel %vm2142_vm5, %v2587_v63, %v2589_v41  ;;  %v5730_v0 = vld [vmem:[%s5283_s28 + $0x68] sm:$0xff]  }
  0x6c   : > { %4539 = vmatmul.mubr.msk.bf16.gmra.mrb[4].mxu1 %vm481_vm3, %v5335_v40  ;;  %v950_v40 = vrot.slane %v5348_v54, 1 }
  0x6d   : > { %4542 = vmatprep.mubr.msk.bf16.mxu1 %vm481_vm3, %v5348_v54 }
  0x6e   : > { %v951_v54 = vsel %vm942_vm6, %v948_v51, %v950_v40 }
  0x6f   : > { %4707 = vmatmul.mubr.msk.bf16.gmra.mrb[20].mxu0 %vm481_vm3, %v2167_v35  ;;  %v5689_v35 = vld [vmem:[%s5283_s28 + $0x40] sm:$0xff]  }
  0x70   : > { %4710 = vmatprep.mubr.msk.bf16.mxu0 %vm481_vm3, %v2169_v29  ;;  %v5693_v29 = vld [vmem:[%s5283_s28 + $0x48] sm:$0xff]   ;;  %v2593_v36 = vrot.slane %v5689_v35, 2 }
  0x72   : > { %v2594_v26 = vsel %vm2142_vm5, %v2591_v27, %v2593_v36 }
  0x74   : > { %4543 = vmatmul.mubr.msk.bf16.gmra.mrb[8].mxu1 %vm481_vm3, %v5357_v60 }
  0x75   : > { %4546 = vmatprep.mubr.msk.bf16.mxu1 %vm481_vm3, %v5369_v9 }
  0x77   : > { %4711 = vmatmul.mubr.msk.bf16.gmra.mrb[24].mxu0 %vm481_vm3, %v2171_v37  ;;  %v4072_v37 = vcombine.low %v936_v32, %v5290_v13  ;;  %v5712_v13 = vld [vmem:[%s5283_s28 + $0x58] sm:$0xff]  }
  0x78   : > { %4714 = vmatprep.mubr.msk.bf16.mxu0 %vm481_vm3, %v2173_v18  ;;  %v2595_v18 = vrot.slane %v5693_v29, 2  ;;  %v2599_v57 = vrot.slane %v5712_v13, 2 }
  0x79   : > { %v943_v45 = vrot.slane %v4072_v37, 1 }
  0x7a   : > { %v2600_v63 = vsel %vm2142_vm5, %v2597_v53, %v2599_v57 }
  0x7c   : > { %4547 = vmatmul.mubr.msk.bf16.gmra.mrb[12].mxu1 %vm481_vm3, %v5391_v43 }
  0x7d   : > { %4550 = vmatprep.mubr.msk.bf16.mxu1 %vm481_vm3, %v5406_v58 }
  0x7f   : > { %4715 = vmatmul.mubr.msk.bf16.gmra.mrb[28].mxu0 %vm481_vm3, %v2175_v1  ;;  %v944_v1 = vrot.slane %v5298_v15, 1  ;;  %v946_v15 = vrot.slane %v5315_v24, 1 }
  0x80   : > { %4718 = vmatprep.mubr.msk.bf16.mxu0 %vm481_vm3, %v2177_v48  ;;  %v2596_v48 = vsel %vm2142_vm5, %v2593_v36, %v2595_v18  ;;  %v5750_v36 = vld [vmem:[%s5283_s28 + $0x78] sm:$0xff]  }
  0x81   : > { %v945_v56 = vsel %vm942_vm6, %v943_v45, %v944_v1  ;;  %v5763_v45 = vld [vmem:[%s5283_s28 + $0x80] sm:$0xff]  }
  0x84   : > { %4551 = vmatmul.mubr.msk.bf16.gmra.mrb[16].mxu1 %vm481_vm3, %v5417_v11 }
  0x85   : > { %4554 = vmatprep.mubr.msk.bf16.mxu1 %vm481_vm3, %v5434_v33 }
  0x87   : > { %4719 = vmatmul.mubr.msk.bf16.gmra.mrb[32].mxu0 %vm481_vm3, %v2179_v59  ;;  %v2598_v59 = vsel %vm2142_vm5, %v2595_v18, %v2597_v53  ;;  %v2607_v18 = vrot.slane %v5750_v36, 2  ;;  %v5768_v53 = vld [vmem:[%s5283_s28 + $0x88] sm:$0xff]  }
  0x88   : > { %4724 = vmatprep.mubr.msk.bf16.mxu0 %vm481_vm3, %v2584_v62  ;;  %v5725_v62 = vld [vmem:[%s5283_s28 + $0x60] sm:$0xff]  }
  0x89   : > { %v2601_v24 = vrot.slane %v5725_v62, 2 }
  0x8c   : > { %4555 = vmatmul.mubr.msk.bf16.gmra.mrb[20].mxu1 %vm481_vm3, %v5444_v49 }
  0x8d   : > { %4558 = vmatprep.mubr.msk.bf16.mxu1 %vm481_vm3, %v5458_v3 }
  0x8f   : > { %4725 = vmatmul.mubr.msk.bf16.vlgmr.msra.gmra.mrb[0].mxu0 %vm481_vm3, %v2586_v5  ;;  %v947_v5 = vsel %vm942_vm6, %v944_v1, %v946_v15  ;;  %v956_v1 = vrot.slane %v5391_v43, 1  ;;  %v958_v43 = vrot.slane %v5406_v58, 1 }
  0x90   : > { %4761 = vmatpush3.bf16.msra.mxu0 %v5513_v19  ;;  %4728 = vmatprep.mubr.msk.bf16.mxu0 %vm481_vm3, %v2588_v14  ;;  %v2592_v19 = vsel %vm2142_vm5, %v2589_v41, %v2591_v27  ;;  %v949_v14 = vsel %vm942_vm6, %v946_v15, %v948_v51  ;;  %v2603_v41 = vrot.slane %v5730_v0, 2  ;;  %v2602_v27 = vsel %vm2142_vm5, %v2599_v57, %v2601_v24  ;;  %v5781_v51 = vld [vmem:[%s5283_s28 + $0x90] sm:$0xff]  }
  0x91   : > { %4798 = vmatprep.subr.bf16.mxu0 %v5675_v38  ;;  %v2611_v15 = vrot.slane %v5768_v53, 2 }
  0x92   : > { %v2604_v32 = vsel %vm2142_vm5, %v2601_v24, %v2603_v41 }
  0x94   : > { %4559 = vmatmul.mubr.msk.bf16.gmra.mrb[24].mxu1 %vm481_vm3, %v5463_v20 }
  0x95   : > { %4562 = vmatprep.mubr.msk.bf16.mxu1 %vm481_vm3, %v5480_v44 }
  0x97   : > { %4729 = vmatmul.mubr.msk.bf16.gmra.mrb[4].mxu0 %vm481_vm3, %v2590_v4  ;;  %v5744_v4 = vld [vmem:[%s5283_s28 + $0x70] sm:$0xff]  }
  0x98   : > { %4732 = vmatprep.mubr.msk.bf16.mxu0 %vm481_vm3, %v2592_v19  ;;  %v952_v19 = vrot.slane %v5357_v60, 1  ;;  %v954_v60 = vrot.slane %v5369_v9, 1  ;;  %v2609_v9 = vrot.slane %v5763_v45, 2 }
  0x9a   : > { %v953_v37 = vsel %vm942_vm6, %v950_v40, %v952_v19  ;;  %v957_v57 = vsel %vm942_vm6, %v954_v60, %v956_v1  ;;  %v2612_v24 = vsel %vm2142_vm5, %v2609_v9, %v2611_v15 }
  0x9c   : > { %4563 = vmatmul.mubr.msk.bf16.gmra.mrb[28].mxu1 %vm481_vm3, %v5486_v50 }
  0x9d   : > { %4566 = vmatprep.mubr.msk.bf16.mxu1 %vm481_vm3, %v5501_v2 }
  0x9f   : > { %4733 = vmatmul.mubr.msk.bf16.gmra.mrb[8].mxu0 %vm481_vm3, %v2594_v26 }
  0xa0   : > { %4736 = vmatprep.mubr.msk.bf16.mxu0 %vm481_vm3, %v2596_v48 }
  0xa4   : > { %4567 = vmatmul.mubr.msk.bf16.gmra.mrb[32].mxu1 %vm481_vm3, %v5509_v17 }
  0xa5   : > { %4572 = vmatprep.mubr.msk.bf16.mxu1 %vm481_vm3, %v945_v56  ;;  %v955_v56 = vsel %vm942_vm6, %v952_v19, %v954_v60  ;;  %v2905_v19 = vshrl.u32 %v5636_v23, 16  ;;  %v964_v60 = vrot.slane %v5444_v49, 1  ;;  %v2923_v49 = vshrl.u32 %v5653_v30, 16 }
  0xa7   : > { %4737 = vmatmul.mubr.msk.bf16.gmra.mrb[12].mxu0 %vm481_vm3, %v2598_v59  ;;  %v2610_v59 = vsel %vm2142_vm5, %v2607_v18, %v2609_v9 }
  0xa8   : > { %4740 = vmatprep.mubr.msk.bf16.mxu0 %vm481_vm3, %v2600_v63  ;;  %v960_v63 = vrot.slane %v5417_v11, 1  ;;  %v2900_v11 = vshll.u32 %v5633_v52, 16 }
  0xaa   : > { %v961_v58 = vsel %vm942_vm6, %v958_v43, %v960_v63 }
  0xac   : > { %4573 = vmatmul.mubr.msk.bf16.vlgmr.msra.gmra.mrb[0].mxu1 %vm481_vm3, %v947_v5  ;;  %v5785_v5 = vld [vmem:[%s5283_s28 + $0x98] sm:$0xff]  }
  0xad   : > { %4576 = vmatprep.mubr.msk.bf16.mxu1 %vm481_vm3, %v949_v14  ;;  %4609 = vmatpush3.bf16.msra.mxu1 %v5566_v21  ;;  %v2605_v21 = vrot.slane %v5744_v4, 2  ;;  %v959_v14 = vsel %vm942_vm6, %v956_v1, %v958_v43  ;;  %v2615_v40 = vrot.slane %v5785_v5, 2  ;;  %v2902_v1 = vrot.slane %v2900_v11, 3 }
  0xae   : > { %4836 = vmatprep.subr.bf16.mxu1 %v5265_v6 }
  0xaf   : > { %4741 = vmatmul.mubr.msk.bf16.gmra.mrb[16].mxu0 %vm481_vm3, %v2602_v27  ;;  %v2606_v26 = vsel %vm2142_vm5, %v2603_v41, %v2605_v21  ;;  %v2608_v48 = vsel %vm2142_vm5, %v2605_v21, %v2607_v18  ;;  %v2613_v41 = vrot.slane %v5781_v51, 2  ;;  %v2897_v27 = vshrl.u32 %v5633_v52, 16  ;;  %v5195_v18 = vld [vmem:[%s5283_s28 + $0xa0] ss:$0 sps:$4 sm:$0x33]  }
  0xb0   : > { %4744 = vmatprep.mubr.msk.bf16.mxu0 %vm481_vm3, %v2604_v32  ;;  %v2908_v32 = vshll.u32 %v5636_v23, 16  ;;  %v2907_v52 = vrot.slane %v2905_v19, 2  ;;  %v2617_v9 = vrot.slane %v5195_v18, 2  ;;  %v2925_v19 = vrot.slane %v2923_v49, 2 }
  0xb1   : > { %v2614_v21 = vsel %vm2142_vm5, %v2611_v15, %v2613_v41  ;;  %v2917_v15 = vshll.u32 %v5649_v61, 16  ;;  %v2953_v49 = vshll.u32 %v5689_v35, 16 }
  0xb4   : > { %4577 = vmatmul.mubr.msk.bf16.gmra.mrb[4].mxu1 %vm481_vm3, %v951_v54  ;;  %v962_v54 = vrot.slane %v5434_v33, 1 }
  0xb5   : > { %4580 = vmatprep.mubr.msk.bf16.mxu1 %vm481_vm3, %v953_v37  ;;  %v2616_v37 = vsel %vm2142_vm5, %v2613_v41, %v2615_v40 }
  0xb6   : > { %v965_v33 = vsel %vm942_vm6, %v962_v54, %v964_v60 }
  0xb7   : > { %4745 = vmatmul.mubr.msk.bf16.gmra.mrb[20].mxu0 %vm481_vm3, %v2606_v26  ;;  %v2899_v26 = vrot.slane %v2897_v27, 2  ;;  %v968_v27 = vrot.slane %v5463_v20, 1  ;;  %v2941_v20 = vshrl.u32 %v5672_v12, 16 }
  0xb8   : > { %4748 = vmatprep.mubr.msk.bf16.mxu0 %vm481_vm3, %v2608_v48  ;;  %v2910_v48 = vrot.slane %v2908_v32, 3 }
  0xb9   : > { %v2903_v43 = vor.u32 %v2902_v1, %v2899_v26  ;;  %v2944_v26 = vshll.u32 %v5672_v12, 16 }
  0xbc   : > { %4581 = vmatmul.mubr.msk.bf16.gmra.mrb[8].mxu1 %vm481_vm3, %v955_v56  ;;  %v963_v56 = vsel %vm942_vm6, %v960_v63, %v962_v54  ;;  %v966_v63 = vrot.slane %v5458_v3, 1  ;;  %v2932_v3 = vshrl.u32 %v5668_v7, 16 }
  0xbd   : > { %4584 = vmatprep.mubr.msk.bf16.mxu1 %vm481_vm3, %v957_v57  ;;  %v2914_v57 = vshrl.u32 %v5649_v61, 16 }
  0xbe   : > { %v967_v54 = vsel %vm942_vm6, %v964_v60, %v966_v63  ;;  %v970_v60 = vrot.slane %v5480_v44, 1 }
  0xbf   : > { %4749 = vmatmul.mubr.msk.bf16.gmra.mrb[24].mxu0 %vm481_vm3, %v2610_v59  ;;  %v2911_v59 = vor.u32 %v2910_v48, %v2907_v52  ;;  %v2916_v41 = vrot.slane %v2914_v57, 2  ;;  %v2934_v52 = vrot.slane %v2932_v3, 2  ;;  %v2946_v57 = vrot.slane %v2944_v26, 3 }
  0xc0   : > { %4752 = vmatprep.mubr.msk.bf16.mxu0 %vm481_vm3, %v2612_v24  ;;  %v2926_v24 = vshll.u32 %v5653_v30, 16  ;;  %v2971_v3 = vshll.u32 %v5707_v8, 16 }
  0xc1   : > { %v2912_v11 = vsel %vm2895_vm7, %v2903_v43, %v2911_v59 }
  0xc2   : > { %v2928_v32 = vrot.slane %v2926_v24, 3  ;;  %v2959_v24 = vshrl.u32 %v5693_v29, 16 }
  0xc4   : > { %4585 = vmatmul.mubr.msk.bf16.gmra.mrb[12].mxu1 %vm481_vm3, %v959_v14  ;;  %v2618_v14 = vsel %vm2142_vm5, %v2615_v40, %v2617_v9  ;;  %v2935_v40 = vshll.u32 %v5668_v7, 16  ;;  %v2929_v18 = vor.u32 %v2928_v32, %v2925_v19  ;;  %v2961_v19 = vrot.slane %v2959_v24, 2  ;;  %v5200_v24 = vld [vmem:[%s5283_s28 + $0x18] sm:$0xff]  }
  0xc5   : > { %4588 = vmatprep.mubr.msk.bf16.mxu1 %vm481_vm3, %v961_v58  ;;  %v2919_v58 = vrot.slane %v2917_v15, 3  ;;  %v971_v15 = vsel %vm942_vm6, %v968_v27, %v970_v60 }
  0xc6   : > { %v2937_v48 = vrot.slane %v2935_v40, 3 }
  0xc7   : > { %4753 = vmatmul.mubr.msk.bf16.gmra.mrb[28].mxu0 %vm481_vm3, %v2614_v21  ;;  %v2920_v21 = vor.u32 %v2919_v58, %v2916_v41  ;;  %v2955_v58 = vrot.slane %v2953_v49, 3  ;;  %v2995_v49 = vshrl.u32 %v5730_v0, 16 }
  0xc8   : > { %4756 = vmatprep.mubr.msk.bf16.mxu0 %vm481_vm3, %v2616_v37  ;;  %v969_v37 = vsel %vm942_vm6, %v966_v63, %v968_v27  ;;  %v2938_v43 = vor.u32 %v2937_v48, %v2934_v52  ;;  %v2962_v63 = vshll.u32 %v5693_v29, 16  ;;  %v976_v27 = vrot.slane %v5509_v17, 1  ;;  %v5199_v48 = vld [vmem:[%s5283_s28 + $0x10] sm:$0xff]  }
  0xc9   : > { %v2921_v1 = vsel %vm2895_vm7, %v2911_v59, %v2920_v21  ;;  %v2930_v9 = vsel %vm2895_vm7, %v2920_v21, %v2929_v18  ;;  %v2950_v59 = vshrl.u32 %v5689_v35, 16  ;;  %v2968_v21 = vshrl.u32 %v5707_v8, 16 }
  0xca   : > { %v2964_v32 = vrot.slane %v2962_v63, 3  ;;  %v2977_v17 = vshrl.u32 %v5712_v13, 16  ;;  %v1382_v52 = vrot.slane %v5318_v25, 1  ;;  %v2989_v25 = vshll.u32 %v5725_v62, 16 }
  0xcb   : > { %v2952_v41 = vrot.slane %v2950_v59, 2  ;;  %v2970_v26 = vrot.slane %v2968_v21, 2  ;;  %v1385_v63 = vrot.slane %v5200_v24, 1 }
  0xcc   : > { %4589 = vmatmul.mubr.msk.bf16.gmra.mrb[16].mxu1 %vm481_vm3, %v963_v56  ;;  %v972_v56 = vrot.slane %v5486_v50, 1  ;;  %v2965_v40 = vor.u32 %v2964_v32, %v2961_v19  ;;  %v2997_v19 = vrot.slane %v2995_v49, 2  ;;  %v3034_v49 = vshll.u32 %v5768_v53, 16 }
  0xcd   : > { %4592 = vmatprep.mubr.msk.bf16.mxu1 %vm481_vm3, %v965_v33  ;;  %v2943_v33 = vrot.slane %v2941_v20, 2  ;;  %v978_v20 = vrot.slane %v5530_v42, 1 }
  0xce   : > { %v973_v44 = vsel %vm942_vm6, %v970_v60, %v972_v56 }
  0xcf   : > { %4757 = vmatmul.mubr.msk.bf16.gmra.mrb[32].mxu0 %vm481_vm3, %v2618_v14  ;;  %v2947_v50 = vor.u32 %v2946_v57, %v2943_v33  ;;  %v2939_v14 = vsel %vm2895_vm7, %v2929_v18, %v2938_v43  ;;  %v2980_v18 = vshll.u32 %v5712_v13, 16  ;;  %v2979_v33 = vrot.slane %v2977_v17, 2 }
  0xd0   : > { %4762 = vmatprep.mubr.msk.bf16.mxu0 %vm481_vm3, %v2912_v11  ;;  %v3013_v17 = vshrl.u32 %v5750_v36, 16 }
  0xd1   : > { %v2948_v11 = vsel %vm2895_vm7, %v2938_v43, %v2947_v50  ;;  %v2982_v57 = vrot.slane %v2980_v18, 3  ;;  %v3016_v18 = vshll.u32 %v5750_v36, 16 }
  0xd3   : > { %v2983_v59 = vor.u32 %v2982_v57, %v2979_v33  ;;  %v3015_v33 = vrot.slane %v3013_v17, 2  ;;  %v3018_v57 = vrot.slane %v3016_v18, 3  ;;  %v3052_v17 = vshll.u32 %v5785_v5, 16  ;;  %v5206_v18 = vld [vmem:[%s5283_s28 + $0x48] sm:$0xff]  }
  0xd4   : > { %4593 = vmatmul.mubr.msk.bf16.gmra.mrb[20].mxu1 %vm481_vm3, %v967_v54 }
  0xd5   : > { %4596 = vmatprep.mubr.msk.bf16.mxu1 %vm481_vm3, %v969_v37 }
  0xd7   : > { %4763 = vmatmul.mubr.msk.bf16.vlgmr.msra.gmra.mrb[0].mxu0 %vm481_vm3, %v2921_v1  ;;  %v2973_v1 = vrot.slane %v2971_v3, 3  ;;  %v3007_v3 = vshll.u32 %v5744_v4, 16 }
  0xd8   : > { %4799 = vmatpush3.bf16.msra.mxu0 %v5675_v38  ;;  %4766 = vmatprep.mubr.msk.bf16.mxu0 %vm481_vm3, %v2930_v9  ;;  %v974_v38 = vrot.slane %v5501_v2, 1  ;;  %v2956_v2 = vor.u32 %v2955_v58, %v2952_v41  ;;  %v2991_v41 = vrot.slane %v2989_v25, 3  ;;  %v5201_v58 = vld [vmem:[%s5283_s28 + $0x20] sm:$0xff]   ;;  %v3019_v25 = vor.u32 %v3018_v57, %v3015_v33 }
  0xd9   : > { %v2974_v42 = vor.u32 %v2973_v1, %v2970_v26  ;;  %v3054_v57 = vrot.slane %v3052_v17, 3  ;;  %v3348_v17 = vrot.slane %v5653_v30, 3  ;;  %v3350_v30 = vrot.slane %v5668_v7, 3 }
  0xda   : > { %v975_v54 = vsel %vm942_vm6, %v972_v56, %v974_v38  ;;  %v977_v37 = vsel %vm942_vm6, %v974_v38, %v976_v27  ;;  %v2957_v60 = vsel %vm2895_vm7, %v2947_v50, %v2956_v2  ;;  %v1383_v56 = vrot.slane %v5199_v48, 1  ;;  %v5203_v48 = vld [vmem:[%s5283_s28 + $0x30] sm:$0xff]  }
  0xdb   : > { %v2966_v9 = vsel %vm2895_vm7, %v2956_v2, %v2965_v40  ;;  %v2998_v50 = vshll.u32 %v5730_v0, 16  ;;  %v2975_v38 = vsel %vm2895_vm7, %v2965_v40, %v2974_v42 }
  0xdc   : > { %4597 = vmatmul.mubr.msk.bf16.gmra.mrb[24].mxu1 %vm481_vm3, %v971_v15  ;;  %v979_v15 = vsel %vm942_vm6, %v976_v27, %v978_v20  ;;  %v1384_v43 = vsel %vm942_vm6, %v1382_v52, %v1383_v56  ;;  %v1387_v27 = vrot.slane %v5201_v58, 1  ;;  %v5202_v20 = vld [vmem:[%s5283_s28 + $0x28] sm:$0xff]   ;;  %v3009_v52 = vrot.slane %v3007_v3, 3 }
  0xdd   : > { %4600 = vmatprep.mubr.msk.bf16.mxu1 %vm481_vm3, %v973_v44  ;;  %v2986_v44 = vshrl.u32 %v5725_v62, 16  ;;  %v3000_v32 = vrot.slane %v2998_v50, 3  ;;  %v1389_v26 = vrot.slane %v5202_v20, 1  ;;  %v5204_v50 = vld [vmem:[%s5283_s28 + $0x38] sm:$0xff]   ;;  %v1397_v20 = vrot.slane %v5206_v18, 1 }
  0xde   : > { %v1388_v2 = vsel %vm942_vm6, %v1385_v63, %v1387_v27  ;;  %v1393_v24 = vrot.slane %v5204_v50, 1  ;;  %v1409_v18 = vrot.slane %v5593_v28, 1 }
  0xdf   : > { %4767 = vmatmul.mubr.msk.bf16.gmra.mrb[4].mxu0 %vm481_vm3, %v2939_v14  ;;  %v2988_v14 = vrot.slane %v2986_v44, 2  ;;  %v3001_v40 = vor.u32 %v3000_v32, %v2997_v19  ;;  %v3025_v44 = vshll.u32 %v5763_v45, 16  ;;  %v3036_v19 = vrot.slane %v3034_v49, 3  ;;  %v5208_v49 = vld [vmem:[%s5283_s28 + $0x58] sm:$0xff]  }
  0xe0   : > { %4770 = vmatprep.mubr.msk.bf16.mxu0 %vm481_vm3, %v2948_v11  ;;  %v2984_v11 = vsel %vm2895_vm7, %v2974_v42, %v2983_v59  ;;  %v1401_v50 = vrot.slane %v5208_v49, 1  ;;  %v1804_v49 = vshrl.u32 %v5576_v16, 16 }
  0xe1   : > { %v2992_v21 = vor.u32 %v2991_v41, %v2988_v14  ;;  %v3027_v14 = vrot.slane %v3025_v44, 3  ;;  %v5205_v41 = vld [vmem:[%s5283_s28 + $0x40] sm:$0xff]  }
  0xe2   : > { %v1395_v58 = vrot.slane %v5205_v41, 1 }
  0xe4   : > { %4601 = vmatmul.mubr.msk.bf16.gmra.mrb[28].mxu1 %vm481_vm3, %v975_v54  ;;  %v1386_v54 = vsel %vm942_vm6, %v1383_v56, %v1385_v63  ;;  %v1391_v56 = vrot.slane %v5203_v48, 1 }
  0xe5   : > { %4604 = vmatprep.mubr.msk.bf16.mxu1 %vm481_vm3, %v977_v37  ;;  %v3004_v37 = vshrl.u32 %v5744_v4, 16 }
  0xe6   : > { %v1394_v32 = vsel %vm942_vm6, %v1391_v56, %v1393_v24 }
  0xe7   : > { %4771 = vmatmul.mubr.msk.bf16.gmra.mrb[8].mxu0 %vm481_vm3, %v2957_v60  ;;  %v2993_v60 = vsel %vm2895_vm7, %v2983_v59, %v2992_v21  ;;  %v3006_v1 = vrot.slane %v3004_v37, 2  ;;  %v3031_v59 = vshrl.u32 %v5768_v53, 16  ;;  %v3043_v37 = vshll.u32 %v5781_v51, 16 }
  0xe8   : > { %4774 = vmatprep.mubr.msk.bf16.mxu0 %vm481_vm3, %v2966_v9  ;;  %v3002_v9 = vsel %vm2895_vm7, %v2992_v21, %v3001_v40  ;;  %v1396_v21 = vsel %vm942_vm6, %v1393_v24, %v1395_v58 }
  0xe9   : > { %v3010_v42 = vor.u32 %v3009_v52, %v3006_v1  ;;  %v3045_v1 = vrot.slane %v3043_v37, 3  ;;  %v5207_v52 = vld [vmem:[%s5283_s28 + $0x50] sm:$0xff]  }
  0xea   : > { %v1399_v48 = vrot.slane %v5207_v52, 1  ;;  %v3352_v52 = vrot.slane %v5672_v12, 3 }
  0xeb   : > { %v3011_v63 = vsel %vm2895_vm7, %v3001_v40, %v3010_v42  ;;  %v3049_v40 = vshrl.u32 %v5785_v5, 16 }
  0xec   : > { %4605 = vmatmul.mubr.msk.bf16.gmra.mrb[32].mxu1 %vm481_vm3, %v979_v15  ;;  %v1390_v15 = vsel %vm942_vm6, %v1387_v27, %v1389_v26  ;;  %v3020_v27 = vsel %vm2895_vm7, %v3010_v42, %v3019_v25  ;;  %v3353_v7 = vsel %vm3342_vm8, %v3350_v30, %v3352_v52 }
  0xed   : > { %4610 = vmatprep.mubr.msk.bf16.mxu1 %vm481_vm3, %v1384_v43  ;;  %v3022_v43 = vshrl.u32 %v5763_v45, 16  ;;  %v3051_v33 = vrot.slane %v3049_v40, 2 }
  0xef   : > { %4775 = vmatmul.mubr.msk.bf16.gmra.mrb[12].mxu0 %vm481_vm3, %v2975_v38  ;;  %v3024_v38 = vrot.slane %v3022_v43, 2 }
  0xf0   : > { %4778 = vmatprep.mubr.msk.bf16.mxu0 %vm481_vm3, %v2984_v11  ;;  %v3033_v11 = vrot.slane %v3031_v59, 2  ;;  %v3336_v59 = vld [vmem:[%s5283_s28 + $0x10] sm:$0x8] }
  0xf2   : > { %v3037_v3 = vor.u32 %v3036_v19, %v3033_v11 }
  0xf4   : > { %4611 = vmatmul.mubr.msk.bf16.vlgmr.msra.gmra.mrb[0].mxu1 %vm481_vm3, %v1386_v54  ;;  %v3028_v54 = vor.u32 %v3027_v14, %v3024_v38  ;;  %v1403_v14 = vrot.slane %v5557_v34, 1 }
  0xf5   : > { %4614 = vmatprep.mubr.msk.bf16.mxu1 %vm481_vm3, %v1388_v2  ;;  %4837 = vmatpush3.bf16.msra.mxu1 %v5265_v6  ;;  %v1392_v6 = vsel %vm942_vm6, %v1389_v26, %v1391_v56  ;;  %v3040_v2 = vshrl.u32 %v5781_v51, 16  ;;  %v5920_v56 = vld [vmem:[%s5283_s28 + $0xa0] ss:$0 sps:$4 sm:$0x77]  }
  0xf6   : > { %v3029_v26 = vsel %vm2895_vm7, %v3019_v25, %v3028_v54  ;;  %v3058_v43 = vshrl.u32 %v5920_v56, 16  ;;  %v3061_v44 = vshll.u32 %v5920_v56, 16  ;;  %v3055_v25 = vor.u32 %v3054_v57, %v3051_v33 }
  0xf7   : > { %4779 = vmatmul.mubr.msk.bf16.gmra.mrb[16].mxu0 %vm481_vm3, %v2993_v60  ;;  %v3042_v60 = vrot.slane %v3040_v2, 2  ;;  %v1404_v19 = vsel %vm942_vm6, %v1401_v50, %v1403_v14  ;;  %v1407_v2 = vrot.slane %v5581_v10, 1  ;;  %v1415_v33 = vrot.slane %v5613_v55, 1 }
  0xf8   : > { %4782 = vmatprep.mubr.msk.bf16.mxu0 %vm481_vm3, %v3002_v9  ;;  %v3038_v9 = vsel %vm2895_vm7, %v3028_v54, %v3037_v3  ;;  %v3063_v38 = vrot.slane %v3061_v44, 3  ;;  %v3344_v54 = vrot.slane %v5636_v23, 3  ;;  %v3346_v23 = vrot.slane %v5649_v61, 3 }
  0xf9   : > { %v3046_v42 = vor.u32 %v3045_v1, %v3042_v60  ;;  %v1410_v61 = vsel %vm942_vm6, %v1407_v2, %v1409_v18  ;;  %v1795_v57 = vshrl.u32 %v5557_v34, 16 }
  0xfa   : > { %v3349_v60 = vsel %vm3342_vm8, %v3346_v23, %v3348_v17 }
  0xfb   : > { %v3047_v24 = vsel %vm2895_vm7, %v3037_v3, %v3046_v42  ;;  %v3056_v41 = vsel %vm2895_vm7, %v3046_v42, %v3055_v25  ;;  %v5198_v42 = vld [vmem:[%s5283_s28 + $0x98] ss:$0 sps:$4 sm:$0x11]   ;;  %v1797_v44 = vrot.slane %v1795_v57, 1 }
  0xfc   : > { %4615 = vmatmul.mubr.msk.bf16.gmra.mrb[4].mxu1 %vm481_vm3, %v1390_v15  ;;  %v1398_v15 = vsel %vm942_vm6, %v1395_v58, %v1397_v20  ;;  %v4228_v58 = vcombine.low %v3336_v59, %v5623_v46  ;;  %v3356_v59 = vrot.slane %v5693_v29, 3 }
  0xfd   : > { %4618 = vmatprep.mubr.msk.bf16.mxu1 %vm481_vm3, %v1392_v6  ;;  %v1400_v6 = vsel %vm942_vm6, %v1397_v20, %v1399_v48  ;;  %v3347_v20 = vsel %vm3342_vm8, %v3344_v54, %v3346_v23 }
  0xff   : > { %4783 = vmatmul.mubr.msk.bf16.gmra.mrb[20].mxu0 %vm481_vm3, %v3011_v63  ;;  %v3060_v63 = vrot.slane %v3058_v43, 2 }
 0x100   : > { %4786 = vmatprep.mubr.msk.bf16.mxu0 %vm481_vm3, %v3020_v27  ;;  %v1402_v27 = vsel %vm942_vm6, %v1399_v48, %v1401_v50  ;;  %v1413_v48 = vrot.slane %v5609_v39, 1  ;;  %v1807_v50 = vshll.u32 %v5576_v16, 16 }
 0x101   : > { %v3064_v11 = vor.u32 %v3063_v38, %v3060_v63  ;;  %v1816_v38 = vshll.u32 %v5581_v10, 16 }
 0x102   : > { %v1416_v43 = vsel %vm942_vm6, %v1413_v48, %v1415_v33 }
 0x103   : > { %v3065_v46 = vsel %vm2895_vm7, %v3055_v25, %v3064_v11 }
 0x104   : > { %4619 = vmatmul.mubr.msk.bf16.gmra.mrb[8].mxu1 %vm481_vm3, %v1394_v32  ;;  %v3343_v32 = vrot.slane %v4228_v58, 3  ;;  %v1809_v58 = vrot.slane %v1807_v50, 2 }
 0x105   : > { %4622 = vmatprep.mubr.msk.bf16.mxu1 %vm481_vm3, %v1396_v21  ;;  %v1405_v21 = vrot.slane %v5576_v16, 1 }
 0x106   : > { %v3345_v37 = vsel %vm3342_vm8, %v3343_v32, %v3344_v54  ;;  %v3360_v32 = vrot.slane %v5712_v13, 3  ;;  %v1822_v54 = vshrl.u32 %v5593_v28, 16 }
 0x107   : > { %4787 = vmatmul.mubr.msk.bf16.gmra.mrb[24].mxu0 %vm481_vm3, %v3029_v26  ;;  %v1406_v3 = vsel %vm942_vm6, %v1403_v14, %v1405_v21  ;;  %v1408_v40 = vsel %vm942_vm6, %v1405_v21, %v1407_v2  ;;  %v1411_v26 = vrot.slane %v5597_v31, 1  ;;  %v1825_v21 = vshll.u32 %v5593_v28, 16 }
 0x108   : > { %4790 = vmatprep.mubr.msk.bf16.mxu0 %vm481_vm3, %v3038_v9  ;;  %v3351_v9 = vsel %vm3342_vm8, %v3348_v17, %v3350_v30 }
 0x109   : > { %v1412_v1 = vsel %vm942_vm6, %v1409_v18, %v1411_v26  ;;  %v1414_v12 = vsel %vm942_vm6, %v1411_v26, %v1413_v48  ;;  %v1827_v23 = vrot.slane %v1825_v21, 2  ;;  %v1840_v26 = vshrl.u32 %v5609_v39, 16 }
 0x10b   : > { %v1842_v48 = vrot.slane %v1840_v26, 1 }
 0x10c   : > { %4623 = vmatmul.mubr.msk.bf16.gmra.mrb[12].mxu1 %vm481_vm3, %v1398_v15  ;;  %v1798_v15 = vshll.u32 %v5557_v34, 16  ;;  %v1417_v34 = vrot.slane %v5198_v42, 1  ;;  %v1861_v42 = vshll.u32 %v5629_v47, 16 }
 0x10d   : > { %4626 = vmatprep.mubr.msk.bf16.mxu1 %vm481_vm3, %v1400_v6  ;;  %v3354_v6 = vrot.slane %v5689_v35, 3  ;;  %v1813_v35 = vshrl.u32 %v5581_v10, 16 }
 0x10e   : > { %v1800_v25 = vrot.slane %v1798_v15, 2  ;;  %v1418_v29 = vsel %vm942_vm6, %v1415_v33, %v1417_v34  ;;  %v3366_v33 = vrot.slane %v5744_v4, 3 }
 0x10f   : > { %4791 = vmatmul.mubr.msk.bf16.gmra.mrb[28].mxu0 %vm481_vm3, %v3047_v24  ;;  %v3355_v24 = vsel %vm3342_vm8, %v3352_v52, %v3354_v6  ;;  %v3357_v14 = vsel %vm3342_vm8, %v3354_v6, %v3356_v59  ;;  %v1815_v11 = vrot.slane %v1813_v35, 1  ;;  %v3376_v35 = vrot.slane %v5785_v5, 3 }
 0x110   : > { %4794 = vmatprep.mubr.msk.bf16.mxu0 %vm481_vm3, %v3056_v41  ;;  %v1801_v63 = vor.u32 %v1800_v25, %v1797_v44  ;;  %v1806_v41 = vrot.slane %v1804_v49, 1  ;;  %v3372_v49 = vrot.slane %v5768_v53, 3 }
 0x112   : > { %v1802_v16 = vsel %vm1695_vm4, %v5472_v22, %v1801_v63  ;;  %v1810_v10 = vor.u32 %v1809_v58, %v1806_v41  ;;  %v1834_v22 = vshll.u32 %v5597_v31, 16 }
 0x114   : > { %4627 = vmatmul.mubr.msk.bf16.gmra.mrb[16].mxu1 %vm481_vm3, %v1402_v27  ;;  %v3358_v27 = vrot.slane %v5707_v8, 3  ;;  %v1831_v8 = vshrl.u32 %v5597_v31, 16  ;;  %v1811_v13 = vsel %vm1695_vm4, %v1801_v63, %v1810_v10  ;;  %v1836_v18 = vrot.slane %v1834_v22, 2 }
 0x115   : > { %4630 = vmatprep.mubr.msk.bf16.mxu1 %vm481_vm3, %v1404_v19  ;;  %v1818_v19 = vrot.slane %v1816_v38, 2 }
 0x116   : > { %v1833_v17 = vrot.slane %v1831_v8, 1 }
 0x117   : > { %4795 = vmatmul.mubr.msk.bf16.gmra.mrb[32].mxu0 %vm481_vm3, %v3065_v46  ;;  %v3359_v46 = vsel %vm3342_vm8, %v3356_v59, %v3358_v27  ;;  %v1819_v2 = vor.u32 %v1818_v19, %v1815_v11  ;;  %v3370_v59 = vrot.slane %v5763_v45, 3  ;;  %v3374_v45 = vrot.slane %v5781_v51, 3 }
 0x118   : > { %4800 = vmatprep.mubr.msk.bf16.mxu0 %vm481_vm3, %v3345_v37  ;;  %v3361_v37 = vsel %vm3342_vm8, %v3358_v27, %v3360_v32  ;;  %v1837_v30 = vor.u32 %v1836_v18, %v1833_v17  ;;  %v6085_v18 = vld [vmem:[%s6255_s3] ss:$0 sm:$0xff] }
 0x119   : > { %v1820_v28 = vsel %vm1695_vm4, %v1810_v10, %v1819_v2  ;;  %v3375_v53 = vsel %vm3342_vm8, %v3372_v49, %v3374_v45  ;;  %v3377_v38 = vsel %vm3342_vm8, %v3374_v45, %v3376_v35 }
 0x11c   : > { %4631 = vmatmul.mubr.msk.bf16.gmra.mrb[20].mxu1 %vm481_vm3, %v1406_v3  ;;  %v1824_v3 = vrot.slane %v1822_v54, 1 }
 0x11d   : > { %4634 = vmatprep.mubr.msk.bf16.mxu1 %vm481_vm3, %v1408_v40  ;;  %v3362_v40 = vrot.slane %v5725_v62, 3  ;;  %v1849_v62 = vshrl.u32 %v5613_v55, 16 }
 0x11e   : > { %v1828_v31 = vor.u32 %v1827_v23, %v1824_v3 }
 0x11f   : > { %4801 = vmatmul.mubr.msk.bf16.vlgmr.msra.gmra.mrb[0].mxu0 %vm481_vm3, %v3347_v20  ;;  %v3364_v20 = vrot.slane %v5730_v0, 3  ;;  %v1851_v57 = vrot.slane %v1849_v62, 1 }
 0x120   : > { %4804 = vmatprep.mubr.msk.bf16.mxu0 %vm481_vm3, %v3349_v60  ;;  %v1843_v60 = vshll.u32 %v5609_v39, 16  ;;  %v1829_v0 = vsel %vm1695_vm4, %v1819_v2, %v1828_v31  ;;  %v1838_v39 = vsel %vm1695_vm4, %v1828_v31, %v1837_v30 }
 0x121   : > { %v3365_v52 = vsel %vm3342_vm8, %v3362_v40, %v3364_v20  ;;  %v3367_v6 = vsel %vm3342_vm8, %v3364_v20, %v3366_v33 }
 0x124   : > { %4635 = vmatmul.mubr.msk.bf16.gmra.mrb[24].mxu1 %vm481_vm3, %v1410_v61  ;;  %v3363_v61 = vsel %vm3342_vm8, %v3360_v32, %v3362_v40  ;;  %v6080_v40 = vld [vmem:[%s6254_s2] ss:$0 sm:$0xff] }
 0x125   : > { %4638 = vmatprep.mubr.msk.bf16.mxu1 %vm481_vm3, %v1412_v1  ;;  %v1852_v1 = vshll.u32 %v5613_v55, 16 }
 0x127   : > { %4805 = vmatmul.mubr.msk.bf16.gmra.mrb[4].mxu0 %vm481_vm3, %v3351_v9  ;;  %v1845_v9 = vrot.slane %v1843_v60, 2  ;;  %v1854_v15 = vrot.slane %v1852_v1, 2 }
 0x128   : > { %4808 = vmatprep.mubr.msk.bf16.mxu0 %vm481_vm3, %v3353_v7  ;;  %v3368_v7 = vrot.slane %v5750_v36, 3  ;;  %v1863_v36 = vrot.slane %v1861_v42, 2 }
 0x129   : > { %v1846_v55 = vor.u32 %v1845_v9, %v1842_v48 }
 0x12a   : > { %v3369_v4 = vsel %vm3342_vm8, %v3366_v33, %v3368_v7  ;;  %v3371_v50 = vsel %vm3342_vm8, %v3368_v7, %v3370_v59 }
 0x12b   : > { %v1847_v44 = vsel %vm1695_vm4, %v1837_v30, %v1846_v55 }
 0x12c   : > { %4639 = vmatmul.mubr.msk.bf16.gmra.mrb[28].mxu1 %vm481_vm3, %v1414_v12  ;;  %v1858_v12 = vshrl.u32 %v5629_v47, 16 }
 0x12d   : > { %4642 = vmatprep.mubr.msk.bf16.mxu1 %vm481_vm3, %v1416_v43  ;;  %v1855_v43 = vor.u32 %v1854_v15, %v1851_v57 }
 0x12e   : > { %v1860_v25 = vrot.slane %v1858_v12, 1 }
 0x12f   : > { %4809 = vmatmul.mubr.msk.bf16.gmra.mrb[8].mxu0 %vm481_vm3, %v3355_v24  ;;  %v1856_v34 = vsel %vm1695_vm4, %v1846_v55, %v1855_v43  ;;  %v3373_v24 = vsel %vm3342_vm8, %v3370_v59, %v3372_v49 }
 0x130   : > { %4812 = vmatprep.mubr.msk.bf16.mxu0 %vm481_vm3, %v3357_v14  ;;  %v1864_v47 = vor.u32 %v1863_v36, %v1860_v25  ;;  %v3378_v14 = vrot.slane %v5920_v56, 3 }
 0x132   : > { %v1865_v63 = vsel %vm1695_vm4, %v1855_v43, %v1864_v47 }
 0x134   : > { %4643 = vmatmul.mubr.msk.bf16.gmra.mrb[32].mxu1 %vm481_vm3, %v1418_v29  ;;  %v3379_v29 = vsel %vm3342_vm8, %v3376_v35, %v3378_v14 }
 0x135   : > { %4668 = vmatprep.mubr.msk.bf16.mxu1 %vm481_vm3, %v1802_v16 }
 0x137   : > { %4813 = vmatmul.mubr.msk.bf16.gmra.mrb[12].mxu0 %vm481_vm3, %v3359_v46 }
 0x138   : > { %4816 = vmatprep.mubr.msk.bf16.mxu0 %vm481_vm3, %v3361_v37 }
 0x13c   : > { %4669 = vmatmul.mubr.msk.bf16.vlgmr.msra.gmra.mrb[20].mxu1 %vm481_vm3, %v1811_v13 }
 0x13d   : > { %4672 = vmatprep.mubr.msk.bf16.mxu1 %vm481_vm3, %v1820_v28 }
 0x13f   : > { %4817 = vmatmul.mubr.msk.bf16.gmra.mrb[16].mxu0 %vm481_vm3, %v3363_v61 }
 0x140   : > { %4820 = vmatprep.mubr.msk.bf16.mxu0 %vm481_vm3, %v3365_v52 }
 0x144   : > { %4673 = vmatmul.mubr.msk.bf16.gmra.mrb[24].mxu1 %vm481_vm3, %v1829_v0 }
 0x145   : > { %4676 = vmatprep.mubr.msk.bf16.mxu1 %vm481_vm3, %v1838_v39 }
 0x147   : > { %4821 = vmatmul.mubr.msk.bf16.gmra.mrb[20].mxu0 %vm481_vm3, %v3367_v6 }
 0x148   : > { %4824 = vmatprep.mubr.msk.bf16.mxu0 %vm481_vm3, %v3369_v4 }
 0x14c   : > { %4677 = vmatmul.mubr.msk.bf16.gmra.mrb[28].mxu1 %vm481_vm3, %v1847_v44 }
 0x14d   : > { %4680 = vmatprep.mubr.msk.bf16.mxu1 %vm481_vm3, %v1856_v34 }
 0x14f   : > { %4825 = vmatmul.mubr.msk.bf16.gmra.mrb[24].mxu0 %vm481_vm3, %v3371_v50 }
 0x150   : > { %4828 = vmatprep.mubr.msk.bf16.mxu0 %vm481_vm3, %v3373_v24 }
 0x154   : > { %4681 = vmatmul.mubr.msk.bf16.gmra.mrb[32].mxu1 %vm481_vm3, %v1865_v63 }
 0x157   : > { %4829 = vmatmul.mubr.msk.bf16.gmra.mrb[28].mxu0 %vm481_vm3, %v3375_v53 }
 0x158   : > { %4832 = vmatprep.mubr.msk.bf16.mxu0 %vm481_vm3, %v3377_v38 }
 0x15f   : > { %4833 = vmatmul.mubr.msk.bf16.gmra.mrb[32].mxu0 %vm481_vm3, %v3379_v29 }
 0x1c7   : > { %v4612_v41 = vpop.f32.mrb[0].mxu1 }
 0x1c8   : > { %v1510_v51 = vpop.f32.mrb[1].mxu1 }
 0x1c9   : > { %v4613_v58 = vpop.f32.mrb[2].mxu1 }
 0x1ca   : > { %v1513_v5 = vpop.f32.mrb[3].mxu1 }
 0x1cf   : > { %v4616_v27 = vpop.f32.mrb[4].mxu1 }
 0x1d0   : > { %v1526_v16 = vpop.f32.mrb[5].mxu1 }
 0x1d1   : > { %v4617_v11 = vpop.f32.mrb[6].mxu1 }
 0x1d2   : > { %v1529_v19 = vpop.f32.mrb[7].mxu1 }
 0x1d7   : > { %v6053_v32 = vpop.f32.mrb[8].mxu1 }
 0x1d8   : > { %v6055_v10 = vpop.f32.mrb[9].mxu1 }
 0x1d9   : > { %v6057_v54 = vpop.f32.mrb[10].mxu1 }
 0x1da   : > { %v6059_v21 = vpop.f32.mrb[11].mxu1 }
 0x1df   : > { %v6061_v56 = vpop.f32.mrb[12].mxu1 }
 0x1e0   : > { %v6063_v46 = vpop.f32.mrb[13].mxu1 }
 0x1e1   : > { %v6065_v2 = vpop.f32.mrb[14].mxu1 }
 0x1e2   : > { %v6067_v8 = vpop.f32.mrb[15].mxu1 }
 0x1e7   : > { %v6069_v22 = vpop.f32.mrb[16].mxu1 }
 0x1e8   : > { %v6071_v37 = vpop.f32.mrb[17].mxu1 }
 0x1e9   : > { %v6073_v13 = vpop.f32.mrb[18].mxu1 }
 0x1ea   : > { %v6075_v3 = vpop.f32.mrb[19].mxu1 }
 0x1f2   : > { %v4802_v23 = vpop.f32.mrb[0].mxu0 }
 0x1f3   : > { %v4838_v28 = vadd.f32 %v4802_v23, %v4612_v41  ;;  %v3471_v17 = vpop.f32.mrb[1].mxu0 }
 0x1f4   : > { %v4839_v20 = vadd.f32 %v3471_v17, %v1510_v51  ;;  %v4803_v31 = vpop.f32.mrb[2].mxu0 }
 0x1f5   : > { %v3659_v26 = vmul.f32 %v4838_v28, %v6080_v40  ;;  %v4840_v60 = vadd.f32 %v4803_v31, %v4613_v58  ;;  %v3474_v61 = vpop.f32.mrb[3].mxu0 }
 0x1f6   : > { %v3657_v30 = vmul.f32 %v4839_v20, %v6080_v40  ;;  %v4841_v62 = vadd.f32 %v3474_v61, %v1513_v5 }
 0x1f7   : > { %v3702_v1 = vadd.f32 %v6085_v18, %v3659_v26  ;;  %v3660_v52 = vmul.f32 %v4840_v60, %v6080_v40 }
 0x1f8   : > { %v3700_v0 = vadd.f32 %v6085_v18, %v3657_v30  ;;  %v3658_v48 = vmul.f32 %v4841_v62, %v6080_v40 }
 0x1f9   : > { %v3738_v9 = vmax.f32 %v3702_v1, 0.0  ;;  %v3703_v33 = vadd.f32 %v6085_v18, %v3660_v52 }
 0x1fa   : > { %v3736_v39 = vmax.f32 %v3700_v0, 0.0  ;;  %v3701_v57 = vadd.f32 %v6085_v18, %v3658_v48  ;;  %v4806_v15 = vpop.f32.mrb[4].mxu0 }
 0x1fb   : > { %v4289_v7 = vpack.c.bf16 %v3738_v9, %v3738_v9  ;;  %v3739_v55 = vmax.f32 %v3703_v33, 0.0  ;;  %v4842_v12 = vadd.f32 %v4806_v15, %v4616_v27  ;;  %v3487_v42 = vpop.f32.mrb[5].mxu0 }
 0x1fc   : > { %v4287_v6 = vpack.c.bf16 %v3736_v39, %v3736_v39  ;;  %v3737_v43 = vmax.f32 %v3701_v57, 0.0  ;;  %v4843_v4 = vadd.f32 %v3487_v42, %v1526_v16  ;;  %v4807_v44 = vpop.f32.mrb[6].mxu0 }
 0x1fd   : > { %3919 = vst.msk [vmem:[%s6098_s22 + $0x8] sm:$0xf] %vm3916_vm9, %v4289_v7  ;;  %v4290_v25 = vpack.c.bf16 %v3739_v55, %v3739_v55  ;;  %v3663_v36 = vmul.f32 %v4842_v12, %v6080_v40  ;;  %v4844_v59 = vadd.f32 %v4807_v44, %v4617_v11  ;;  %v3490_v34 = vpop.f32.mrb[7].mxu0 }
 0x1fe   : > { %3917 = vst.msk [vmem:[%s6098_s22] sm:$0xf] %vm3916_vm9, %v4287_v6  ;;  %v4288_v49 = vpack.c.bf16 %v3737_v43, %v3737_v43  ;;  %v3661_v47 = vmul.f32 %v4843_v4, %v6080_v40  ;;  %v4845_v50 = vadd.f32 %v3490_v34, %v1529_v19 }
 0x1ff   : > { %3920 = vst.msk [vmem:[%s6098_s22 + $0xc] sm:$0xf] %vm3916_vm9, %v4290_v25  ;;  %v3706_v24 = vadd.f32 %v6085_v18, %v3663_v36  ;;  %v3664_v63 = vmul.f32 %v4844_v59, %v6080_v40 }
 0x200   : > { %3918 = vst.msk [vmem:[%s6098_s22 + $0x4] sm:$0xf] %vm3916_vm9, %v4288_v49  ;;  %v3704_v45 = vadd.f32 %v6085_v18, %v3661_v47  ;;  %v3662_v35 = vmul.f32 %v4845_v50, %v6080_v40 }
 0x201   : > { %v3742_v53 = vmax.f32 %v3706_v24, 0.0  ;;  %v3707_v38 = vadd.f32 %v6085_v18, %v3664_v63 }
 0x202   : > { %v3740_v14 = vmax.f32 %v3704_v45, 0.0  ;;  %v3705_v29 = vadd.f32 %v6085_v18, %v3662_v35  ;;  %v4810_v41 = vpop.f32.mrb[8].mxu0 }
 0x203   : > { %v4293_v51 = vpack.c.bf16 %v3742_v53, %v3742_v53  ;;  %v3743_v58 = vmax.f32 %v3707_v38, 0.0  ;;  %v4846_v5 = vadd.f32 %v4810_v41, %v6053_v32  ;;  %v3503_v27 = vpop.f32.mrb[9].mxu0 }
 0x204   : > { %v4291_v16 = vpack.c.bf16 %v3740_v14, %v3740_v14  ;;  %v3741_v11 = vmax.f32 %v3705_v29, 0.0  ;;  %v4847_v19 = vadd.f32 %v3503_v27, %v6055_v10  ;;  %v4811_v23 = vpop.f32.mrb[10].mxu0 }
 0x205   : > { %3923 = vst.msk [vmem:[%s6098_s22 + $0x18] sm:$0xf] %vm3916_vm9, %v4293_v51  ;;  %v4294_v28 = vpack.c.bf16 %v3743_v58, %v3743_v58  ;;  %v3667_v17 = vmul.f32 %v4846_v5, %v6080_v40  ;;  %v4848_v20 = vadd.f32 %v4811_v23, %v6057_v54  ;;  %v3506_v31 = vpop.f32.mrb[11].mxu0 }
 0x206   : > { %3921 = vst.msk [vmem:[%s6098_s22 + $0x10] sm:$0xf] %vm3916_vm9, %v4291_v16  ;;  %v4292_v26 = vpack.c.bf16 %v3741_v11, %v3741_v11  ;;  %v3665_v32 = vmul.f32 %v4847_v19, %v6080_v40  ;;  %v4849_v60 = vadd.f32 %v3506_v31, %v6059_v21 }
 0x207   : > { %3924 = vst.msk [vmem:[%s6098_s22 + $0x1c] sm:$0xf] %vm3916_vm9, %v4294_v28  ;;  %v3710_v10 = vadd.f32 %v6085_v18, %v3667_v17  ;;  %v3668_v61 = vmul.f32 %v4848_v20, %v6080_v40 }
 0x208   : > { %3922 = vst.msk [vmem:[%s6098_s22 + $0x14] sm:$0xf] %vm3916_vm9, %v4292_v26  ;;  %v3708_v30 = vadd.f32 %v6085_v18, %v3665_v32  ;;  %v3666_v54 = vmul.f32 %v4849_v60, %v6080_v40 }
 0x209   : > { %v3746_v62 = vmax.f32 %v3710_v10, 0.0  ;;  %v3711_v1 = vadd.f32 %v6085_v18, %v3668_v61 }
 0x20a   : > { %v3744_v52 = vmax.f32 %v3708_v30, 0.0  ;;  %v3709_v0 = vadd.f32 %v6085_v18, %v3666_v54  ;;  %v4814_v21 = vpop.f32.mrb[12].mxu0 }
 0x20b   : > { %v4297_v48 = vpack.c.bf16 %v3746_v62, %v3746_v62  ;;  %v3747_v9 = vmax.f32 %v3711_v1, 0.0  ;;  %v4850_v33 = vadd.f32 %v4814_v21, %v6061_v56  ;;  %v3519_v39 = vpop.f32.mrb[13].mxu0 }
 0x20c   : > { %v4295_v57 = vpack.c.bf16 %v3744_v52, %v3744_v52  ;;  %v3745_v15 = vmax.f32 %v3709_v0, 0.0  ;;  %v4851_v7 = vadd.f32 %v3519_v39, %v6063_v46  ;;  %v4815_v55 = vpop.f32.mrb[14].mxu0 }
 0x20d   : > { %3927 = vst.msk [vmem:[%s6098_s22 + $0x28] sm:$0xf] %vm3916_vm9, %v4297_v48  ;;  %v4298_v12 = vpack.c.bf16 %v3747_v9, %v3747_v9  ;;  %v3671_v42 = vmul.f32 %v4850_v33, %v6080_v40  ;;  %v4852_v6 = vadd.f32 %v4815_v55, %v6065_v2  ;;  %v3522_v43 = vpop.f32.mrb[15].mxu0 }
 0x20e   : > { %3925 = vst.msk [vmem:[%s6098_s22 + $0x20] sm:$0xf] %vm3916_vm9, %v4295_v57  ;;  %v4296_v56 = vpack.c.bf16 %v3745_v15, %v3745_v15  ;;  %v3669_v44 = vmul.f32 %v4851_v7, %v6080_v40  ;;  %v4853_v25 = vadd.f32 %v3522_v43, %v6067_v8 }
 0x20f   : > { %v4670_v4 = vpop.f32.mrb[20].mxu1  ;;  %3928 = vst.msk [vmem:[%s6098_s22 + $0x2c] sm:$0xf] %vm3916_vm9, %v4298_v12  ;;  %v3714_v46 = vadd.f32 %v6085_v18, %v3671_v42  ;;  %v3672_v59 = vmul.f32 %v4852_v6, %v6080_v40 }
 0x210   : > { %v2037_v36 = vpop.f32.mrb[21].mxu1  ;;  %3926 = vst.msk [vmem:[%s6098_s22 + $0x24] sm:$0xf] %vm3916_vm9, %v4296_v56  ;;  %v3712_v2 = vadd.f32 %v6085_v18, %v3669_v44  ;;  %v3670_v49 = vmul.f32 %v4853_v25, %v6080_v40 }
 0x211   : > { %v4671_v34 = vpop.f32.mrb[22].mxu1  ;;  %v3750_v50 = vmax.f32 %v3714_v46, 0.0  ;;  %v3715_v24 = vadd.f32 %v6085_v18, %v3672_v59 }
 0x212   : > { %v2040_v47 = vpop.f32.mrb[23].mxu1  ;;  %v3748_v8 = vmax.f32 %v3712_v2, 0.0  ;;  %v3713_v63 = vadd.f32 %v6085_v18, %v3670_v49  ;;  %v4818_v45 = vpop.f32.mrb[16].mxu0 }
 0x213   : > { %v4301_v35 = vpack.c.bf16 %v3750_v50, %v3750_v50  ;;  %v3751_v53 = vmax.f32 %v3715_v24, 0.0  ;;  %v4854_v38 = vadd.f32 %v4818_v45, %v6069_v22  ;;  %v3535_v14 = vpop.f32.mrb[17].mxu0 }
 0x214   : > { %v4299_v29 = vpack.c.bf16 %v3748_v8, %v3748_v8  ;;  %v3749_v41 = vmax.f32 %v3713_v63, 0.0  ;;  %v4855_v51 = vadd.f32 %v3535_v14, %v6071_v37  ;;  %v4819_v58 = vpop.f32.mrb[18].mxu0 }
 0x215   : > { %3931 = vst.msk [vmem:[%s6098_s22 + $0x38] sm:$0xf] %vm3916_vm9, %v4301_v35  ;;  %v4302_v5 = vpack.c.bf16 %v3751_v53, %v3751_v53  ;;  %v3675_v27 = vmul.f32 %v4854_v38, %v6080_v40  ;;  %v4856_v16 = vadd.f32 %v4819_v58, %v6073_v13  ;;  %v3538_v11 = vpop.f32.mrb[19].mxu0 }
 0x216   : > { %3929 = vst.msk [vmem:[%s6098_s22 + $0x30] sm:$0xf] %vm3916_vm9, %v4299_v29  ;;  %v4300_v22 = vpack.c.bf16 %v3749_v41, %v3749_v41  ;;  %v3673_v23 = vmul.f32 %v4855_v51, %v6080_v40  ;;  %v4857_v28 = vadd.f32 %v3538_v11, %v6075_v3 }
 0x217   : > { %v4674_v19 = vpop.f32.mrb[24].mxu1  ;;  %3932 = vst.msk [vmem:[%s6098_s22 + $0x3c] sm:$0xf] %vm3916_vm9, %v4302_v5  ;;  %v3718_v37 = vadd.f32 %v6085_v18, %v3675_v27  ;;  %v3676_v20 = vmul.f32 %v4856_v16, %v6080_v40 }
 0x218   : > { %v2053_v17 = vpop.f32.mrb[25].mxu1  ;;  %3930 = vst.msk [vmem:[%s6098_s22 + $0x34] sm:$0xf] %vm3916_vm9, %v4300_v22  ;;  %v3716_v13 = vadd.f32 %v6085_v18, %v3673_v23  ;;  %v3674_v26 = vmul.f32 %v4857_v28, %v6080_v40 }
 0x219   : > { %v4675_v31 = vpop.f32.mrb[26].mxu1  ;;  %v3754_v60 = vmax.f32 %v3718_v37, 0.0  ;;  %v3719_v10 = vadd.f32 %v6085_v18, %v3676_v20 }
 0x21a   : > { %v2056_v32 = vpop.f32.mrb[27].mxu1  ;;  %v3752_v3 = vmax.f32 %v3716_v13, 0.0  ;;  %v3717_v61 = vadd.f32 %v6085_v18, %v3674_v26  ;;  %v4822_v30 = vpop.f32.mrb[20].mxu0 }
 0x21b   : > { %v4305_v54 = vpack.c.bf16 %v3754_v60, %v3754_v60  ;;  %v3755_v62 = vmax.f32 %v3719_v10, 0.0  ;;  %v4858_v1 = vadd.f32 %v4822_v30, %v4670_v4  ;;  %v3551_v52 = vpop.f32.mrb[21].mxu0 }
 0x21c   : > { %v4303_v0 = vpack.c.bf16 %v3752_v3, %v3752_v3  ;;  %v3753_v21 = vmax.f32 %v3717_v61, 0.0  ;;  %v4859_v48 = vadd.f32 %v3551_v52, %v2037_v36  ;;  %v4823_v9 = vpop.f32.mrb[22].mxu0 }
 0x21d   : > { %3935 = vst.msk [vmem:[%s6098_s22 + $0x48] sm:$0xf] %vm3916_vm9, %v4305_v54  ;;  %v4306_v33 = vpack.c.bf16 %v3755_v62, %v3755_v62  ;;  %v3679_v39 = vmul.f32 %v4858_v1, %v6080_v40  ;;  %v4860_v57 = vadd.f32 %v4823_v9, %v4671_v34  ;;  %v3554_v15 = vpop.f32.mrb[23].mxu0 }
 0x21e   : > { %3933 = vst.msk [vmem:[%s6098_s22 + $0x40] sm:$0xf] %vm3916_vm9, %v4303_v0  ;;  %v4304_v55 = vpack.c.bf16 %v3753_v21, %v3753_v21  ;;  %v3677_v12 = vmul.f32 %v4859_v48, %v6080_v40  ;;  %v4861_v42 = vadd.f32 %v3554_v15, %v2040_v47 }
 0x21f   : > { %v4678_v7 = vpop.f32.mrb[28].mxu1  ;;  %3936 = vst.msk [vmem:[%s6098_s22 + $0x4c] sm:$0xf] %vm3916_vm9, %v4306_v33  ;;  %v3722_v43 = vadd.f32 %v6085_v18, %v3679_v39  ;;  %v3680_v4 = vmul.f32 %v4860_v57, %v6080_v40 }
 0x220   : > { %v2069_v6 = vpop.f32.mrb[29].mxu1  ;;  %3934 = vst.msk [vmem:[%s6098_s22 + $0x44] sm:$0xf] %vm3916_vm9, %v4304_v55  ;;  %v3720_v44 = vadd.f32 %v6085_v18, %v3677_v12  ;;  %v3678_v25 = vmul.f32 %v4861_v42, %v6080_v40 }
 0x221   : > { %v4679_v56 = vpop.f32.mrb[30].mxu1  ;;  %v3758_v46 = vmax.f32 %v3722_v43, 0.0  ;;  %v3723_v59 = vadd.f32 %v6085_v18, %v3680_v4 }
 0x222   : > { %v2072_v36 = vpop.f32.mrb[31].mxu1  ;;  %v3756_v34 = vmax.f32 %v3720_v44, 0.0  ;;  %v3721_v2 = vadd.f32 %v6085_v18, %v3678_v25  ;;  %v4826_v49 = vpop.f32.mrb[24].mxu0 }
 0x223   : > { %v4309_v47 = vpack.c.bf16 %v3758_v46, %v3758_v46  ;;  %v3759_v50 = vmax.f32 %v3723_v59, 0.0  ;;  %v4862_v24 = vadd.f32 %v4826_v49, %v4674_v19  ;;  %v3567_v8 = vpop.f32.mrb[25].mxu0 }
 0x224   : > { %v4307_v63 = vpack.c.bf16 %v3756_v34, %v3756_v34  ;;  %v3757_v45 = vmax.f32 %v3721_v2, 0.0  ;;  %v4863_v35 = vadd.f32 %v3567_v8, %v2053_v17  ;;  %v4827_v53 = vpop.f32.mrb[26].mxu0 }
 0x225   : > { %3939 = vst.msk [vmem:[%s6098_s22 + $0x58] sm:$0xf] %vm3916_vm9, %v4309_v47  ;;  %v4310_v38 = vpack.c.bf16 %v3759_v50, %v3759_v50  ;;  %v3683_v14 = vmul.f32 %v4862_v24, %v6080_v40  ;;  %v4864_v29 = vadd.f32 %v4827_v53, %v4675_v31  ;;  %v3570_v41 = vpop.f32.mrb[27].mxu0 }
 0x226   : > { %3937 = vst.msk [vmem:[%s6098_s22 + $0x50] sm:$0xf] %vm3916_vm9, %v4307_v63  ;;  %v4308_v58 = vpack.c.bf16 %v3757_v45, %v3757_v45  ;;  %v3681_v5 = vmul.f32 %v4863_v35, %v6080_v40  ;;  %v4865_v27 = vadd.f32 %v3570_v41, %v2056_v32 }
 0x227   : > { %v4682_v51 = vpop.f32.mrb[32].mxu1  ;;  %3940 = vst.msk [vmem:[%s6098_s22 + $0x5c] sm:$0xf] %vm3916_vm9, %v4310_v38  ;;  %v3726_v11 = vadd.f32 %v6085_v18, %v3683_v14  ;;  %v3684_v19 = vmul.f32 %v4864_v29, %v6080_v40 }
 0x228   : > { %v2085_v16 = vpop.f32.mrb[33].mxu1  ;;  %3938 = vst.msk [vmem:[%s6098_s22 + $0x54] sm:$0xf] %vm3916_vm9, %v4308_v58  ;;  %v3724_v23 = vadd.f32 %v6085_v18, %v3681_v5  ;;  %v3682_v28 = vmul.f32 %v4865_v27, %v6080_v40 }
 0x229   : > { %v4683_v22 = vpop.f32.mrb[34].mxu1  ;;  %v3762_v37 = vmax.f32 %v3726_v11, 0.0  ;;  %v3727_v20 = vadd.f32 %v6085_v18, %v3684_v19 }
 0x22a   : > { %v2088_v17 = vpop.f32.mrb[35].mxu1  ;;  %v3760_v31 = vmax.f32 %v3724_v23, 0.0  ;;  %v3725_v13 = vadd.f32 %v6085_v18, %v3682_v28  ;;  %v4830_v26 = vpop.f32.mrb[28].mxu0 }
 0x22b   : > { %v4313_v32 = vpack.c.bf16 %v3762_v37, %v3762_v37  ;;  %v3763_v60 = vmax.f32 %v3727_v20, 0.0  ;;  %v4866_v10 = vadd.f32 %v4830_v26, %v4678_v7  ;;  %v3583_v3 = vpop.f32.mrb[29].mxu0 }
 0x22c   : > { %v4311_v61 = vpack.c.bf16 %v3760_v31, %v3760_v31  ;;  %v3761_v30 = vmax.f32 %v3725_v13, 0.0  ;;  %v4867_v54 = vadd.f32 %v3583_v3, %v2069_v6  ;;  %v4831_v62 = vpop.f32.mrb[30].mxu0 }
 0x22d   : > { %3943 = vst.msk [vmem:[%s6098_s22 + $0x68] sm:$0xf] %vm3916_vm9, %v4313_v32  ;;  %v4314_v1 = vpack.c.bf16 %v3763_v60, %v3763_v60  ;;  %v3687_v52 = vmul.f32 %v4866_v10, %v6080_v40  ;;  %v4868_v0 = vadd.f32 %v4831_v62, %v4679_v56  ;;  %v3586_v21 = vpop.f32.mrb[31].mxu0 }
 0x22e   : > { %3941 = vst.msk [vmem:[%s6098_s22 + $0x60] sm:$0xf] %vm3916_vm9, %v4311_v61  ;;  %v4312_v48 = vpack.c.bf16 %v3761_v30, %v3761_v30  ;;  %v3685_v9 = vmul.f32 %v4867_v54, %v6080_v40  ;;  %v4869_v33 = vadd.f32 %v3586_v21, %v2072_v36 }
 0x22f   : > { %3944 = vst.msk [vmem:[%s6098_s22 + $0x6c] sm:$0xf] %vm3916_vm9, %v4314_v1  ;;  %v3730_v39 = vadd.f32 %v6085_v18, %v3687_v52  ;;  %v3688_v57 = vmul.f32 %v4868_v0, %v6080_v40 }
 0x230   : > { %3942 = vst.msk [vmem:[%s6098_s22 + $0x64] sm:$0xf] %vm3916_vm9, %v4312_v48  ;;  %v3728_v15 = vadd.f32 %v6085_v18, %v3685_v9  ;;  %v3686_v7 = vmul.f32 %v4869_v33, %v6080_v40 }
 0x231   : > { %v3766_v55 = vmax.f32 %v3730_v39, 0.0  ;;  %v3731_v12 = vadd.f32 %v6085_v18, %v3688_v57 }
 0x232   : > { %v3764_v42 = vmax.f32 %v3728_v15, 0.0  ;;  %v3729_v6 = vadd.f32 %v6085_v18, %v3686_v7  ;;  %v4834_v43 = vpop.f32.mrb[32].mxu0 }
 0x233   : > { %v4317_v4 = vpack.c.bf16 %v3766_v55, %v3766_v55  ;;  %v3767_v56 = vmax.f32 %v3731_v12, 0.0  ;;  %v4870_v44 = vadd.f32 %v4834_v43, %v4682_v51  ;;  %v3599_v25 = vpop.f32.mrb[33].mxu0 }
 0x234   : > { %v4315_v36 = vpack.c.bf16 %v3764_v42, %v3764_v42  ;;  %v3765_v46 = vmax.f32 %v3729_v6, 0.0  ;;  %v4871_v59 = vadd.f32 %v3599_v25, %v2085_v16  ;;  %v4835_v34 = vpop.f32.mrb[34].mxu0 }
 0x235   : > { %3947 = vst.msk [vmem:[%s6098_s22 + $0x78] sm:$0xf] %vm3916_vm9, %v4317_v4  ;;  %v4318_v2 = vpack.c.bf16 %v3767_v56, %v3767_v56  ;;  %v3691_v49 = vmul.f32 %v4870_v44, %v6080_v40  ;;  %v4872_v47 = vadd.f32 %v4835_v34, %v4683_v22  ;;  %v3602_v50 = vpop.f32.mrb[35].mxu0 }
 0x236   : > { %3945 = vst.msk [vmem:[%s6098_s22 + $0x70] sm:$0xf] %vm3916_vm9, %v4315_v36  ;;  %v4316_v24 = vpack.c.bf16 %v3765_v46, %v3765_v46  ;;  %v3689_v8 = vmul.f32 %v4871_v59, %v6080_v40  ;;  %v4873_v63 = vadd.f32 %v3602_v50, %v2088_v17 }
 0x237   : > { %3948 = vst.msk [vmem:[%s6098_s22 + $0x7c] sm:$0xf] %vm3916_vm9, %v4318_v2  ;;  %v3734_v45 = vadd.f32 %v6085_v18, %v3691_v49  ;;  %v3692_v35 = vmul.f32 %v4872_v47, %v6080_v40 }
 0x238   : > { %3946 = vst.msk [vmem:[%s6098_s22 + $0x74] sm:$0xf] %vm3916_vm9, %v4316_v24  ;;  %v3732_v53 = vadd.f32 %v6085_v18, %v3689_v8  ;;  %v3690_v38 = vmul.f32 %v4873_v63, %v6080_v40 }
 0x239   : > { %v3770_v14 = vmax.f32 %v3734_v45, 0.0  ;;  %v3735_v29 = vadd.f32 %v6085_v18, %v3692_v35 }
 0x23a   : > { %v3768_v41 = vmax.f32 %v3732_v53, 0.0  ;;  %v3733_v51 = vadd.f32 %v6085_v18, %v3690_v38 }
 0x23b   : > { %v4321_v58 = vpack.c.bf16 %v3770_v14, %v3770_v14  ;;  %v3771_v5 = vmax.f32 %v3735_v29, 0.0 }
 0x23c   : > { %v4319_v27 = vpack.c.bf16 %v3768_v41, %v3768_v41  ;;  %v3769_v16 = vmax.f32 %v3733_v51, 0.0 }
 0x23d   : > { %3951 = vst.msk [vmem:[%s6098_s22 + $0x88] sm:$0xf] %vm3916_vm9, %v4321_v58  ;;  %v4322_v11 = vpack.c.bf16 %v3771_v5, %v3771_v5 }
 0x23e   : > { %3949 = vst.msk [vmem:[%s6098_s22 + $0x80] sm:$0xf] %vm3916_vm9, %v4319_v27  ;;  %v4320_v19 = vpack.c.bf16 %v3769_v16, %v3769_v16 }
 0x23f   : > { %3952 = vst.msk [vmem:[%s6098_s22 + $0x8c] sm:$0xf] %vm3916_vm9, %v4322_v11 }
 0x240   : > { %3950 = vst.msk [vmem:[%s6098_s22 + $0x84] sm:$0xf] %vm3916_vm9, %v4320_v19 }
 0x241 PF: > { %s14_s15 = sadd.s32 1, %s5215_s15  }
 0x242   : > { %p11_p4 = scmp.ge.s32.totalorder %s14_s15, 4  }
 0x244   :  { %13 = sbr.rel (!%p11_p4) target bundleno = 1 (0x1), region = 74 }

// kernel: test_model_forward.3
= control target key start
LH: loop header
LB: loop body
LE: loop exit
PB: predicated region body
PF: predicated region fallthrough
CT: control target
= control target key end

     0   :  { %12 = vsyncpa [#allocation3], 0  ;;  %s7436_s0 = inlined_call_operand.vmem [shape: bf16[2,342,64], index: 0, kind: input, shape index: {}]   ;;  %s7437_s1 = inlined_call_operand.vmem [shape: bf16[9,64,64], index: 1, kind: input, shape index: {}]   ;;  %s7438_s2 = inlined_call_operand.vmem [shape: f32[1,64], index: 2, kind: input, shape index: {}]   ;;  %s7439_s3 = inlined_call_operand.vmem [shape: f32[1,64], index: 3, kind: input, shape index: {}]   ;;  %s7440_s4 = inlined_call_operand.vmem [shape: f32[288,1], index: 4, kind: input, shape index: {}]   ;;  %s7441_s5 = inlined_call_operand.vmem [shape: f32[64,10], index: 5, kind: input, shape index: {}]   ;;  %s7442_s6 = inlined_call_operand.vmem [shape: f32[1,10], index: 6, kind: input, shape index: {}]   ;;  %s7443_s7 = inlined_call_operand.hbm [shape: f32[2,1,10], index: 7, kind: output, shape index: {}]  }
   0x1   :  { %14 = vsyncpa [#allocation3 + $0x1], 0  ;;  %s6125_s24 = smov 0   ;;  %s6127_s25 = smov 0  }
   0x2   :  { %s6129_s26 = smov 0   ;;  %s6131_s27 = smov 0  }
   0x3 LB: > { %s6146_s28 = sadd.s32 4294967295, %s6078_s27   ;;  %s4580_s29 = sadd.s32 4294967294, %s6078_s27   ;;  %s6078_s27 = sphi %s6131_s27, %s7449_s27   ;;  %s6074_s26 = sphi %s6129_s26, %s7448_s26   ;;  %s6070_s25 = sphi %s6127_s25, %s7447_s25   ;;  %s6066_s24 = sphi %s6125_s24, %s7446_s24  }
   0x4   : > { %s6150_s30 = sadd.s32 1, %s6078_s27   ;;  %s179_s8 = sadd.s32 1, %s6074_s26 }
   0x5   : > { %s176_s9 = ssub.s32 %s6078_s27, %s6150_s30  ;;  %p189_p0 = scmp.ne.s32.totalorder %s6074_s26, %s6070_s25 }
   0x6   : > { %p177_p1 = scmp.eq.s32.totalorder %s176_s9, 0  ;;  %p190_p2 = scmp.eq.s32.totalorder %s6146_s28, 1 }
   0x7   : > { %p195_p3 = scmp.ne.s32.totalorder %s6070_s25, %s6066_s24  ;;  %p196_p4 = scmp.eq.s32.totalorder %s4580_s29, 1 }
   0x8   : > { %s6161_s10 = scalar_select %p177_p1, %s6074_s26, %s179_s8  }
   0x9   : > { %p6163_p5 = por %p190_p2, %p189_p0  ;;  %p6167_p6 = por %p196_p4, %p195_p3 }
   0xa   : > { %p4583_p7 = scmp.ge.s32.totalorder %s6078_s27, 1  ;;  %p240_p8 = scmp.lt.s32.totalorder %s6078_s27, 3 }
   0xc   : > { %p241_p9 = pnand %p4583_p7, %p240_p8 }
   0xd   : > { %v5891_v0 = vld [vmem:[%s7437_s1 + $0x20] sm:$0xff] (!%p241_p9)   ;;  %p271_p10 = scmp.lt.s32.totalorder (!%p241_p9), %s6146_s28, 1  ;;  %v5893_v2 = vld [vmem:[%s7437_s1 + $0x28] sm:$0xff] (!%p241_p9)   ;;  %v5895_v4 = vld [vmem:[%s7437_s1 + $0x30] sm:$0xff] (!%p241_p9)   ;;  %vm597_vm0 = vcmask (!%p241_p9), 523264   ;;  %vm2363_vm3 = vcmask (!%p241_p9), 1045504  }
   0xe   : > { %244 = sbr.rel (%p241_p9) target bundleno = 833 (0x341), region = 48  ;;  %v5892_v1 = vld [vmem:[%s7437_s1 + $0x80] sm:$0xff] (!%p241_p9)   ;;  %5122 = vmatprep.subr.bf16.mxu1 (!%p241_p9), %v5891_v0  ;;  %v5894_v3 = vld [vmem:[%s7437_s1 + $0x88] sm:$0xff] (!%p241_p9)   ;;  %v5896_v5 = vld [vmem:[%s7437_s1 + $0x90] sm:$0xff] (!%p241_p9)   ;;  %vm424_vm1 = vsmask.f32 (!%p241_p9), 7424 }
   0xf   : > { %5298 = vmatprep.subr.bf16.mxu0 (!%p241_p9), %v5892_v1  ;;  %5123 = vmatpush3.bf16.msra.mxu1 (!%p241_p9), %v5891_v0  ;;  %v5897_v6 = vld [vmem:[%s7437_s1 + $0x38] sm:$0xff] (!%p241_p9)   ;;  %vm1888_vm2 = vsmask.f32 (!%p241_p9), 6400  ;;  %v5905_v38 = vld [vmem:[%s7437_s1 + $0xa0] sm:$0xff] (!%p241_p9)   ;;  %v5911_v61 = vld [vmem:[%s7437_s1 + $0xa8] sm:$0xff] (!%p241_p9)   ;;  %vm1079_vm4 = vcmask (!%p241_p9), 1046528  }
  0x10   : > { %5299 = vmatpush3.bf16.msra.mxu0 (!%p241_p9), %v5892_v1  ;;  %5124 = vmatprep.subr.bf16.mxu1 (!%p241_p9), %v5893_v2  ;;  %v5898_v7 = vld [vmem:[%s7437_s1 + $0x98] sm:$0xff] (!%p241_p9)   ;;  %v5909_v56 = vld [vmem:[%s7437_s1] sm:$0xff] (!%p241_p9)   ;;  %vm3172_vm5 = vsmask.f32 (!%p241_p9), 5376  ;;  %vm3647_vm6 = vcmask (!%p241_p9), 1044480   ;;  %vm6082_vm7 = vmmov (!%p241_p9), 0  }
  0x11   : > { %5300 = vmatprep.subr.bf16.mxu0 (!%p241_p9), %v5894_v3  ;;  %s269_s18 = sand.u32 (!%p241_p9), 1, %s6070_s25   ;;  %s4912_s21 = sshll.u32 (!%p241_p9), %s6146_s28, 4  ;;  %vm4510_vm8 = vcmask (!%p241_p9), 73728  }
  0x12   : > { %s270_s22 = scalar_lea.vmem (!%p241_p9), [#allocation2], %s269_s18  ;;  %s4513_s9 = scalar_lea.sflag (!%p241_p9), [#allocation3], %s269_s18 }
  0x13   : > { %5125 = vmatpush3.bf16.msra.mxu1 (!%p241_p9), %v5893_v2  ;;  %s4525_s23 = sshll.u32 (!%p241_p9), %s270_s22, 4  ;;  %s7396_s23 = int_to_ptr.vmem [resolvable:$true] %s4525_s23 }
  0x14   : > { %5301 = vmatpush3.bf16.msra.mxu0 (!%p241_p9), %v5894_v3  ;;  %5126 = vmatprep.subr.bf16.mxu1 (!%p241_p9), %v5895_v4  ;;  %s6016_s13 = scalar_lea.vmem (!%p241_p9), %s7396_s23, 16 }
  0x15   : > { %s272_s19 = scalar_select %p271_p10, %s6146_s28, 1  ;;  %5302 = vmatprep.subr.bf16.mxu0 %v5896_v5 }
  0x16   : > { %p6017_p11 = scmp.ne.s32.totalorder %s7396_s23, %s6016_s13  ;;  %s6084_s28 = smov [#allocation2]  }
  0x17   : > { %s5845_s29 = smul.u32 172, %s272_s19  ;;  %5127 = vmatpush3.bf16.msra.mxu1 %v5895_v4  ;;  %s6020_s14 = sshll.u32 %s6084_s28, 4  ;;  %s6021_s14 = int_to_ptr.vmem [resolvable:$false] %s6020_s14 }
  0x18   : > { %5303 = vmatpush3.bf16.msra.mxu0 %v5896_v5  ;;  %5128 = vmatprep.subr.bf16.mxu1 %v5897_v6  ;;  %p6018_p12 = pnand %p6017_p11, %p6163_p5  ;;  %s6022_s15 = scalar_lea.vmem %s6021_s14, 32 }
  0x19   : > { %s6199_s17 = scalar_lea.vmem %s7436_s0, %s5845_s29  ;;  %5304 = vmatprep.subr.bf16.mxu0 %v5898_v7  ;;  %p6023_p0 = scmp.lt.s32.totalorder %s7396_s23, %s6021_s14 }
  0x1a   : > { %v277_v8 = vld [vmem:[%s6199_s17] sm:$0xf]  ;;  %v278_v9 = vld [vmem:[%s6199_s17 + $0x4] sm:$0xf]  ;;  %v6209_v11 = vld [vmem:[%s6199_s17 + $0x8] sm:$0xff]   ;;  %p6019_p13 = pneg %p6018_p12  ;;  %p6024_p1 = scmp.lt.s32.totalorder %s6022_s15, %s6016_s13 }
  0x1b   : > { %v6206_v10 = vcombine.low %v277_v8, %v278_v9  ;;  %v6212_v12 = vld [vmem:[%s6199_s17 + $0x10] sm:$0xff]   ;;  %v1408_v13 = vld [vmem:[%s6199_s17 + $0x8] sm:$0xe]  ;;  %v6216_v14 = vld [vmem:[%s6199_s17 + $0xc] sm:$0xf]  ;;  %v433_v17 = vshll.u32 %v6209_v11, 16  ;;  %5129 = vmatpush3.bf16.msra.mxu1 %v5897_v6 }
  0x1c   : > { %v437_v18 = vshrl.u32 %v6209_v11, 16  ;;  %v6223_v19 = vcombine.low %v1408_v13, %v6216_v14  ;;  %v1898_v20 = vshrl.u32 %v6212_v12, 16  ;;  %v1901_v21 = vshll.u32 %v6212_v12, 16  ;;  %v6228_v24 = vld [vmem:[%s6199_s17 + $0x10] sm:$0xff]   ;;  %v6231_v25 = vld [vmem:[%s6199_s17 + $0x18] sm:$0xff]   ;;  %5305 = vmatpush3.bf16.msra.mxu0 %v5898_v7  ;;  %v6248_v46 = vld [vmem:[%s6199_s17 + $0x20] sm:$0xff]   ;;  %5166 = vmatprep.subr.bf16.mxu1 %v5909_v56  ;;  %p6025_p2 = por %p6024_p1, %p6023_p0 }
  0x1d   : > { %v426_v15 = vshrl.u32 %v6206_v10, 16  ;;  %v428_v16 = vshll.u32 %v6206_v10, 16  ;;  %v435_v23 = vrot.slane %v433_v17, 1  ;;  %v441_v32 = vshll.u32 %v6228_v24, 16  ;;  %5342 = vmatprep.subr.bf16.mxu0 %v5905_v38  ;;  %v6244_v44 = vld [vmem:[%s6199_s17 + $0x18] sm:$0xff]   ;;  %v6255_v52 = vld [vmem:[%s6199_s17 + $0x20] sm:$0xff]  }
  0x1e   : > { %v1890_v26 = vshrl.u32 %v6223_v19, 16  ;;  %v1893_v27 = vshll.u32 %v6223_v19, 16  ;;  %v1900_v28 = vrot.slane %v1898_v20, 1  ;;  %v1903_v29 = vrot.slane %v1901_v21, 2  ;;  %v6267_v60 = vld [vmem:[%s6199_s17 + $0x28] sm:$0xff]   ;;  %v6282_v8 = vld [vmem:[%s6199_s17 + $0x30] sm:$0xff]   ;;  %p6026_p3 = pnand %p6025_p2, %p6019_p13 }
  0x1f   : > { %v430_v22 = vrot.slane %v428_v16, 1  ;;  %v439_v31 = vor.u32 %v437_v18, %v435_v23  ;;  %v1907_v33 = vshrl.u32 %v6231_v25, 16  ;;  %v1910_v37 = vshll.u32 %v6231_v25, 16  ;;  %v6278_v6 = vld [vmem:[%s6199_s17 + $0x28] sm:$0xff]  }
  0x20   : > { %v1892_v34 = vrot.slane %v1890_v26, 1  ;;  %v1895_v35 = vrot.slane %v1893_v27, 2  ;;  %v1904_v36 = vor.u32 %v1903_v29, %v1900_v28  ;;  %v443_v40 = vrot.slane %v441_v32, 1  ;;  %v6297_v29 = vld [vmem:[%s6199_s17 + $0x38] sm:$0xff]  }
  0x21   : > { %v431_v30 = vor.u32 %v430_v22, %v426_v15  ;;  %v1909_v41 = vrot.slane %v1907_v33, 1  ;;  %v1912_v43 = vrot.slane %v1910_v37, 2  ;;  %v445_v45 = vshrl.u32 %v6228_v24, 16  ;;  %v6286_v15 = vld [vmem:[%s6199_s17 + $0x30] sm:$0xff]  }
  0x22   : > { %v1896_v42 = vor.u32 %v1895_v35, %v1892_v34  ;;  %v444_v47 = vsel %vm424_vm1, %v439_v31, %v443_v40  ;;  %v449_v51 = vshll.u32 %v6244_v44, 16  ;;  %v1916_v53 = vshrl.u32 %v6248_v46, 16  ;;  %v5916_v33 = vld [vmem:[%s7437_s1 + $0xb0] sm:$0xff]  }
  0x23   : > { %v436_v39 = vsel %vm424_vm1, %v431_v30, %v435_v23  ;;  %v1913_v49 = vor.u32 %v1912_v43, %v1909_v41  ;;  %v447_v50 = vor.u32 %v445_v45, %v443_v40  ;;  %v1919_v54 = vshll.u32 %v6248_v46, 16  ;;  %v6316_v43 = vld [vmem:[%s6199_s17 + $0x40] sm:$0xff]  }
  0x24   : > { %5130 = vmatprep.mubr.msk.bf16.mxu1 %vm597_vm0, %v436_v39  ;;  %v1905_v48 = vsel %vm1888_vm2, %v1896_v42, %v1904_v36  ;;  %v453_v55 = vshrl.u32 %v6244_v44, 16  ;;  %v451_v58 = vrot.slane %v449_v51, 1  ;;  %v457_v59 = vshll.u32 %v6255_v52, 16  ;;  %v6313_v42 = vld [vmem:[%s6199_s17 + $0x40] sm:$0xff]  }
  0x25   : > { %5131 = vmatmul.mubr.msk.bf16.vlgmr.msra.gmra.mrb[0].mxu1 %vm597_vm0, %v444_v47  ;;  %5306 = vmatprep.mubr.msk.bf16.mxu0 %vm597_vm0, %v1905_v48  ;;  %v1914_v57 = vsel %vm1888_vm2, %v1904_v36, %v1913_v49  ;;  %v1918_v62 = vrot.slane %v1916_v53, 1  ;;  %v1921_v63 = vrot.slane %v1919_v54, 2  ;;  %v1925_v3 = vshrl.u32 %v6267_v60, 16 }
  0x26   : > { %5307 = vmatmul.mubr.msk.bf16.vlgmr.msra.gmra.mrb[0].mxu0 %vm597_vm0, %v1914_v57  ;;  %v452_v0 = vsel %vm424_vm1, %v447_v50, %v451_v58  ;;  %v455_v1 = vor.u32 %v453_v55, %v451_v58  ;;  %v459_v2 = vrot.slane %v457_v59, 1  ;;  %5167 = vmatpush3.bf16.msra.mxu1 %v5909_v56  ;;  %v1928_v5 = vshll.u32 %v6267_v60, 16  ;;  %v6327_v58 = vld [vmem:[%s6199_s17 + $0x48] sm:$0xff]  }
  0x27   : > { %5343 = vmatpush3.bf16.msra.mxu0 %v5905_v38  ;;  %5134 = vmatprep.mubr.msk.bf16.mxu1 %vm597_vm0, %v452_v0  ;;  %v1922_v4 = vor.u32 %v1921_v63, %v1918_v62  ;;  %v461_v7 = vshrl.u32 %v6255_v52, 16  ;;  %v1927_v13 = vrot.slane %v1925_v3, 1  ;;  %v465_v20 = vshll.u32 %v6278_v6, 16  ;;  %v6306_v38 = vld [vmem:[%s6199_s17 + $0x38] sm:$0xff]   ;;  %v5921_v59 = vld [vmem:[%s7437_s1 + $0x8] sm:$0xff]  }
  0x28   : > { %5344 = vmatprep.subr.bf16.mxu0 %v5911_v61  ;;  %v460_v9 = vsel %vm424_vm1, %v455_v1, %v459_v2  ;;  %v1930_v17 = vrot.slane %v1928_v5, 2  ;;  %v1934_v21 = vshrl.u32 %v6282_v8, 16  ;;  %v1937_v22 = vshll.u32 %v6282_v8, 16  ;;  %v5922_v63 = vld [vmem:[%s7437_s1 + $0xb8] sm:$0xff]   ;;  %5168 = vmatprep.subr.bf16.mxu1 %v5921_v59 }
  0x29   : > { %v1923_v16 = vsel %vm1888_vm2, %v1913_v49, %v1922_v4  ;;  %v463_v18 = vor.u32 %v461_v7, %v459_v2  ;;  %v469_v23 = vshrl.u32 %v6278_v6, 16  ;;  %v473_v26 = vshll.u32 %v6286_v15, 16 }
  0x2a   : > { %5310 = vmatprep.mubr.msk.bf16.mxu0 %vm597_vm0, %v1923_v16  ;;  %v1931_v27 = vor.u32 %v1930_v17, %v1927_v13  ;;  %v467_v28 = vrot.slane %v465_v20, 1  ;;  %v1936_v30 = vrot.slane %v1934_v21, 1  ;;  %v1939_v31 = vrot.slane %v1937_v22, 2  ;;  %5169 = vmatpush3.bf16.msra.mxu1 %v5921_v59  ;;  %v6342_v13 = vld [vmem:[%s6199_s17 + $0x48] sm:$0xff]   ;;  %v6348_v21 = vld [vmem:[%s6199_s17 + $0x50] sm:$0xff]  }
  0x2b   : > { %5345 = vmatpush3.bf16.msra.mxu0 %v5911_v61  ;;  %v475_v32 = vrot.slane %v473_v26, 1  ;;  %v1943_v37 = vshrl.u32 %v6297_v29, 16  ;;  %v1946_v40 = vshll.u32 %v6297_v29, 16  ;;  %v477_v41 = vshrl.u32 %v6286_v15, 16  ;;  %v6351_v22 = vld [vmem:[%s6199_s17 + $0x50] sm:$0xff]  }
  0x2c   : > { %v1932_v34 = vsel %vm1888_vm2, %v1922_v4, %v1931_v27  ;;  %v468_v35 = vsel %vm424_vm1, %v463_v18, %v467_v28  ;;  %v471_v36 = vor.u32 %v469_v23, %v467_v28  ;;  %v1940_v39 = vor.u32 %v1939_v31, %v1936_v30  ;;  %5346 = vmatprep.subr.bf16.mxu0 %v5916_v33 }
  0x2d   : > { %5135 = vmatmul.mubr.msk.bf16.gmra.mrb[4].mxu1 %vm597_vm0, %v460_v9  ;;  %v1945_v47 = vrot.slane %v1943_v37, 1  ;;  %v481_v48 = vshll.u32 %v6306_v38, 16  ;;  %v1948_v50 = vrot.slane %v1946_v40, 2  ;;  %v479_v51 = vor.u32 %v477_v41, %v475_v32 }
  0x2e   : > { %5311 = vmatmul.mubr.msk.bf16.gmra.mrb[4].mxu0 %vm597_vm0, %v1932_v34  ;;  %5138 = vmatprep.mubr.msk.bf16.mxu1 %vm597_vm0, %v468_v35  ;;  %v476_v45 = vsel %vm424_vm1, %v471_v36, %v475_v32  ;;  %v1941_v49 = vsel %vm1888_vm2, %v1931_v27, %v1940_v39  ;;  %v1952_v53 = vshrl.u32 %v6313_v42, 16  ;;  %v1955_v55 = vshll.u32 %v6313_v42, 16  ;;  %v6361_v34 = vld [vmem:[%s6199_s17 + $0x58] sm:$0xff]  }
  0x2f   : > { %5347 = vmatpush3.bf16.msra.mxu0 %v5916_v33  ;;  %5314 = vmatprep.mubr.msk.bf16.mxu0 %vm597_vm0, %v1941_v49  ;;  %v483_v54 = vrot.slane %v481_v48, 1  ;;  %v485_v56 = vshrl.u32 %v6306_v38, 16  ;;  %v489_v57 = vshll.u32 %v6316_v43, 16  ;;  %v1949_v61 = vor.u32 %v1948_v50, %v1945_v47  ;;  %v6364_v36 = vld [vmem:[%s6199_s17 + $0x58] sm:$0xff]   ;;  %v6370_v47 = vld [vmem:[%s6199_s17 + $0x60] sm:$0xff]  }
  0x30   : > { %v1954_v62 = vrot.slane %v1952_v53, 1  ;;  %v1957_v1 = vrot.slane %v1955_v55, 2  ;;  %v1961_v5 = vshrl.u32 %v6327_v58, 16  ;;  %v1964_v7 = vshll.u32 %v6327_v58, 16  ;;  %5348 = vmatprep.subr.bf16.mxu0 %v5922_v63 }
  0x31   : > { %v484_v0 = vsel %vm424_vm1, %v479_v51, %v483_v54  ;;  %v487_v2 = vor.u32 %v485_v56, %v483_v54  ;;  %v491_v3 = vrot.slane %v489_v57, 1  ;;  %v1950_v4 = vsel %vm1888_vm2, %v1940_v39, %v1949_v61 }
  0x32   : > { %v1958_v9 = vor.u32 %v1957_v1, %v1954_v62  ;;  %v493_v16 = vshrl.u32 %v6316_v43, 16  ;;  %v1963_v18 = vrot.slane %v1961_v5, 1  ;;  %v1966_v20 = vrot.slane %v1964_v7, 2  ;;  %v5930_v62 = vld [vmem:[%s7437_s1 + $0xc0] sm:$0xff]  }
  0x33   : > { %v492_v17 = vsel %vm424_vm1, %v487_v2, %v491_v3  ;;  %v497_v27 = vshll.u32 %v6342_v13, 16  ;;  %5349 = vmatpush3.bf16.msra.mxu0 %v5922_v63  ;;  %v501_v28 = vshrl.u32 %v6342_v13, 16  ;;  %v1970_v31 = vshrl.u32 %v6348_v21, 16 }
  0x34   : > { %v1959_v23 = vsel %vm1888_vm2, %v1949_v61, %v1958_v9  ;;  %v495_v26 = vor.u32 %v493_v16, %v491_v3  ;;  %v1967_v30 = vor.u32 %v1966_v20, %v1963_v18  ;;  %v1973_v32 = vshll.u32 %v6348_v21, 16  ;;  %v6390_v3 = vld [vmem:[%s6199_s17 + $0x68] sm:$0xff]   ;;  %5386 = vmatprep.subr.bf16.mxu0 %v5930_v62  ;;  %v6402_v20 = vld [vmem:[%s6199_s17 + $0x70] sm:$0xff]  }
  0x35   : > { %5139 = vmatmul.mubr.msk.bf16.gmra.mrb[8].mxu1 %vm597_vm0, %v476_v45  ;;  %v505_v33 = vshll.u32 %v6351_v22, 16  ;;  %v499_v35 = vrot.slane %v497_v27, 1  ;;  %v1972_v39 = vrot.slane %v1970_v31, 1  ;;  %v2350_v45 = vld [vmem:[%s6199_s17 + $0x8] sm:$0xc]  ;;  %v1979_v50 = vshrl.u32 %v6361_v34, 16 }
  0x36   : > { %5142 = vmatprep.mubr.msk.bf16.mxu1 %vm597_vm0, %v484_v0  ;;  %5315 = vmatmul.mubr.msk.bf16.gmra.mrb[8].mxu0 %vm597_vm0, %v1950_v4  ;;  %v1968_v37 = vsel %vm1888_vm2, %v1958_v9, %v1967_v30  ;;  %v1975_v40 = vrot.slane %v1973_v32, 2  ;;  %v1982_v51 = vshll.u32 %v6361_v34, 16  ;;  %v509_v54 = vshrl.u32 %v6351_v22, 16  ;;  %v6409_v31 = vld [vmem:[%s6199_s17 + $0x78] sm:$0xff]  }
  0x37   : > { %5318 = vmatprep.mubr.msk.bf16.mxu0 %vm597_vm0, %v1959_v23  ;;  %v507_v41 = vrot.slane %v505_v33, 1  ;;  %v500_v48 = vsel %vm424_vm1, %v495_v26, %v499_v35  ;;  %v503_v49 = vor.u32 %v501_v28, %v499_v35  ;;  %v513_v55 = vshll.u32 %v6364_v36, 16  ;;  %v5937_v35 = vld [vmem:[%s7437_s1 + $0x18] sm:$0xff]  }
  0x38   : > { %v1976_v53 = vor.u32 %v1975_v40, %v1972_v39  ;;  %v4775_v56 = vcombine.low %v2350_v45, %v6216_v14  ;;  %v1981_v59 = vrot.slane %v1979_v50, 1  ;;  %v1984_v61 = vrot.slane %v1982_v51, 2  ;;  %v5931_v14 = vld [vmem:[%s7437_s1 + $0x10] sm:$0xff]   ;;  %v5936_v50 = vld [vmem:[%s7437_s1 + $0xc8] sm:$0xff]  }
  0x39   : > { %v508_v57 = vsel %vm424_vm1, %v503_v49, %v507_v41  ;;  %v511_v0 = vor.u32 %v509_v54, %v507_v41  ;;  %v515_v1 = vrot.slane %v513_v55, 1  ;;  %v2365_v2 = vrot.slane %v6212_v12, 2  ;;  %5170 = vmatprep.subr.bf16.mxu1 %v5931_v14  ;;  %v6426_v49 = vld [vmem:[%s6199_s17 + $0x80] sm:$0xff]  }
  0x3a   : > { %v1977_v63 = vsel %vm1888_vm2, %v1967_v30, %v1976_v53  ;;  %v6393_v4 = vor.u32 %v1984_v61, %v1981_v59  ;;  %v2364_v5 = vrot.slane %v4775_v56, 2  ;;  %v517_v7 = vshrl.u32 %v6364_v36, 16  ;;  %5171 = vmatpush3.bf16.msra.mxu1 %v5931_v14 }
  0x3b   : > { %v521_v9 = vshll.u32 %v6370_v47, 16  ;;  %v516_v12 = vsel %vm424_vm1, %v511_v0, %v515_v1  ;;  %v525_v16 = vshrl.u32 %v6370_v47, 16  ;;  %v2367_v32 = vrot.slane %v6231_v25, 2  ;;  %5172 = vmatprep.subr.bf16.mxu1 %v5937_v35 }
  0x3c   : > { %v1986_v23 = vsel %vm1888_vm2, %v1976_v53, %v6393_v4  ;;  %v519_v26 = vor.u32 %v517_v7, %v515_v1  ;;  %v2366_v27 = vsel %vm2363_vm3, %v2364_v5, %v2365_v2  ;;  %v537_v33 = vshll.u32 %v6402_v20, 16  ;;  %v6434_v53 = vld [vmem:[%s6199_s17 + $0x88] sm:$0xff]   ;;  %v6457_v5 = vld [vmem:[%s6199_s17 + $0x90] ss:$0 sps:$4 sm:$0x11]  }
  0x3d   : > { %5143 = vmatmul.mubr.msk.bf16.gmra.mrb[12].mxu1 %vm597_vm0, %v492_v17  ;;  %v529_v17 = vshll.u32 %v6390_v3, 16  ;;  %v523_v18 = vrot.slane %v521_v9, 1  ;;  %v2369_v39 = vrot.slane %v6248_v46, 2  ;;  %v533_v40 = vshrl.u32 %v6390_v3, 16 }
  0x3e   : > { %5146 = vmatprep.mubr.msk.bf16.mxu1 %vm597_vm0, %v500_v48  ;;  %5319 = vmatmul.mubr.msk.bf16.gmra.mrb[12].mxu0 %vm597_vm0, %v1968_v37  ;;  %v541_v45 = vshrl.u32 %v6402_v20, 16  ;;  %v545_v25 = vshll.u32 %v6409_v31, 16  ;;  %v539_v48 = vrot.slane %v537_v33, 1  ;;  %v2368_v46 = vsel %vm2363_vm3, %v2365_v2, %v2367_v32  ;;  %v6477_v33 = vld [vmem:[%s7437_s1 + $0xe0] sm:$0xff]  }
  0x3f   : > { %5322 = vmatprep.mubr.msk.bf16.mxu0 %vm597_vm0, %v1977_v63  ;;  %v527_v28 = vor.u32 %v525_v16, %v523_v18  ;;  %v531_v30 = vrot.slane %v529_v17, 1  ;;  %v524_v37 = vsel %vm424_vm1, %v519_v26, %v523_v18  ;;  %5173 = vmatpush3.bf16.msra.mxu1 %v5937_v35  ;;  %v2370_v54 = vsel %vm2363_vm3, %v2367_v32, %v2369_v39  ;;  %v5946_v18 = vld [vmem:[%s7437_s1 + $0xd8] sm:$0xff]  }
  0x40   : > { %v543_v55 = vor.u32 %v541_v45, %v539_v48  ;;  %v547_v56 = vrot.slane %v545_v25, 1  ;;  %v2371_v59 = vrot.slane %v6267_v60, 2  ;;  %v2373_v61 = vrot.slane %v6282_v8, 2  ;;  %v5940_v8 = vld [vmem:[%s7437_s1 + $0xd0] sm:$0xff]  }
  0x41   : > { %v532_v41 = vsel %vm424_vm1, %v527_v28, %v531_v30  ;;  %v535_v51 = vor.u32 %v533_v40, %v531_v30  ;;  %v553_v63 = vshll.u32 %v6426_v49, 16  ;;  %v549_v1 = vshrl.u32 %v6409_v31, 16 }
  0x42   : > { %v557_v2 = vshrl.u32 %v6426_v49, 16  ;;  %v548_v14 = vsel %vm424_vm1, %v543_v55, %v547_v56  ;;  %v561_v60 = vshll.u32 %v6434_v53, 16  ;;  %v2372_v7 = vsel %vm2363_vm3, %v2369_v39, %v2371_v59  ;;  %v5962_v55 = vld [vmem:[%s7437_s1 + $0x58] sm:$0xff]  }
  0x43   : > { %v540_v0 = vsel %vm424_vm1, %v535_v51, %v539_v48  ;;  %v551_v9 = vor.u32 %v549_v1, %v547_v56  ;;  %v569_v28 = vshll.u32 %v6457_v5, 16  ;;  %v2377_v32 = vrot.slane %v6313_v42, 2  ;;  %v5941_v48 = vld [vmem:[%s6199_s17 + $0x60] sm:$0xff]   ;;  %v6511_v51 = vld [vmem:[%s6199_s17 + $0x70] sm:$0xff]   ;;  %v6552_v1 = vld [vmem:[%s6199_s17 + $0x88] sm:$0xff]  }
  0x44   : > { %v563_v17 = vrot.slane %v561_v60, 1  ;;  %v2379_v40 = vrot.slane %v6327_v58, 2  ;;  %v2385_v58 = vrot.slane %v5941_v48, 2  ;;  %v2395_v60 = vrot.slane %v6552_v1, 2 }
  0x45   : > { %5147 = vmatmul.mubr.msk.bf16.gmra.mrb[16].mxu1 %vm597_vm0, %v508_v57  ;;  %v6440_v57 = vld [vmem:[%s7437_s1 + $0x40] sm:$0xff]  }
  0x46   : > { %5150 = vmatprep.mubr.msk.bf16.mxu1 %vm597_vm0, %v516_v12  ;;  %5323 = vmatmul.mubr.msk.bf16.gmra.mrb[16].mxu0 %vm597_vm0, %v1986_v23  ;;  %v2374_v12 = vsel %vm2363_vm3, %v2371_v59, %v2373_v61  ;;  %v2375_v23 = vrot.slane %v6297_v29, 2  ;;  %v2380_v45 = vsel %vm2363_vm3, %v2377_v32, %v2379_v40 }
  0x47   : > { %5350 = vmatprep.mubr.msk.bf16.mxu0 %vm597_vm0, %v2366_v27  ;;  %5210 = vmatprep.subr.bf16.mxu1 %v6440_v57  ;;  %v565_v27 = vshrl.u32 %v6434_v53, 16 }
  0x48   : > { %v2376_v29 = vsel %vm2363_vm3, %v2373_v61, %v2375_v23  ;;  %v2378_v39 = vsel %vm2363_vm3, %v2375_v23, %v2377_v32  ;;  %v6534_v61 = vld [vmem:[%s6199_s17 + $0x80] sm:$0xff]  }
  0x49   : > { %v567_v35 = vor.u32 %v565_v27, %v563_v17 }
  0x4d   : > { %5151 = vmatmul.mubr.msk.bf16.gmra.mrb[20].mxu1 %vm597_vm0, %v524_v37  ;;  %v571_v37 = vrot.slane %v569_v28, 1 }
  0x4e   : > { %5154 = vmatprep.mubr.msk.bf16.mxu1 %vm597_vm0, %v532_v41  ;;  %5351 = vmatmul.mubr.msk.bf16.vlgmr.msra.gmra.mrb[0].mxu0 %vm597_vm0, %v2368_v46  ;;  %v2381_v41 = vrot.slane %v6348_v21, 2  ;;  %v5949_v21 = vld [vmem:[%s7437_s1 + $0x48] sm:$0xff]  }
  0x4f   : > { %5387 = vmatpush3.bf16.msra.mxu0 %v5930_v62  ;;  %5354 = vmatprep.mubr.msk.bf16.mxu0 %vm597_vm0, %v2370_v54  ;;  %v555_v62 = vrot.slane %v553_v63, 1  ;;  %v572_v42 = vsel %vm424_vm1, %v567_v35, %v571_v37  ;;  %v6504_v46 = vld [vmem:[%s6199_s17 + $0x68] sm:$0xff]   ;;  %v6539_v63 = vld [vmem:[%s7437_s1 + $0x60] sm:$0xff]  }
  0x50   : > { %5388 = vmatprep.subr.bf16.mxu0 %v5936_v50  ;;  %v2382_v25 = vsel %vm2363_vm3, %v2379_v40, %v2381_v41  ;;  %v2387_v54 = vrot.slane %v6504_v46, 2 }
  0x51   : > { %v559_v16 = vor.u32 %v557_v2, %v555_v62  ;;  %v556_v26 = vsel %vm424_vm1, %v551_v9, %v555_v62  ;;  %v2692_v62 = vld [vmem:[%s6199_s17 + $0x10] sm:$0xc] }
  0x52   : > { %v2388_v56 = vsel %vm2363_vm3, %v2385_v58, %v2387_v54 }
  0x53   : > { %5389 = vmatpush3.bf16.msra.mxu0 %v5936_v50  ;;  %v564_v30 = vsel %vm424_vm1, %v559_v16, %v563_v17  ;;  %v2383_v50 = vrot.slane %v6361_v34, 2 }
  0x54   : > { %5390 = vmatprep.subr.bf16.mxu0 %v5940_v8 }
  0x55   : > { %5155 = vmatmul.mubr.msk.bf16.gmra.mrb[24].mxu1 %vm597_vm0, %v540_v0  ;;  %v2386_v34 = vsel %vm2363_vm3, %v2383_v50, %v2385_v58 }
  0x56   : > { %5158 = vmatprep.mubr.msk.bf16.mxu1 %vm597_vm0, %v548_v14  ;;  %5355 = vmatmul.mubr.msk.bf16.gmra.mrb[4].mxu0 %vm597_vm0, %v2372_v7  ;;  %v6556_v14 = vld [vmem:[%s6199_s17 + $0x90] sm:$0xff]  }
  0x57   : > { %5358 = vmatprep.mubr.msk.bf16.mxu0 %vm597_vm0, %v2374_v12  ;;  %5391 = vmatpush3.bf16.msra.mxu0 %v5940_v8  ;;  %v2397_v8 = vrot.slane %v6556_v14, 2  ;;  %v6564_v7 = vld [vmem:[%s6199_s17 + $0x14] sm:$0xf]  ;;  %v5951_v12 = vld [vmem:[%s6199_s17 + $0x98] ss:$0 sps:$4 sm:$0x33]  }
  0x58   : > { %5392 = vmatprep.subr.bf16.mxu0 %v5946_v18  ;;  %v6574_v17 = vcombine.low %v2692_v62, %v6564_v7  ;;  %v2399_v23 = vrot.slane %v5951_v12, 2  ;;  %v6659_v62 = vld [vmem:[%s6199_s17 + $0x58] sm:$0xff]  }
  0x59   : > { %v2398_v16 = vsel %vm2363_vm3, %v2395_v60, %v2397_v8 }
  0x5a   : > { %v2400_v28 = vsel %vm2363_vm3, %v2397_v8, %v2399_v23 }
  0x5b   : > { %5393 = vmatpush3.bf16.msra.mxu0 %v5946_v18  ;;  %v6577_v18 = vld [vmem:[%s6199_s17 + $0x18] sm:$0xff]  }
  0x5c   : > { %5430 = vmatprep.subr.bf16.mxu0 %v6477_v33  ;;  %v2832_v27 = vrot.slane %v6577_v18, 2 }
  0x5d   : > { %5159 = vmatmul.mubr.msk.bf16.gmra.mrb[28].mxu1 %vm597_vm0, %v556_v26  ;;  %v2831_v26 = vrot.slane %v6574_v17, 2 }
  0x5e   : > { %5162 = vmatprep.mubr.msk.bf16.mxu1 %vm597_vm0, %v564_v30  ;;  %5359 = vmatmul.mubr.msk.bf16.gmra.mrb[8].mxu0 %vm597_vm0, %v2376_v29  ;;  %v6589_v30 = vld [vmem:[%s6199_s17 + $0x20] sm:$0xff]   ;;  %v6593_v29 = vld [vmem:[%s6199_s17 + $0x28] sm:$0xff]  }
  0x5f   : > { %5362 = vmatprep.mubr.msk.bf16.mxu0 %vm597_vm0, %v2378_v39  ;;  %v2833_v32 = vsel %vm2363_vm3, %v2831_v26, %v2832_v27  ;;  %v2834_v35 = vrot.slane %v6589_v30, 2  ;;  %v2836_v37 = vrot.slane %v6593_v29, 2  ;;  %v5991_v26 = vld [vmem:[%s6199_s17 + $0x10] sm:$0xff]  }
  0x61   : > { %v2835_v39 = vsel %vm2363_vm3, %v2832_v27, %v2834_v35  ;;  %v2837_v40 = vsel %vm2363_vm3, %v2834_v35, %v2836_v37  ;;  %v1083_v27 = vrot.slane %v5991_v26, 1  ;;  %v5992_v35 = vld [vmem:[%s6199_s17 + $0x18] sm:$0xff]   ;;  %v1093_v26 = vrot.slane %v6306_v38, 1 }
  0x65   : > { %5163 = vmatmul.mubr.msk.bf16.gmra.mrb[32].mxu1 %vm597_vm0, %v572_v42  ;;  %v6605_v42 = vld [vmem:[%s6199_s17 + $0x30] sm:$0xff]  }
  0x66   : > { %5174 = vmatprep.mubr.msk.bf16.mxu1 %vm597_vm0, %v6206_v10  ;;  %5363 = vmatmul.mubr.msk.bf16.gmra.mrb[12].mxu0 %vm597_vm0, %v2380_v45  ;;  %v2384_v10 = vsel %vm2363_vm3, %v2381_v41, %v2383_v50  ;;  %v6609_v41 = vld [vmem:[%s6199_s17 + $0x38] sm:$0xff]   ;;  %v5961_v45 = vld [vmem:[%s7437_s1 + $0xe8] sm:$0xff]   ;;  %v5968_v50 = vld [vmem:[%s7437_s1 + $0xf0] sm:$0xff]  }
  0x67   : > { %5366 = vmatprep.mubr.msk.bf16.mxu0 %vm597_vm0, %v2382_v25  ;;  %v2838_v25 = vrot.slane %v6605_v42, 2  ;;  %v2840_v48 = vrot.slane %v6609_v41, 2 }
  0x69   : > { %v2839_v58 = vsel %vm2363_vm3, %v2836_v37, %v2838_v25  ;;  %v1085_v37 = vrot.slane %v5992_v35, 1 }
  0x6d   : > { %5175 = vmatmul.mubr.msk.bf16.vlgmr.msra.gmra.mrb[0].mxu1 %vm597_vm0, %v6209_v11  ;;  %v5956_v11 = vld [vmem:[%s7437_s1 + $0x50] sm:$0xff]  }
  0x6e   : > { %5178 = vmatprep.mubr.msk.bf16.mxu1 %vm597_vm0, %v6228_v24  ;;  %5211 = vmatpush3.bf16.msra.mxu1 %v6440_v57  ;;  %v2389_v24 = vrot.slane %v6511_v51, 2  ;;  %v6530_v57 = vld [vmem:[%s6199_s17 + $0x78] sm:$0xff]  }
  0x6f   : > { %5212 = vmatprep.subr.bf16.mxu1 %v5949_v21  ;;  %5367 = vmatmul.mubr.msk.bf16.gmra.mrb[16].mxu0 %vm597_vm0, %v2384_v10  ;;  %v6632_v10 = vld [vmem:[%s6199_s17 + $0x48] sm:$0xff]  }
  0x70   : > { %5370 = vmatprep.mubr.msk.bf16.mxu0 %vm597_vm0, %v2386_v34  ;;  %v2390_v59 = vsel %vm2363_vm3, %v2387_v54, %v2389_v24  ;;  %v5974_v34 = vld [vmem:[%s7437_s1 + $0xf8] sm:$0xff]  }
  0x72   : > { %5213 = vmatpush3.bf16.msra.mxu1 %v5949_v21  ;;  %v2841_v21 = vsel %vm2363_vm3, %v2838_v25, %v2840_v48  ;;  %v1086_v25 = vsel %vm1079_vm4, %v1083_v27, %v1085_v37 }
  0x73   : > { %5214 = vmatprep.subr.bf16.mxu1 %v5956_v11 }
  0x75   : > { %5179 = vmatmul.mubr.msk.bf16.gmra.mrb[4].mxu1 %vm597_vm0, %v6244_v44  ;;  %v2391_v44 = vrot.slane %v6530_v57, 2 }
  0x76   : > { %5182 = vmatprep.mubr.msk.bf16.mxu1 %vm597_vm0, %v6255_v52  ;;  %5215 = vmatpush3.bf16.msra.mxu1 %v5956_v11  ;;  %v2393_v52 = vrot.slane %v6534_v61, 2  ;;  %v1066_v11 = vld [vmem:[%s6199_s17] sm:$0xe] }
  0x77   : > { %5216 = vmatprep.subr.bf16.mxu1 %v5962_v55  ;;  %5371 = vmatmul.mubr.msk.bf16.gmra.mrb[20].mxu0 %vm597_vm0, %v2388_v56  ;;  %v2392_v0 = vsel %vm2363_vm3, %v2389_v24, %v2391_v44  ;;  %v2844_v24 = vrot.slane %v6632_v10, 2 }
  0x78   : > { %5374 = vmatprep.mubr.msk.bf16.mxu0 %vm597_vm0, %v2390_v59  ;;  %v2394_v2 = vsel %vm2363_vm3, %v2391_v44, %v2393_v52  ;;  %v2396_v9 = vsel %vm2363_vm3, %v2393_v52, %v2395_v60  ;;  %v6646_v59 = vld [vmem:[%s7437_s1 + $0x100] sm:$0xff]   ;;  %v6654_v52 = vld [vmem:[%s6199_s17 + $0x50] sm:$0xff]   ;;  %v5990_v60 = vld [vmem:[%s6199_s17 + $0x8] sm:$0xff]  }
  0x79   : > { %v1081_v8 = vrot.slane %v5990_v60, 1  ;;  %v5983_v60 = vld [vmem:[%s7437_s1 + $0x78] sm:$0xff]  }
  0x7a   : > { %5217 = vmatpush3.bf16.msra.mxu1 %v5962_v55  ;;  %v5989_v55 = vld [vmem:[%s6199_s17 + $0x4] sm:$0xf] }
  0x7b   : > { %5254 = vmatprep.subr.bf16.mxu1 %v6539_v63  ;;  %v4664_v56 = vcombine.low %v1066_v11, %v5989_v55  ;;  %v6694_v11 = vld [vmem:[%s6199_s17 + $0x70] sm:$0xff]   ;;  %v6700_v55 = vld [vmem:[%s6199_s17 + $0x78] sm:$0xff]  }
  0x7d   : > { %5183 = vmatmul.mubr.msk.bf16.gmra.mrb[8].mxu1 %vm597_vm0, %v6278_v6 }
  0x7e   : > { %5186 = vmatprep.mubr.msk.bf16.mxu1 %vm597_vm0, %v6286_v15 }
  0x7f   : > { %5375 = vmatmul.mubr.msk.bf16.gmra.mrb[24].mxu0 %vm597_vm0, %v2392_v0 }
  0x80   : > { %5378 = vmatprep.mubr.msk.bf16.mxu0 %vm597_vm0, %v2394_v2  ;;  %v1080_v2 = vrot.slane %v4664_v56, 1  ;;  %v5981_v56 = vld [vmem:[%s7437_s1 + $0x70] sm:$0xff]  }
  0x82   : > { %v1082_v12 = vsel %vm1079_vm4, %v1080_v2, %v1081_v8  ;;  %v2856_v2 = vrot.slane %v6700_v55, 2 }
  0x85   : > { %5187 = vmatmul.mubr.msk.bf16.gmra.mrb[12].mxu1 %vm597_vm0, %v6306_v38 }
  0x86   : > { %5190 = vmatprep.mubr.msk.bf16.mxu1 %vm597_vm0, %v6316_v43 }
  0x87   : > { %5379 = vmatmul.mubr.msk.bf16.gmra.mrb[28].mxu0 %vm597_vm0, %v2396_v9  ;;  %v2846_v9 = vrot.slane %v6654_v52, 2 }
  0x88   : > { %5382 = vmatprep.mubr.msk.bf16.mxu0 %vm597_vm0, %v2398_v16  ;;  %v2848_v16 = vrot.slane %v6659_v62, 2 }
  0x89   : > { %v2847_v23 = vsel %vm2363_vm3, %v2844_v24, %v2846_v9 }
  0x8d   : > { %5191 = vmatmul.mubr.msk.bf16.gmra.mrb[16].mxu1 %vm597_vm0, %v6342_v13 }
  0x8e   : > { %5194 = vmatprep.mubr.msk.bf16.mxu1 %vm597_vm0, %v6351_v22 }
  0x8f   : > { %5383 = vmatmul.mubr.msk.bf16.gmra.mrb[32].mxu0 %vm597_vm0, %v2400_v28  ;;  %v6673_v28 = vld [vmem:[%s6199_s17 + $0x60] sm:$0xff]  }
  0x90   : > { %5394 = vmatprep.mubr.msk.bf16.mxu0 %vm597_vm0, %v2833_v32  ;;  %v2849_v32 = vsel %vm2363_vm3, %v2846_v9, %v2848_v16 }
  0x95   : > { %5195 = vmatmul.mubr.msk.bf16.gmra.mrb[20].mxu1 %vm597_vm0, %v6364_v36 }
  0x96   : > { %5198 = vmatprep.mubr.msk.bf16.mxu1 %vm597_vm0, %v6370_v47 }
  0x97   : > { %5395 = vmatmul.mubr.msk.bf16.vlgmr.msra.gmra.mrb[0].mxu0 %vm597_vm0, %v2835_v39  ;;  %v6678_v39 = vld [vmem:[%s6199_s17 + $0x68] sm:$0xff]  }
  0x98   : > { %5431 = vmatpush3.bf16.msra.mxu0 %v6477_v33  ;;  %5398 = vmatprep.mubr.msk.bf16.mxu0 %vm597_vm0, %v2837_v40  ;;  %v6628_v33 = vld [vmem:[%s6199_s17 + $0x40] sm:$0xff]   ;;  %v1084_v40 = vsel %vm1079_vm4, %v1081_v8, %v1083_v27  ;;  %v6080_v8 = vmov 0   ;;  %v6727_v27 = vld [vmem:[%s6199_s17 + $0x88] sm:$0xff]  }
  0x99   : > { %5432 = vmatprep.subr.bf16.mxu0 %v5961_v45  ;;  %v2842_v54 = vrot.slane %v6628_v33, 2  ;;  %5889 = vset.pattern.permute.xlu0 %v6080_v8 }
  0x9a   : > { %5890 = vset.pattern.permute.xlu1 %v6080_v8  ;;  %v3185_v8 = vshll.u32 %v6577_v18, 16 }
  0x9b   : > { %v2843_v44 = vsel %vm2363_vm3, %v2840_v48, %v2842_v54  ;;  %v2845_v0 = vsel %vm2363_vm3, %v2842_v54, %v2844_v24  ;;  %v2852_v48 = vrot.slane %v6678_v39, 2  ;;  %v1089_v24 = vrot.slane %v6278_v6, 1  ;;  %v4098_v6 = vld [vmem:[%s7440_s4] sm:$0xff] }
  0x9c   : > { %5433 = vmatpush3.bf16.msra.mxu0 %v5961_v45  ;;  %v2850_v45 = vrot.slane %v6673_v28, 2  ;;  %4136 = vperm.xlu0 %5889, %v4098_v6   ;;  %v3174_v6 = vshrl.u32 %v6574_v17, 16 }
  0x9d   : > { %5199 = vmatmul.mubr.msk.bf16.gmra.mrb[24].mxu1 %vm597_vm0, %v6390_v3  ;;  %5434 = vmatprep.subr.bf16.mxu0 %v5968_v50 }
  0x9e   : > { %5202 = vmatprep.mubr.msk.bf16.mxu1 %vm597_vm0, %v6402_v20  ;;  %v2853_v54 = vsel %vm2363_vm3, %v2850_v45, %v2852_v48 }
  0x9f   : > { %5399 = vmatmul.mubr.msk.bf16.gmra.mrb[4].mxu0 %vm597_vm0, %v2839_v58  ;;  %v2851_v58 = vsel %vm2363_vm3, %v2848_v16, %v2850_v45  ;;  %v6722_v16 = vld [vmem:[%s6199_s17 + $0x80] sm:$0xff]  }
  0xa0   : > { %5402 = vmatprep.mubr.msk.bf16.mxu0 %vm597_vm0, %v2841_v21  ;;  %5435 = vmatpush3.bf16.msra.mxu0 %v5968_v50  ;;  %v5977_v50 = vld [vmem:[%s7437_s1 + $0x68] sm:$0xff]   ;;  %v5993_v21 = vld [vmem:[%s6199_s17 + $0x20] sm:$0xff]   ;;  %v2858_v38 = vrot.slane %v6722_v16, 2 }
  0xa1   : > { %5436 = vmatprep.subr.bf16.mxu0 %v5974_v34  ;;  %v6744_v45 = vld [vmem:[%s7437_s1 + $0x80] sm:$0xff]  }
  0xa4   : > { %5437 = vmatpush3.bf16.msra.mxu0 %v5974_v34  ;;  %v1087_v34 = vrot.slane %v5993_v21, 1  ;;  %v6758_v21 = vld [vmem:[%s6199_s17 + $0x90] sm:$0xff]  }
  0xa5   : > { %5203 = vmatmul.mubr.msk.bf16.gmra.mrb[28].mxu1 %vm597_vm0, %v6409_v31  ;;  %5474 = vmatprep.subr.bf16.mxu0 %v6646_v59 }
  0xa6   : > { %5206 = vmatprep.mubr.msk.bf16.mxu1 %vm597_vm0, %v6426_v49 }
  0xa7   : > { %5403 = vmatmul.mubr.msk.bf16.gmra.mrb[8].mxu0 %vm597_vm0, %v2843_v44  ;;  %v1088_v44 = vsel %vm1079_vm4, %v1085_v37, %v1087_v34 }
  0xa8   : > { %5406 = vmatprep.mubr.msk.bf16.mxu0 %vm597_vm0, %v2845_v0  ;;  %v1090_v0 = vsel %vm1079_vm4, %v1087_v34, %v1089_v24  ;;  %v1097_v34 = vrot.slane %v6342_v13, 1 }
  0xad   : > { %5207 = vmatmul.mubr.msk.bf16.gmra.mrb[32].mxu1 %vm597_vm0, %v6434_v53 }
  0xae   : > { %5218 = vmatprep.mubr.msk.bf16.mxu1 %vm597_vm0, %v1082_v12  ;;  %v1091_v12 = vrot.slane %v6286_v15, 1  ;;  %v4099_v15 = vld [vmem:[%s7440_s4 + $0x8] sm:$0xff] }
  0xaf   : > { %5407 = vmatmul.mubr.msk.bf16.gmra.mrb[12].mxu0 %vm597_vm0, %v2847_v23  ;;  %4141 = vperm.xlu0 %5889, %v4099_v15   ;;  %v3176_v15 = vrot.slane %v3174_v6, 2 }
  0xb0   : > { %5410 = vmatprep.mubr.msk.bf16.mxu0 %vm597_vm0, %v2849_v32  ;;  %v4100_v32 = vld [vmem:[%s7440_s4 + $0x10] sm:$0xff]  ;;  %v1092_v35 = vsel %vm1079_vm4, %v1089_v24, %v1091_v12  ;;  %v1094_v37 = vsel %vm1079_vm4, %v1091_v12, %v1093_v26  ;;  %v6763_v24 = vld [vmem:[%s6199_s17 + $0x98] sm:$0xff]   ;;  %v1099_v12 = vrot.slane %v6351_v22, 1 }
  0xb1   : > { %4146 = vperm.xlu1 %5890, %v4100_v32   ;;  %v1101_v32 = vrot.slane %v6364_v36, 1  ;;  %v4108_v36 = vld [vmem:[%s7440_s4 + $0x50] sm:$0xff] }
  0xb2   : > { %v1100_v22 = vsel %vm1079_vm4, %v1097_v34, %v1099_v12 }
  0xb5   : > { %5219 = vmatmul.mubr.msk.bf16.vlgmr.msra.gmra.mrb[0].mxu1 %vm597_vm0, %v1084_v40  ;;  %v2860_v40 = vrot.slane %v6727_v27, 2 }
  0xb6   : > { %5222 = vmatprep.mubr.msk.bf16.mxu1 %vm597_vm0, %v1086_v25  ;;  %5255 = vmatpush3.bf16.msra.mxu1 %v6539_v63  ;;  %v2854_v63 = vrot.slane %v6694_v11, 2  ;;  %v4101_v25 = vld [vmem:[%s7440_s4 + $0x18] sm:$0xff] }
  0xb7   : > { %5256 = vmatprep.subr.bf16.mxu1 %v5977_v50  ;;  %5411 = vmatmul.mubr.msk.bf16.gmra.mrb[16].mxu0 %vm597_vm0, %v2851_v58  ;;  %v1095_v58 = vrot.slane %v6316_v43, 1  ;;  %v4104_v43 = vld [vmem:[%s7440_s4 + $0x30] sm:$0xff] }
  0xb8   : > { %5414 = vmatprep.mubr.msk.bf16.mxu0 %vm597_vm0, %v2853_v54  ;;  %v2855_v9 = vsel %vm2363_vm3, %v2852_v48, %v2854_v63  ;;  %v2857_v23 = vsel %vm2363_vm3, %v2854_v63, %v2856_v2  ;;  %v4102_v48 = vld [vmem:[%s7440_s4 + $0x20] sm:$0xff]  ;;  %v2861_v54 = vsel %vm2363_vm3, %v2858_v38, %v2860_v40  ;;  %4151 = vperm.xlu1 %5890, %v4101_v25   ;;  %v3187_v25 = vrot.slane %v3185_v8, 3 }
  0xb9   : > { %4156 = vperm.xlu0 %5889, %v4102_v48   ;;  %v1096_v13 = vsel %vm1079_vm4, %v1093_v26, %v1095_v58  ;;  %v1098_v63 = vsel %vm1079_vm4, %v1095_v58, %v1097_v34  ;;  %v5979_v26 = vld [vmem:[%s6199_s17 + $0xa0] ss:$0 sps:$4 sm:$0x33]   ;;  %v3191_v58 = vshrl.u32 %v6589_v30, 16  ;;  %v3200_v34 = vshrl.u32 %v6593_v29, 16 }
  0xba   : > { %5257 = vmatpush3.bf16.msra.mxu1 %v5977_v50  ;;  %v2859_v50 = vsel %vm2363_vm3, %v2856_v2, %v2858_v38  ;;  %v3177_v2 = vshll.u32 %v6574_v17, 16  ;;  %v2866_v48 = vrot.slane %v5979_v26, 2 }
  0xbb   : > { %5258 = vmatprep.subr.bf16.mxu1 %v5981_v56 }
  0xbc   : > { %v3179_v38 = vrot.slane %v3177_v2, 3  ;;  %v1103_v2 = vrot.slane %v6370_v47, 1  ;;  %v4112_v47 = vld [vmem:[%s7440_s4 + $0x70] sm:$0xff] }
  0xbd   : > { %5223 = vmatmul.mubr.msk.bf16.gmra.mrb[4].mxu1 %vm597_vm0, %v1088_v44  ;;  %v2862_v44 = vrot.slane %v6758_v21, 2  ;;  %4166 = vperm.xlu0 %5889, %v4104_v43  }
  0xbe   : > { %5226 = vmatprep.mubr.msk.bf16.mxu1 %vm597_vm0, %v1090_v0  ;;  %5259 = vmatpush3.bf16.msra.mxu1 %v5981_v56  ;;  %v4103_v56 = vld [vmem:[%s7440_s4 + $0x28] sm:$0xff]  ;;  %v2864_v0 = vrot.slane %v6763_v24, 2  ;;  %v1104_v26 = vsel %vm1079_vm4, %v1101_v32, %v1103_v2 }
  0xbf   : > { %5260 = vmatprep.subr.bf16.mxu1 %v5983_v60  ;;  %5415 = vmatmul.mubr.msk.bf16.gmra.mrb[20].mxu0 %vm597_vm0, %v2855_v9  ;;  %v4105_v9 = vld [vmem:[%s7440_s4 + $0x38] sm:$0xff]  ;;  %v2863_v17 = vsel %vm2363_vm3, %v2860_v40, %v2862_v44  ;;  %v4107_v40 = vld [vmem:[%s7440_s4 + $0x48] sm:$0xff] }
  0xc0   : > { %5418 = vmatprep.mubr.msk.bf16.mxu0 %vm597_vm0, %v2857_v23  ;;  %4161 = vperm.xlu1 %5890, %v4103_v56   ;;  %v4106_v23 = vld [vmem:[%s7440_s4 + $0x40] sm:$0xff]  ;;  %v3180_v56 = vor.u32 %v3179_v38, %v3176_v15  ;;  %v2867_v6 = vsel %vm2363_vm3, %v2864_v0, %v2866_v48  ;;  %v1107_v48 = vrot.slane %v6402_v20, 1  ;;  %v4115_v20 = vld [vmem:[%s7440_s4 + $0x88] sm:$0xff] }
  0xc1   : > { %4176 = vperm.xlu0 %5889, %v4106_v23   ;;  %v3202_v23 = vrot.slane %v3200_v34, 2 }
  0xc2   : > { %5261 = vmatpush3.bf16.msra.mxu1 %v5983_v60  ;;  %v3182_v60 = vshrl.u32 %v6577_v18, 16 }
  0xc3   : > { %5549 = vmatprep.subr.bf16.mxu1 %v6744_v45 }
  0xc4   : > { %4171 = vperm.xlu1 %5890, %v4105_v9  }
  0xc5   : > { %5227 = vmatmul.mubr.msk.bf16.gmra.mrb[8].mxu1 %vm597_vm0, %v1092_v35  ;;  %v2865_v35 = vsel %vm2363_vm3, %v2862_v44, %v2864_v0  ;;  %4186 = vperm.xlu0 %5889, %v4108_v36   ;;  %v4109_v44 = vld [vmem:[%s7440_s4 + $0x58] sm:$0xff]  ;;  %v4111_v0 = vld [vmem:[%s7440_s4 + $0x68] sm:$0xff] }
  0xc6   : > { %5230 = vmatprep.mubr.msk.bf16.mxu1 %vm597_vm0, %v1094_v37  ;;  %v3184_v37 = vrot.slane %v3182_v60, 2  ;;  %v3193_v60 = vrot.slane %v3191_v58, 2 }
  0xc7   : > { %5419 = vmatmul.mubr.msk.bf16.gmra.mrb[24].mxu0 %vm597_vm0, %v2859_v50  ;;  %v1102_v50 = vsel %vm1079_vm4, %v1099_v12, %v1101_v32  ;;  %v1105_v12 = vrot.slane %v6390_v3, 1  ;;  %v3209_v3 = vshrl.u32 %v6605_v42, 16  ;;  %v4114_v32 = vld [vmem:[%s7440_s4 + $0x80] sm:$0xff] }
  0xc8   : > { %5422 = vmatprep.mubr.msk.bf16.mxu0 %vm597_vm0, %v2861_v54  ;;  %v3194_v54 = vshll.u32 %v6589_v30, 16  ;;  %v3188_v43 = vor.u32 %v3187_v25, %v3184_v37  ;;  %4181 = vperm.xlu1 %5890, %v4107_v40   ;;  %v3218_v25 = vshrl.u32 %v6609_v41, 16  ;;  %v4113_v40 = vld [vmem:[%s7440_s4 + $0x78] sm:$0xff] }
  0xc9   : > { %v1106_v38 = vsel %vm1079_vm4, %v1103_v2, %v1105_v12  ;;  %v3230_v2 = vshll.u32 %v6628_v33, 16 }
  0xca   : > { %v3196_v8 = vrot.slane %v3194_v54, 3  ;;  %v3189_v9 = vsel %vm3172_vm5, %v3180_v56, %v3188_v43  ;;  %v1109_v56 = vrot.slane %v6409_v31, 1  ;;  %v3220_v34 = vrot.slane %v3218_v25, 2 }
  0xcb   : > { %v1108_v31 = vsel %vm1079_vm4, %v1105_v12, %v1107_v48  ;;  %v4117_v12 = vld [vmem:[%s7440_s4 + $0x98] sm:$0xff] }
  0xcc   : > { %4191 = vperm.xlu1 %5890, %v4109_v44   ;;  %v3197_v15 = vor.u32 %v3196_v8, %v3193_v60  ;;  %v5982_v44 = vld [vmem:[%s7437_s1 + $0x108] sm:$0xff]   ;;  %v1110_v60 = vsel %vm1079_vm4, %v1107_v48, %v1109_v56 }
  0xcd   : > { %5231 = vmatmul.mubr.msk.bf16.gmra.mrb[12].mxu1 %vm597_vm0, %v1096_v13  ;;  %v3203_v13 = vshll.u32 %v6593_v29, 16 }
  0xce   : > { %5234 = vmatprep.mubr.msk.bf16.mxu1 %vm597_vm0, %v1098_v63  ;;  %v4110_v63 = vld [vmem:[%s7440_s4 + $0x60] sm:$0xff]  ;;  %v3198_v36 = vsel %vm3172_vm5, %v3188_v43, %v3197_v15  ;;  %v4116_v43 = vld [vmem:[%s7440_s4 + $0x90] sm:$0xff] }
  0xcf   : > { %5423 = vmatmul.mubr.msk.bf16.gmra.mrb[28].mxu0 %vm597_vm0, %v2863_v17  ;;  %v3205_v17 = vrot.slane %v3203_v13, 3  ;;  %4196 = vperm.xlu0 %5889, %v4110_v63  }
  0xd0   : > { %5426 = vmatprep.mubr.msk.bf16.mxu0 %vm597_vm0, %v2865_v35  ;;  %v3212_v35 = vshll.u32 %v6605_v42, 16  ;;  %4201 = vperm.xlu1 %5890, %v4111_v0  }
  0xd1   : > { %v3206_v37 = vor.u32 %v3205_v17, %v3202_v23  ;;  %v3239_v23 = vshll.u32 %v6632_v10, 16  ;;  %v4118_v17 = vld [vmem:[%s7440_s4 + $0xa0] sm:$0xff] }
  0xd2   : > { %v3214_v58 = vrot.slane %v3212_v35, 3  ;;  %v1113_v35 = vrot.slane %v6434_v53, 1 }
  0xd3   : > { %4206 = vperm.xlu0 %5889, %v4112_v47   ;;  %v3207_v54 = vsel %vm3172_vm5, %v3197_v15, %v3206_v37  ;;  %v1111_v47 = vrot.slane %v6426_v49, 1  ;;  %v3232_v15 = vrot.slane %v3230_v2, 3  ;;  %v3241_v25 = vrot.slane %v3239_v23, 3  ;;  %v4119_v49 = vld [vmem:[%s7440_s4 + $0xa8] sm:$0xff] }
  0xd4   : > { %4211 = vperm.xlu1 %5890, %v4113_v40  }
  0xd5   : > { %5235 = vmatmul.mubr.msk.bf16.gmra.mrb[16].mxu1 %vm597_vm0, %v1100_v22  ;;  %v3221_v22 = vshll.u32 %v6609_v41, 16  ;;  %v1112_v53 = vsel %vm1079_vm4, %v1109_v56, %v1111_v47  ;;  %v1114_v48 = vsel %vm1079_vm4, %v1111_v47, %v1113_v35  ;;  %v4121_v56 = vld [vmem:[%s7440_s4 + $0xb8] sm:$0xff]  ;;  %v3272_v47 = vshrl.u32 %v6678_v39, 16 }
  0xd6   : > { %5238 = vmatprep.mubr.msk.bf16.mxu1 %vm597_vm0, %v1102_v50  ;;  %v3211_v50 = vrot.slane %v3209_v3, 2 }
  0xd7   : > { %5427 = vmatmul.mubr.msk.bf16.gmra.mrb[32].mxu0 %vm597_vm0, %v2867_v6  ;;  %v3223_v13 = vrot.slane %v3221_v22, 3  ;;  %4216 = vperm.xlu0 %5889, %v4114_v32   ;;  %v3227_v6 = vshrl.u32 %v6628_v33, 16  ;;  %v5985_v22 = vld [vmem:[%s7437_s1 + $0x118] sm:$0xff]   ;;  %v3245_v32 = vshrl.u32 %v6654_v52, 16 }
  0xd8   : > { %5438 = vmatprep.mubr.msk.bf16.mxu0 %vm597_vm0, %v3189_v9  ;;  %v3215_v63 = vor.u32 %v3214_v58, %v3211_v50  ;;  %v3236_v9 = vshrl.u32 %v6632_v10, 16  ;;  %4221 = vperm.xlu1 %5890, %v4115_v20   ;;  %v3254_v58 = vshrl.u32 %v6659_v62, 16 }
  0xd9   : > { %v3224_v8 = vor.u32 %v3223_v13, %v3220_v34  ;;  %v1115_v34 = vrot.slane %v6457_v5, 1  ;;  %v4122_v13 = vld [vmem:[%s7440_s4 + $0xc0] sm:$0xff]  ;;  %v3247_v20 = vrot.slane %v3245_v32, 2  ;;  %v4123_v5 = vld [vmem:[%s7440_s4 + $0xc8] sm:$0xff]  ;;  %v3274_v32 = vrot.slane %v3272_v47, 2 }
  0xda   : > { %v3216_v0 = vsel %vm3172_vm5, %v3206_v37, %v3215_v63  ;;  %v4120_v37 = vld [vmem:[%s7440_s4 + $0xb0] sm:$0xff] }
  0xdb   : > { %4226 = vperm.xlu0 %5889, %v4116_v43   ;;  %v3225_v3 = vsel %vm3172_vm5, %v3215_v63, %v3224_v8 }
  0xdc   : > { %4231 = vperm.xlu1 %5890, %v4117_v12   ;;  %v3266_v12 = vshll.u32 %v6673_v28, 16 }
  0xdd   : > { %5239 = vmatmul.mubr.msk.bf16.gmra.mrb[20].mxu1 %vm597_vm0, %v1104_v26  ;;  %v3229_v26 = vrot.slane %v3227_v6, 2  ;;  %v5995_v6 = vld [vmem:[%s6199_s17 + $0x10] sm:$0xff]  }
  0xde   : > { %5242 = vmatprep.mubr.msk.bf16.mxu1 %vm597_vm0, %v1106_v38  ;;  %v3238_v38 = vrot.slane %v3236_v9, 2  ;;  %v1548_v2 = vrot.slane %v5995_v6, 1 }
  0xdf   : > { %5439 = vmatmul.mubr.msk.bf16.vlgmr.msra.gmra.mrb[0].mxu0 %vm597_vm0, %v3198_v36  ;;  %4236 = vperm.xlu0 %5889, %v4118_v17   ;;  %v3233_v40 = vor.u32 %v3232_v15, %v3229_v26  ;;  %v3248_v36 = vshll.u32 %v6654_v52, 16  ;;  %v3275_v26 = vshll.u32 %v6678_v39, 16  ;;  %v4125_v15 = vld [vmem:[%s7440_s4 + $0xd8] sm:$0xff] }
  0xe0   : > { %5475 = vmatpush3.bf16.msra.mxu0 %v6646_v59  ;;  %5442 = vmatprep.mubr.msk.bf16.mxu0 %vm597_vm0, %v3207_v54  ;;  %v5984_v59 = vld [vmem:[%s7437_s1 + $0x110] sm:$0xff]   ;;  %v3242_v50 = vor.u32 %v3241_v25, %v3238_v38  ;;  %v3257_v54 = vshll.u32 %v6659_v62, 16  ;;  %v5996_v38 = vld [vmem:[%s6199_s17 + $0x18] sm:$0xff]  }
  0xe1   : > { %5476 = vmatprep.subr.bf16.mxu0 %v5982_v44  ;;  %4241 = vperm.xlu1 %5890, %v4119_v49   ;;  %v3250_v43 = vrot.slane %v3248_v36, 3  ;;  %v1550_v25 = vrot.slane %v5996_v38, 1  ;;  %v3268_v49 = vrot.slane %v3266_v12, 3  ;;  %v3277_v36 = vrot.slane %v3275_v26, 3 }
  0xe2   : > { %v3243_v63 = vsel %vm3172_vm5, %v3233_v40, %v3242_v50  ;;  %v3259_v9 = vrot.slane %v3257_v54, 3 }
  0xe3   : > { %4246 = vperm.xlu0 %5889, %v4120_v37   ;;  %v3251_v23 = vor.u32 %v3250_v43, %v3247_v20  ;;  %v3290_v20 = vshrl.u32 %v6700_v55, 16  ;;  %v3293_v43 = vshll.u32 %v6700_v55, 16 }
  0xe4   : > { %5477 = vmatpush3.bf16.msra.mxu0 %v5982_v44  ;;  %v3234_v44 = vsel %vm3172_vm5, %v3224_v8, %v3233_v40  ;;  %v4124_v8 = vld [vmem:[%s7440_s4 + $0xd0] sm:$0xff] }
  0xe5   : > { %5243 = vmatmul.mubr.msk.bf16.gmra.mrb[24].mxu1 %vm597_vm0, %v1108_v31  ;;  %5478 = vmatprep.subr.bf16.mxu0 %v5984_v59  ;;  %v1547_v31 = vrot.slane %v6223_v19, 1  ;;  %v1116_v19 = vsel %vm1079_vm4, %v1113_v35, %v1115_v34  ;;  %v3252_v35 = vsel %vm3172_vm5, %v3242_v50, %v3251_v23  ;;  %v4128_v50 = vld [vmem:[%s7440_s4 + $0xf0] sm:$0xff]  ;;  %v3284_v34 = vshll.u32 %v6694_v11, 16 }
  0xe6   : > { %5246 = vmatprep.mubr.msk.bf16.mxu1 %vm597_vm0, %v1110_v60  ;;  %v3256_v60 = vrot.slane %v3254_v58, 2  ;;  %4251 = vperm.xlu1 %5890, %v4121_v56   ;;  %v1551_v58 = vsel %vm1079_vm4, %v1548_v2, %v1550_v25  ;;  %v3281_v56 = vshrl.u32 %v6694_v11, 16  ;;  %v3295_v12 = vrot.slane %v3293_v43, 3 }
  0xe7   : > { %5443 = vmatmul.mubr.msk.bf16.gmra.mrb[4].mxu0 %vm597_vm0, %v3216_v0  ;;  %4256 = vperm.xlu0 %5889, %v4122_v13   ;;  %v1549_v17 = vsel %vm1079_vm4, %v1547_v31, %v1548_v2  ;;  %v4129_v31 = vld [vmem:[%s7440_s4 + $0xf8] sm:$0xff]  ;;  %v5998_v2 = vld [vmem:[%s6199_s17 + $0x28] sm:$0xff]   ;;  %v3317_v43 = vshrl.u32 %v6758_v21, 16 }
  0xe8   : > { %5446 = vmatprep.mubr.msk.bf16.mxu0 %vm597_vm0, %v3225_v3  ;;  %5479 = vmatpush3.bf16.msra.mxu0 %v5984_v59  ;;  %v3263_v59 = vshrl.u32 %v6673_v28, 16  ;;  %v3260_v0 = vor.u32 %v3259_v9, %v3256_v60  ;;  %v4126_v3 = vld [vmem:[%s7440_s4 + $0xe0] sm:$0xff]  ;;  %v1554_v60 = vrot.slane %v5998_v2, 1  ;;  %v3283_v9 = vrot.slane %v3281_v56, 2 }
  0xe9   : > { %5480 = vmatprep.subr.bf16.mxu0 %v5985_v22  ;;  %v3326_v2 = vshrl.u32 %v6763_v24, 16 }
  0xea   : > { %4261 = vperm.xlu1 %5890, %v4123_v5   ;;  %v3261_v37 = vsel %vm3172_vm5, %v3251_v23, %v3260_v0  ;;  %v3286_v5 = vrot.slane %v3284_v34, 3 }
  0xeb   : > { %4266 = vperm.xlu0 %5889, %v4124_v8  }
  0xec   : > { %5481 = vmatpush3.bf16.msra.mxu0 %v5985_v22  ;;  %v3265_v22 = vrot.slane %v3263_v59, 2  ;;  %v3292_v59 = vrot.slane %v3290_v20, 2  ;;  %v3287_v26 = vor.u32 %v3286_v5, %v3283_v9  ;;  %v6005_v5 = vld [vmem:[%s6199_s17 + $0x48] sm:$0xff]  }
  0xed   : > { %5247 = vmatmul.mubr.msk.bf16.gmra.mrb[28].mxu1 %vm597_vm0, %v1112_v53  ;;  %v5997_v53 = vld [vmem:[%s6199_s17 + $0x20] sm:$0xff]  }
  0xee   : > { %5250 = vmatprep.mubr.msk.bf16.mxu1 %vm597_vm0, %v1114_v48  ;;  %v1552_v40 = vrot.slane %v5997_v53, 1  ;;  %4271 = vperm.xlu1 %5890, %v4125_v15   ;;  %v4127_v48 = vld [vmem:[%s7440_s4 + $0xe8] sm:$0xff]  ;;  %v3269_v54 = vor.u32 %v3268_v49, %v3265_v22  ;;  %v3299_v15 = vshrl.u32 %v6722_v16, 16  ;;  %v3296_v38 = vor.u32 %v3295_v12, %v3292_v59  ;;  %v6001_v49 = vld [vmem:[%s7437_s1 + $0x90] sm:$0xff]  }
  0xef   : > { %5447 = vmatmul.mubr.msk.bf16.gmra.mrb[8].mxu0 %vm597_vm0, %v3234_v44  ;;  %4276 = vperm.xlu0 %5889, %v4126_v3   ;;  %v3278_v44 = vor.u32 %v3277_v36, %v3274_v32  ;;  %v3302_v3 = vshll.u32 %v6722_v16, 16  ;;  %v3311_v22 = vshll.u32 %v6727_v27, 16  ;;  %v7007_v59 = vld [vmem:[%s6199_s17 + $0xa0] ss:$0 sps:$4 sm:$0x77]  }
  0xf0   : > { %5450 = vmatprep.mubr.msk.bf16.mxu0 %vm597_vm0, %v3243_v63  ;;  %v1553_v13 = vsel %vm1079_vm4, %v1550_v25, %v1552_v40  ;;  %v4130_v63 = vld [vmem:[%s7440_s4 + $0x100] sm:$0xff]  ;;  %v3270_v6 = vsel %vm3172_vm5, %v3260_v0, %v3269_v54  ;;  %v4131_v0 = vld [vmem:[%s7440_s4 + $0x108] sm:$0xff]  ;;  %v1555_v47 = vsel %vm1079_vm4, %v1552_v40, %v1554_v60  ;;  %v3308_v25 = vshrl.u32 %v6727_v27, 16  ;;  %v6002_v40 = vld [vmem:[%s6199_s17 + $0x38] sm:$0xff]  }
  0xf1   : > { %v3279_v8 = vsel %vm3172_vm5, %v3269_v54, %v3278_v44  ;;  %v3288_v53 = vsel %vm3172_vm5, %v3278_v44, %v3287_v26  ;;  %v1558_v32 = vrot.slane %v6002_v40, 1  ;;  %v3301_v36 = vrot.slane %v3299_v15, 2 }
  0xf2   : > { %4281 = vperm.xlu1 %5890, %v4127_v48   ;;  %v3304_v48 = vrot.slane %v3302_v3, 3  ;;  %v3310_v56 = vrot.slane %v3308_v25, 2  ;;  %v3313_v34 = vrot.slane %v3311_v22, 3  ;;  %v3335_v3 = vshrl.u32 %v7007_v59, 16  ;;  %v3634_v22 = vld [vmem:[%s6199_s17 + $0x10] sm:$0x8] }
  0xf3   : > { %4286 = vperm.xlu0 %5889, %v4128_v50   ;;  %v3297_v50 = vsel %vm3172_vm5, %v3287_v26, %v3296_v38 }
  0xf4   : > { %v3305_v20 = vor.u32 %v3304_v48, %v3301_v36  ;;  %v3337_v40 = vrot.slane %v3335_v3, 2  ;;  %v6008_v48 = vld [vmem:[%s6199_s17 + $0x60] sm:$0xff]   ;;  %v6009_v3 = vld [vmem:[%s6199_s17 + $0x68] sm:$0xff]  }
  0xf5   : > { %5251 = vmatmul.mubr.msk.bf16.gmra.mrb[32].mxu1 %vm597_vm0, %v1116_v19  ;;  %v5999_v19 = vld [vmem:[%s6199_s17 + $0x30] sm:$0xff]  }
  0xf6   : > { %5262 = vmatprep.mubr.msk.bf16.mxu1 %vm597_vm0, %v1549_v17  ;;  %v1556_v23 = vrot.slane %v5999_v19, 1  ;;  %v6000_v17 = vld [vmem:[%s7437_s1 + $0x88] sm:$0xff]   ;;  %4291 = vperm.xlu1 %5890, %v4129_v31   ;;  %v3320_v31 = vshll.u32 %v6758_v21, 16  ;;  %v3306_v9 = vsel %vm3172_vm5, %v3296_v38, %v3305_v20  ;;  %v3319_v19 = vrot.slane %v3317_v43, 2 }
  0xf7   : > { %5451 = vmatmul.mubr.msk.bf16.gmra.mrb[12].mxu0 %vm597_vm0, %v3252_v35  ;;  %4296 = vperm.xlu0 %5889, %v4130_v63  }
  0xf8   : > { %5454 = vmatprep.mubr.msk.bf16.mxu0 %vm597_vm0, %v3261_v37  ;;  %v1557_v35 = vsel %vm1079_vm4, %v1554_v60, %v1556_v23  ;;  %v4133_v37 = vld [vmem:[%s7440_s4 + $0x118] sm:$0xff]  ;;  %v1559_v44 = vsel %vm1079_vm4, %v1556_v23, %v1558_v32  ;;  %v3329_v60 = vshll.u32 %v6763_v24, 16  ;;  %v3322_v23 = vrot.slane %v3320_v31, 3 }
  0xf9   : > { %v1572_v31 = vrot.slane %v6511_v51, 1  ;;  %v1574_v51 = vrot.slane %v6530_v57, 1 }
  0xfa   : > { %4301 = vperm.xlu1 %5890, %v4131_v0   ;;  %v3323_v15 = vor.u32 %v3322_v23, %v3319_v19  ;;  %v1580_v23 = vrot.slane %v6556_v14, 1 }
  0xfd   : > { %5263 = vmatmul.mubr.msk.bf16.vlgmr.msra.gmra.mrb[0].mxu1 %vm597_vm0, %v1551_v58  ;;  %v6003_v58 = vld [vmem:[%s6199_s17 + $0x40] sm:$0xff]  }
  0xfe   : > { %5266 = vmatprep.mubr.msk.bf16.mxu1 %vm597_vm0, %v1553_v13  ;;  %5553 = vmatpush3.bf16.msra.mxu1 %v6744_v45  ;;  %v4132_v45 = vld [vmem:[%s7440_s4 + $0x110] sm:$0xff]  ;;  %v1560_v54 = vrot.slane %v6003_v58, 1  ;;  %v6004_v13 = vld [vmem:[%s7437_s1 + $0x98] sm:$0xff]   ;;  %v4886_v58 = vcombine.low %v3634_v22, %v6564_v7  ;;  %v1570_v7 = vrot.slane %v6504_v46, 1 }
  0xff   : > { %5550 = vmatprep.subr.bf16.mxu1 %v6000_v17  ;;  %5455 = vmatmul.mubr.msk.bf16.gmra.mrb[16].mxu0 %vm597_vm0, %v3270_v6  ;;  %v3314_v6 = vor.u32 %v3313_v34, %v3310_v56  ;;  %v6010_v22 = vld [vmem:[%s6199_s17 + $0x70] sm:$0xff]  }
 0x100   : > { %5458 = vmatprep.mubr.msk.bf16.mxu0 %vm597_vm0, %v3279_v8  ;;  %4306 = vperm.xlu0 %5889, %v4132_v45   ;;  %v1561_v63 = vsel %vm1079_vm4, %v1558_v32, %v1560_v54  ;;  %v1562_v8 = vrot.slane %v6005_v5, 1  ;;  %v3328_v45 = vrot.slane %v3326_v2, 2  ;;  %v3653_v2 = vrot.slane %v6593_v29, 3 }
 0x101   : > { %4311 = vperm.xlu1 %5890, %v4133_v37   ;;  %v3315_v12 = vsel %vm3172_vm5, %v3305_v20, %v3314_v6  ;;  %v6007_v37 = vld [vmem:[%s6199_s17 + $0x58] sm:$0xff]   ;;  %v3655_v29 = vrot.slane %v6605_v42, 3 }
 0x102   : > { %5554 = vmatpush3.bf16.msra.mxu1 %v6000_v17  ;;  %v6006_v17 = vld [vmem:[%s6199_s17 + $0x50] sm:$0xff]   ;;  %v1563_v26 = vsel %vm1079_vm4, %v1560_v54, %v1562_v8 }
 0x103   : > { %5551 = vmatprep.subr.bf16.mxu1 %v6001_v49  ;;  %v1564_v0 = vrot.slane %v6006_v17, 1  ;;  %v3656_v57 = vsel %vm3647_vm6, %v3653_v2, %v3655_v29  ;;  %v1991_v17 = vshll.u32 %v6008_v48, 16 }
 0x105   : > { %5267 = vmatmul.mubr.msk.bf16.gmra.mrb[4].mxu1 %vm597_vm0, %v1555_v47  ;;  %v3331_v47 = vrot.slane %v3329_v60, 3  ;;  %v1565_v38 = vsel %vm1079_vm4, %v1562_v8, %v1564_v0  ;;  %v3657_v8 = vrot.slane %v6609_v41, 3  ;;  %v3659_v41 = vrot.slane %v6628_v33, 3 }
 0x106   : > { %5270 = vmatprep.mubr.msk.bf16.mxu1 %vm597_vm0, %v1557_v35  ;;  %5555 = vmatpush3.bf16.msra.mxu1 %v6001_v49  ;;  %v3338_v35 = vshll.u32 %v7007_v59, 16  ;;  %v3324_v49 = vsel %vm3172_vm5, %v3314_v6, %v3323_v15  ;;  %v1573_v6 = vsel %vm1079_vm4, %v1570_v7, %v1572_v31 }
 0x107   : > { %5552 = vmatprep.subr.bf16.mxu1 %v6004_v13  ;;  %5459 = vmatmul.mubr.msk.bf16.gmra.mrb[20].mxu0 %vm597_vm0, %v3288_v53  ;;  %v3332_v25 = vor.u32 %v3331_v47, %v3328_v45  ;;  %v1566_v53 = vrot.slane %v6007_v37, 1  ;;  %v3658_v19 = vsel %vm3647_vm6, %v3655_v29, %v3657_v8  ;;  %v3660_v14 = vsel %vm3647_vm6, %v3657_v8, %v3659_v41 }
 0x108   : > { %5462 = vmatprep.mubr.msk.bf16.mxu0 %vm597_vm0, %v3297_v50  ;;  %v3340_v32 = vrot.slane %v3338_v35, 3  ;;  %v1568_v50 = vrot.slane %v6008_v48, 1  ;;  %v1997_v35 = vshrl.u32 %v6009_v3, 16  ;;  %v2009_v37 = vshll.u32 %v6010_v22, 16 }
 0x109   : > { %v3333_v36 = vsel %vm3172_vm5, %v3323_v15, %v3332_v25  ;;  %v1567_v54 = vsel %vm1079_vm4, %v1564_v0, %v1566_v53  ;;  %v5988_v0 = vld [vmem:[%s6199_s17 + $0x98] ss:$0 sps:$4 sm:$0x11]  }
 0x10a   : > { %5556 = vmatpush3.bf16.msra.mxu1 %v6004_v13  ;;  %v3341_v56 = vor.u32 %v3340_v32, %v3337_v40  ;;  %v1569_v34 = vsel %vm1079_vm4, %v1566_v53, %v1568_v50  ;;  %v3648_v13 = vrot.slane %v4886_v58, 3  ;;  %v1582_v15 = vrot.slane %v5988_v0, 1 }
 0x10b   : > { %v3663_v53 = vrot.slane %v6654_v52, 3  ;;  %v1999_v40 = vrot.slane %v1997_v35, 1  ;;  %v2011_v58 = vrot.slane %v2009_v37, 2  ;;  %v3675_v35 = vrot.slane %v6722_v16, 3 }
 0x10c   : > { %v3342_v20 = vsel %vm3172_vm5, %v3332_v25, %v3341_v56 }
 0x10d   : > { %5271 = vmatmul.mubr.msk.bf16.gmra.mrb[8].mxu1 %vm597_vm0, %v1559_v44  ;;  %v3649_v44 = vrot.slane %v6577_v18, 3  ;;  %v3651_v18 = vrot.slane %v6589_v30, 3  ;;  %v1575_v30 = vsel %vm1079_vm4, %v1572_v31, %v1574_v51  ;;  %v3667_v31 = vrot.slane %v6673_v28, 3 }
 0x10e   : > { %5274 = vmatprep.mubr.msk.bf16.mxu1 %vm597_vm0, %v1561_v63  ;;  %v1571_v63 = vsel %vm1079_vm4, %v1568_v50, %v1570_v7  ;;  %v6012_v7 = vld [vmem:[%s6199_s17 + $0x80] sm:$0xff]  }
 0x10f   : > { %5463 = vmatmul.mubr.msk.bf16.gmra.mrb[24].mxu0 %vm597_vm0, %v3306_v9  ;;  %v3650_v43 = vsel %vm3647_vm6, %v3648_v13, %v3649_v44  ;;  %v3652_v46 = vsel %vm3647_vm6, %v3649_v44, %v3651_v18  ;;  %v3654_v60 = vsel %vm3647_vm6, %v3651_v18, %v3653_v2  ;;  %v1576_v9 = vrot.slane %v6534_v61, 1 }
 0x110   : > { %5466 = vmatprep.mubr.msk.bf16.mxu0 %vm597_vm0, %v3315_v12  ;;  %v1578_v61 = vrot.slane %v6552_v1, 1  ;;  %v1988_v12 = vshrl.u32 %v6008_v48, 16  ;;  %v3661_v1 = vrot.slane %v6632_v10, 3  ;;  %v1583_v10 = vsel %vm1079_vm4, %v1580_v23, %v1582_v15 }
 0x111   : > { %v1577_v5 = vsel %vm1079_vm4, %v1574_v51, %v1576_v9  ;;  %v3665_v48 = vrot.slane %v6659_v62, 3  ;;  %v3669_v2 = vrot.slane %v6678_v39, 3 }
 0x112   : > { %v1579_v42 = vsel %vm1079_vm4, %v1576_v9, %v1578_v61  ;;  %v1581_v45 = vsel %vm1079_vm4, %v1578_v61, %v1580_v23  ;;  %v1990_v47 = vrot.slane %v1988_v12, 1  ;;  %v3662_v25 = vsel %vm3647_vm6, %v3659_v41, %v3661_v1 }
 0x113   : > { %v3666_v44 = vsel %vm3647_vm6, %v3663_v53, %v3665_v48  ;;  %v3670_v28 = vsel %vm3647_vm6, %v3667_v31, %v3669_v2  ;;  %v3671_v23 = vrot.slane %v6694_v11, 3  ;;  %v3673_v41 = vrot.slane %v6700_v55, 3 }
 0x115   : > { %5275 = vmatmul.mubr.msk.bf16.gmra.mrb[12].mxu1 %vm597_vm0, %v1563_v26  ;;  %v1993_v26 = vrot.slane %v1991_v17, 2  ;;  %v3674_v11 = vsel %vm3647_vm6, %v3671_v23, %v3673_v41 }
 0x116   : > { %5278 = vmatprep.mubr.msk.bf16.mxu1 %vm597_vm0, %v1565_v38  ;;  %v2000_v38 = vshll.u32 %v6009_v3, 16 }
 0x117   : > { %5467 = vmatmul.mubr.msk.bf16.gmra.mrb[28].mxu0 %vm597_vm0, %v3324_v49  ;;  %v1994_v33 = vor.u32 %v1993_v26, %v1990_v47  ;;  %v2006_v49 = vshrl.u32 %v6010_v22, 16  ;;  %v6015_v26 = vld [vmem:[%s6199_s17 + $0x98] ss:$0 sps:$4 sm:$0x33]   ;;  %v3677_v22 = vrot.slane %v6727_v27, 3 }
 0x118   : > { %5470 = vmatprep.mubr.msk.bf16.mxu0 %vm597_vm0, %v3333_v36  ;;  %v2002_v32 = vrot.slane %v2000_v38, 2  ;;  %v2054_v15 = vshll.u32 %v6015_v26, 16 }
 0x119   : > { %v1995_v36 = vsel %vm1888_vm2, %v6393_v4, %v1994_v33  ;;  %v2008_v50 = vrot.slane %v2006_v49, 1  ;;  %v2027_v4 = vshll.u32 %v6012_v7, 16  ;;  %v3676_v49 = vsel %vm3647_vm6, %v3673_v41, %v3675_v35 }
 0x11a   : > { %v2003_v56 = vor.u32 %v2002_v32, %v1999_v40  ;;  %v3681_v40 = vrot.slane %v6763_v24, 3  ;;  %v4429_v24 = vld [vmem:[%s7441_s5 + $0x8] sm:$0xff] }
 0x11b   : > { %v2029_v51 = vrot.slane %v2027_v4, 2 }
 0x11c   : > { %v2004_v62 = vsel %vm1888_vm2, %v1994_v33, %v2003_v56 }
 0x11d   : > { %5279 = vmatmul.mubr.msk.bf16.gmra.mrb[16].mxu1 %vm597_vm0, %v1567_v54  ;;  %v3664_v54 = vsel %vm3647_vm6, %v3661_v1, %v3663_v53  ;;  %v3672_v1 = vsel %vm3647_vm6, %v3669_v2, %v3671_v23  ;;  %v3679_v53 = vrot.slane %v6758_v21, 3  ;;  %v4428_v21 = vld [vmem:[%s7441_s5] sm:$0xff] }
 0x11e   : > { %5282 = vmatprep.mubr.msk.bf16.mxu1 %vm597_vm0, %v1569_v34  ;;  %v6011_v34 = vld [vmem:[%s6199_s17 + $0x78] sm:$0xff]  }
 0x11f   : > { %5471 = vmatmul.mubr.msk.bf16.gmra.mrb[32].mxu0 %vm597_vm0, %v3342_v20  ;;  %v2015_v13 = vshrl.u32 %v6011_v34, 16  ;;  %v2018_v52 = vshll.u32 %v6011_v34, 16  ;;  %v2012_v20 = vor.u32 %v2011_v58, %v2008_v50  ;;  %v3680_v27 = vsel %vm3647_vm6, %v3677_v22, %v3679_v53 }
 0x120   : > { %5482 = vmatprep.mubr.msk.bf16.mxu0 %vm597_vm0, %v3650_v43  ;;  %v2024_v43 = vshrl.u32 %v6012_v7, 16  ;;  %v3682_v32 = vsel %vm3647_vm6, %v3679_v53, %v3681_v40  ;;  %v5538_v50 = vpack.c.bf16 %v4429_v24, %v4428_v21  ;;  %v4433_v7 = vld [vmem:[%s7441_s5 + $0x28] sm:$0xff] }
 0x121   : > { %v2020_v18 = vrot.slane %v2018_v52, 2 }
 0x125   : > { %5283 = vmatmul.mubr.msk.bf16.gmra.mrb[20].mxu1 %vm597_vm0, %v1571_v63  ;;  %v2017_v63 = vrot.slane %v2015_v13, 1  ;;  %v4431_v13 = vld [vmem:[%s7441_s5 + $0x18] sm:$0xff] }
 0x126   : > { %5286 = vmatprep.mubr.msk.bf16.mxu1 %vm597_vm0, %v1573_v6  ;;  %v2013_v6 = vsel %vm1888_vm2, %v2003_v56, %v2012_v20 }
 0x127   : > { %5483 = vmatmul.mubr.msk.bf16.vlgmr.msra.gmra.mrb[0].mxu0 %vm597_vm0, %v3652_v46  ;;  %v2026_v46 = vrot.slane %v2024_v43, 1  ;;  %v2021_v9 = vor.u32 %v2020_v18, %v2017_v63 }
 0x128   : > { %5486 = vmatprep.mubr.msk.bf16.mxu0 %vm597_vm0, %v3654_v60  ;;  %v3668_v60 = vsel %vm3647_vm6, %v3665_v48, %v3667_v31  ;;  %v4435_v31 = vld [vmem:[%s7441_s5 + $0x38] sm:$0xff] }
 0x129   : > { %v2030_v8 = vor.u32 %v2029_v51, %v2026_v46  ;;  %v2022_v39 = vsel %vm1888_vm2, %v2012_v20, %v2021_v9  ;;  %v4432_v20 = vld [vmem:[%s7441_s5 + $0x20] sm:$0xff] }
 0x12a   : > { %v5544_v43 = vpack.c.bf16 %v4433_v7, %v4432_v20 }
 0x12d   : > { %5287 = vmatmul.mubr.msk.bf16.gmra.mrb[24].mxu1 %vm597_vm0, %v1575_v30  ;;  %v6013_v30 = vld [vmem:[%s6199_s17 + $0x88] sm:$0xff]  }
 0x12e   : > { %5290 = vmatprep.mubr.msk.bf16.mxu1 %vm597_vm0, %v1577_v5  ;;  %v2033_v29 = vshrl.u32 %v6013_v30, 16  ;;  %v2036_v5 = vshll.u32 %v6013_v30, 16 }
 0x12f   : > { %5487 = vmatmul.mubr.msk.bf16.gmra.mrb[4].mxu0 %vm597_vm0, %v3656_v57  ;;  %v6014_v57 = vld [vmem:[%s6199_s17 + $0x90] sm:$0xff]   ;;  %s7394_s17 = scalar_lea.hbm %s7443_s7, %s4912_s21 }
 0x130   : > { %5490 = vmatprep.mubr.msk.bf16.mxu0 %vm597_vm0, %v3658_v19  ;;  %v2042_v61 = vshrl.u32 %v6014_v57, 16  ;;  %v2045_v19 = vshll.u32 %v6014_v57, 16  ;;  %v2035_v12 = vrot.slane %v2033_v29, 1  ;;  %v2038_v17 = vrot.slane %v2036_v5, 2  ;;  %v4147_v5 = vpop.permute.xlu1 %4146 }
 0x132   : > { %v2044_v0 = vrot.slane %v2042_v61, 1  ;;  %v2039_v47 = vor.u32 %v2038_v17, %v2035_v12 }
 0x134   : > { %v2040_v55 = vsel %vm1888_vm2, %v2030_v8, %v2039_v47 }
 0x135   : > { %5291 = vmatmul.mubr.msk.bf16.gmra.mrb[28].mxu1 %vm597_vm0, %v1579_v42  ;;  %v2031_v42 = vsel %vm1888_vm2, %v2021_v9, %v2030_v8  ;;  %v4137_v9 = vpop.permute.xlu0 %4136 }
 0x136   : > { %5294 = vmatprep.mubr.msk.bf16.mxu1 %vm597_vm0, %v1581_v45  ;;  %v2047_v45 = vrot.slane %v2045_v19, 2 }
 0x137   : > { %5491 = vmatmul.mubr.msk.bf16.gmra.mrb[8].mxu0 %vm597_vm0, %v3660_v14  ;;  %v2051_v14 = vshrl.u32 %v6015_v26, 16  ;;  %v4152_v61 = vpop.permute.xlu1 %4151 }
 0x138   : > { %5494 = vmatprep.mubr.msk.bf16.mxu0 %vm597_vm0, %v3662_v25  ;;  %v2048_v3 = vor.u32 %v2047_v45, %v2044_v0  ;;  %v2056_v25 = vrot.slane %v2054_v15, 2  ;;  %v7195_v15 = vld [vmem:[%s7438_s2] ss:$0 sm:$0xff] }
 0x139   : > { %v2053_v38 = vrot.slane %v2051_v14, 1 }
 0x13a   : > { %v2049_v33 = vsel %vm1888_vm2, %v2039_v47, %v2048_v3 }
 0x13b   : > { %v2057_v37 = vor.u32 %v2056_v25, %v2053_v38 }
 0x13d   : > { %5295 = vmatmul.mubr.msk.bf16.gmra.mrb[32].mxu1 %vm597_vm0, %v1583_v10  ;;  %v3678_v10 = vsel %vm3647_vm6, %v3675_v35, %v3677_v22  ;;  %v2058_v16 = vsel %vm1888_vm2, %v2048_v3, %v2057_v37 }
 0x13e   : > { %5326 = vmatprep.mubr.msk.bf16.mxu1 %vm597_vm0, %v1995_v36  ;;  %v3683_v36 = vrot.slane %v7007_v59, 3  ;;  %v4430_v59 = vld [vmem:[%s7441_s5 + $0x10] sm:$0xff] }
 0x13f   : > { %5495 = vmatmul.mubr.msk.bf16.gmra.mrb[12].mxu0 %vm597_vm0, %v3664_v54  ;;  %v6081_v54 = vmov 0.0|0.0   ;;  %v7174_v12 = vpop.permute.xlu1 %4161 }
 0x140   : > { %5498 = vmatprep.mubr.msk.bf16.mxu0 %vm597_vm0, %v3666_v44  ;;  %v3684_v48 = vsel %vm3647_vm6, %v3681_v40, %v3683_v36  ;;  %5537 = vmatprep.subr.bf16.mxu1 %v6081_v54  ;;  %v5541_v44 = vpack.c.bf16 %v4431_v13, %v4430_v59 }
 0x145   : > { %5327 = vmatmul.mubr.msk.bf16.vlgmr.msra.gmra.mrb[20].mxu1 %vm597_vm0, %v2004_v62  ;;  %v4434_v62 = vld [vmem:[%s7441_s5 + $0x30] sm:$0xff] }
 0x146   : > { %5330 = vmatprep.mubr.msk.bf16.mxu1 %vm597_vm0, %v2013_v6  ;;  %5539 = vmatpush3.bf16.msra.mxu1 %v5538_v50  ;;  %v5547_v18 = vpack.c.bf16 %v4435_v31, %v4434_v62  ;;  %v6083_v6 = vmov 0.0  }
 0x147   : > { %5499 = vmatmul.mubr.msk.bf16.gmra.mrb[16].mxu0 %vm597_vm0, %v3668_v60  ;;  %5540 = vmatprep.subr.bf16.mxu1 %v6081_v54 }
 0x148   : > { %5502 = vmatprep.mubr.msk.bf16.mxu0 %vm597_vm0, %v3670_v28  ;;  %v4142_v28 = vpop.permute.xlu0 %4141 }
 0x14a   : > { %5542 = vmatpush3.bf16.msra.mxu1 %v5541_v44 }
 0x14b   : > { %5543 = vmatprep.subr.bf16.mxu1 %v6081_v54 }
 0x14c   : > { %v7172_v23 = vpop.permute.xlu0 %4156 }
 0x14d   : > { %5331 = vmatmul.mubr.msk.bf16.gmra.mrb[24].mxu1 %vm597_vm0, %v2022_v39 }
 0x14e   : > { %5334 = vmatprep.mubr.msk.bf16.mxu1 %vm597_vm0, %v2031_v42  ;;  %5545 = vmatpush3.bf16.msra.mxu1 %v5544_v43 }
 0x14f   : > { %5503 = vmatmul.mubr.msk.bf16.gmra.mrb[20].mxu0 %vm597_vm0, %v3672_v1  ;;  %5546 = vmatprep.subr.bf16.mxu1 %v6081_v54  ;;  %v7186_v1 = vpop.permute.xlu1 %4171 }
 0x150   : > { %5506 = vmatprep.mubr.msk.bf16.mxu0 %vm597_vm0, %v3674_v11  ;;  %v7184_v45 = vpop.permute.xlu0 %4166 }
 0x152   : > { %5548 = vmatpush3.bf16.msra.mxu1 %v5547_v18 }
 0x153   : > { %v7190_v26 = vpop.permute.xlu1 %4181 }
 0x154   : > { %v7188_v47 = vpop.permute.xlu0 %4176 }
 0x155   : > { %5335 = vmatmul.mubr.msk.bf16.gmra.mrb[28].mxu1 %vm597_vm0, %v2040_v55  ;;  %v7200_v55 = vld [vmem:[%s7439_s3] ss:$0 sm:$0xff] }
 0x156   : > { %5338 = vmatprep.mubr.msk.bf16.mxu1 %vm597_vm0, %v2049_v33 }
 0x157   : > { %5507 = vmatmul.mubr.msk.bf16.gmra.mrb[24].mxu0 %vm597_vm0, %v3676_v49  ;;  %v7208_v40 = vpop.permute.xlu1 %4191 }
 0x158   : > { %5510 = vmatprep.mubr.msk.bf16.mxu0 %vm597_vm0, %v3678_v10  ;;  %v7203_v49 = vpop.permute.xlu0 %4186 }
 0x15b   : > { %v7217_v62 = vpop.permute.xlu1 %4201 }
 0x15d   : > { %5339 = vmatmul.mubr.msk.bf16.gmra.mrb[32].mxu1 %vm597_vm0, %v2058_v16 }
 0x15e   : > { %5534 = vmatprep.mubr.msk.f32.mxu1 %vm6082_vm7, %v6083_v6 }
 0x15f   : > { %5511 = vmatmul.mubr.msk.bf16.gmra.mrb[28].mxu0 %vm597_vm0, %v3680_v27 }
 0x160   : > { %5514 = vmatprep.mubr.msk.bf16.mxu0 %vm597_vm0, %v3682_v32 }
 0x167   : > { %5515 = vmatmul.mubr.msk.bf16.gmra.mrb[32].mxu0 %vm597_vm0, %v3684_v48 }
 0x1d0   : > { %v5264_v58 = vpop.f32.mrb[0].mxu1 }
 0x1d1   : > { %v1696_v56 = vpop.f32.mrb[1].mxu1 }
 0x1d2   : > { %v5265_v34 = vpop.f32.mrb[2].mxu1 }
 0x1d3   : > { %v1699_v52 = vpop.f32.mrb[3].mxu1 }
 0x1d8   : > { %v5268_v4 = vpop.f32.mrb[4].mxu1 }
 0x1d9   : > { %v1712_v63 = vpop.f32.mrb[5].mxu1 }
 0x1da   : > { %v5269_v2 = vpop.f32.mrb[6].mxu1 }
 0x1db   : > { %v1715_v46 = vpop.f32.mrb[7].mxu1 }
 0x1e0   : > { %v7156_v51 = vpop.f32.mrb[8].mxu1 }
 0x1e1   : > { %v7158_v60 = vpop.f32.mrb[9].mxu1 }
 0x1e2   : > { %v7160_v30 = vpop.f32.mrb[10].mxu1 }
 0x1e3   : > { %v7162_v29 = vpop.f32.mrb[11].mxu1 }
 0x1e8   : > { %v7164_v8 = vpop.f32.mrb[12].mxu1 }
 0x1e9   : > { %v7166_v57 = vpop.f32.mrb[13].mxu1 }
 0x1ea   : > { %v7168_v19 = vpop.f32.mrb[14].mxu1 }
 0x1eb   : > { %v7170_v39 = vpop.f32.mrb[15].mxu1 }
 0x1f0   : > { %v7176_v17 = vpop.f32.mrb[16].mxu1 }
 0x1f1   : > { %v7178_v42 = vpop.f32.mrb[17].mxu1 }
 0x1f2   : > { %v7180_v41 = vpop.f32.mrb[18].mxu1 }
 0x1f3   : > { %v7182_v0 = vpop.f32.mrb[19].mxu1 }
 0x1fa   : > { %v5484_v14 = vpop.f32.mrb[0].mxu0 }
 0x1fb   : > { %v5557_v11 = vadd.f32 %v5484_v14, %v5264_v58  ;;  %v3797_v3 = vpop.f32.mrb[1].mxu0 }
 0x1fc   : > { %v5558_v35 = vadd.f32 %v3797_v3, %v1696_v56  ;;  %v5485_v38 = vpop.f32.mrb[2].mxu0 }
 0x1fd   : > { %v3985_v25 = vmul.f32 %v5557_v11, %v7195_v15  ;;  %v5559_v33 = vadd.f32 %v5485_v38, %v5265_v34  ;;  %v3800_v22 = vpop.f32.mrb[3].mxu0  ;;  %v7214_v34 = vpop.permute.xlu0 %4196 }
 0x1fe   : > { %v3983_v37 = vmul.f32 %v5558_v35, %v7195_v15  ;;  %v5560_v10 = vadd.f32 %v3800_v22, %v1699_v52 }
 0x1ff   : > { %v4028_v16 = vadd.f32 %v7200_v55, %v3985_v25  ;;  %v3986_v53 = vmul.f32 %v5559_v33, %v7195_v15 }
 0x200   : > { %v4026_v27 = vadd.f32 %v7200_v55, %v3983_v37  ;;  %v3984_v32 = vmul.f32 %v5560_v10, %v7195_v15 }
 0x201   : > { %v4029_v36 = vadd.f32 %v7200_v55, %v3986_v53  ;;  %v4064_v48 = vmax.f32 %v4028_v16, 0.0 }
 0x202   : > { %v4062_v21 = vmax.f32 %v4026_v27, 0.0  ;;  %v4027_v24 = vadd.f32 %v7200_v55, %v3984_v32  ;;  %v5488_v50 = vpop.f32.mrb[4].mxu0  ;;  %v7233_v27 = vpop.permute.xlu1 %4211 }
 0x203   : > { %v4065_v58 = vmax.f32 %v4029_v36, 0.0  ;;  %v5561_v54 = vadd.f32 %v5488_v50, %v5268_v4  ;;  %v3813_v56 = vpop.f32.mrb[5].mxu0  ;;  %v4316_v31 = vmul.f32 %v4147_v5, %v4064_v48 }
 0x204   : > { %v4314_v59 = vmul.f32 %v4137_v9, %v4062_v21  ;;  %v4063_v13 = vmax.f32 %v4027_v24, 0.0  ;;  %v5562_v52 = vadd.f32 %v3813_v56, %v1712_v63  ;;  %v5489_v44 = vpop.f32.mrb[6].mxu0 }
 0x205   : > { %v3989_v20 = vmul.f32 %v5561_v54, %v7195_v15  ;;  %v5563_v7 = vadd.f32 %v5489_v44, %v5269_v2  ;;  %v3816_v43 = vpop.f32.mrb[7].mxu0  ;;  %v4317_v11 = vmul.f32 %v4152_v61, %v4065_v58 }
 0x206   : > { %v4315_v18 = vmul.f32 %v4142_v28, %v4063_v13  ;;  %v3987_v6 = vmul.f32 %v5562_v52, %v7195_v15  ;;  %v5564_v14 = vadd.f32 %v3816_v43, %v1715_v46  ;;  %v4350_v9 = vsel %vm597_vm0, %v4314_v59, 0.0  ;;  %v7227_v28 = vpop.permute.xlu0 %4206 }
 0x207   : > { %v4032_v4 = vadd.f32 %v7200_v55, %v3989_v20  ;;  %v3990_v3 = vmul.f32 %v5563_v7, %v7195_v15  ;;  %v4353_v46 = vsel %vm597_vm0, %v4316_v31, 0.0  ;;  %v4355_v37 = vsel %vm597_vm0, %v4317_v11, 0.0 }
 0x208   : > { %v4351_v63 = vsel %vm597_vm0, %v4315_v18, 0.0  ;;  %v4030_v35 = vadd.f32 %v7200_v55, %v3987_v6  ;;  %v3988_v2 = vmul.f32 %v5564_v14, %v7195_v15  ;;  %v7252_v6 = vpop.permute.xlu1 %4221 }
 0x209   : > { %v4352_v38 = vadd.f32 %v4351_v63, %v4350_v9  ;;  %v4068_v25 = vmax.f32 %v4032_v4, 0.0  ;;  %v4033_v5 = vadd.f32 %v7200_v55, %v3990_v3 }
 0x20a   : > { %v4066_v61 = vmax.f32 %v4030_v35, 0.0  ;;  %v4031_v33 = vadd.f32 %v7200_v55, %v3988_v2  ;;  %v5492_v22 = vpop.f32.mrb[8].mxu0  ;;  %v7245_v20 = vpop.permute.xlu0 %4216 }
 0x20b   : > { %v4354_v10 = vadd.f32 %v4353_v46, %v4352_v38  ;;  %v5565_v16 = vadd.f32 %v5492_v22, %v7156_v51  ;;  %v3829_v53 = vpop.f32.mrb[9].mxu0  ;;  %v4069_v36 = vmax.f32 %v4033_v5, 0.0  ;;  %v4320_v50 = vmul.f32 %v7184_v45, %v4068_v25 }
 0x20c   : > { %v4318_v32 = vmul.f32 %v7172_v23, %v4066_v61  ;;  %v4067_v48 = vmax.f32 %v4031_v33, 0.0  ;;  %v5566_v21 = vadd.f32 %v3829_v53, %v7158_v60  ;;  %v5493_v24 = vpop.f32.mrb[10].mxu0 }
 0x20d   : > { %v4356_v58 = vadd.f32 %v4355_v37, %v4354_v10  ;;  %v3993_v54 = vmul.f32 %v5565_v16, %v7195_v15  ;;  %v3832_v56 = vpop.f32.mrb[11].mxu0  ;;  %v5567_v52 = vadd.f32 %v5493_v24, %v7160_v30  ;;  %v4321_v45 = vmul.f32 %v7186_v1, %v4069_v36  ;;  %v7271_v24 = vpop.permute.xlu1 %4231 }
 0x20e   : > { %v4357_v59 = vsel %vm597_vm0, %v4318_v32, 0.0  ;;  %v4319_v51 = vmul.f32 %v7174_v12, %v4067_v48  ;;  %v3991_v13 = vmul.f32 %v5566_v21, %v7195_v15  ;;  %v5568_v60 = vadd.f32 %v3832_v56, %v7162_v29  ;;  %v7262_v37 = vpop.permute.xlu0 %4226 }
 0x20f   : > { %v4358_v23 = vadd.f32 %v4357_v59, %v4356_v58  ;;  %v4036_v44 = vadd.f32 %v7200_v55, %v3993_v54  ;;  %v3994_v31 = vmul.f32 %v5567_v52, %v7195_v15  ;;  %v4361_v30 = vsel %vm597_vm0, %v4320_v50, 0.0 }
 0x210   : > { %v4359_v7 = vsel %vm597_vm0, %v4319_v51, 0.0  ;;  %v4034_v43 = vadd.f32 %v7200_v55, %v3991_v13  ;;  %v3992_v18 = vmul.f32 %v5568_v60, %v7195_v15  ;;  %v4363_v35 = vsel %vm597_vm0, %v4321_v45, 0.0 }
 0x211   : > { %v4360_v12 = vadd.f32 %v4359_v7, %v4358_v23  ;;  %v4072_v14 = vmax.f32 %v4036_v44, 0.0  ;;  %v4037_v29 = vadd.f32 %v7200_v55, %v3994_v31 }
 0x212   : > { %v4070_v11 = vmax.f32 %v4034_v43, 0.0  ;;  %v5496_v4 = vpop.f32.mrb[12].mxu0  ;;  %v4035_v1 = vadd.f32 %v7200_v55, %v3992_v18  ;;  %v7286_v45 = vpop.permute.xlu0 %4236 }
 0x213   : > { %v4362_v3 = vadd.f32 %v4361_v30, %v4360_v12  ;;  %v5569_v9 = vadd.f32 %v5496_v4, %v7164_v8  ;;  %v3845_v63 = vpop.f32.mrb[13].mxu0  ;;  %v4073_v38 = vmax.f32 %v4037_v29, 0.0  ;;  %v4324_v10 = vmul.f32 %v7203_v49, %v4072_v14 }
 0x214   : > { %v4322_v2 = vmul.f32 %v7188_v47, %v4070_v11  ;;  %v5570_v25 = vadd.f32 %v3845_v63, %v7166_v57  ;;  %v5497_v5 = vpop.f32.mrb[14].mxu0  ;;  %v4071_v61 = vmax.f32 %v4035_v1, 0.0 }
 0x215   : > { %v4364_v46 = vadd.f32 %v4363_v35, %v4362_v3  ;;  %v3997_v33 = vmul.f32 %v5569_v9, %v7195_v15  ;;  %v3848_v22 = vpop.f32.mrb[15].mxu0  ;;  %v5571_v53 = vadd.f32 %v5497_v5, %v7168_v19  ;;  %v4325_v50 = vmul.f32 %v7208_v40, %v4073_v38  ;;  %v7293_v3 = vpop.permute.xlu1 %4241 }
 0x216   : > { %v4365_v8 = vsel %vm597_vm0, %v4322_v2, 0.0  ;;  %v3995_v16 = vmul.f32 %v5570_v25, %v7195_v15  ;;  %v4323_v57 = vmul.f32 %v7190_v26, %v4071_v61  ;;  %v5572_v48 = vadd.f32 %v3848_v22, %v7170_v39 }
 0x217   : > { %v4366_v32 = vadd.f32 %v4365_v8, %v4364_v46  ;;  %v4040_v36 = vadd.f32 %v7200_v55, %v3997_v33  ;;  %v3998_v58 = vmul.f32 %v5571_v53, %v7195_v15  ;;  %v4369_v40 = vsel %vm597_vm0, %v4324_v10, 0.0  ;;  %v4247_v10 = vpop.permute.xlu0 %4246 }
 0x218   : > { %v5328_v47 = vpop.f32.mrb[20].mxu1  ;;  %v4038_v49 = vadd.f32 %v7200_v55, %v3995_v16  ;;  %v4367_v19 = vsel %vm597_vm0, %v4323_v57, 0.0  ;;  %v3996_v56 = vmul.f32 %v5572_v48, %v7195_v15  ;;  %v4371_v7 = vsel %vm597_vm0, %v4325_v50, 0.0 }
 0x219   : > { %v2251_v21 = vpop.f32.mrb[21].mxu1  ;;  %v4368_v59 = vadd.f32 %v4367_v19, %v4366_v32  ;;  %v4076_v51 = vmax.f32 %v4040_v36, 0.0  ;;  %v4041_v13 = vadd.f32 %v7200_v55, %v3998_v58 }
 0x21a   : > { %v7276_v54 = vpop.f32.mrb[22].mxu1  ;;  %v4074_v39 = vmax.f32 %v4038_v49, 0.0  ;;  %v5500_v52 = vpop.f32.mrb[16].mxu0  ;;  %v4039_v23 = vadd.f32 %v7200_v55, %v3996_v56 }
 0x21b   : > { %v7280_v26 = vpop.f32.mrb[23].mxu1  ;;  %v5573_v44 = vadd.f32 %v5500_v52, %v7176_v17  ;;  %v3861_v60 = vpop.f32.mrb[17].mxu0  ;;  %v4370_v43 = vadd.f32 %v4369_v40, %v4368_v59  ;;  %v4077_v30 = vmax.f32 %v4041_v13, 0.0  ;;  %v4328_v17 = vmul.f32 %v7227_v28, %v4076_v51 }
 0x21c   : > { %v4326_v31 = vmul.f32 %v7214_v34, %v4074_v39  ;;  %v5574_v12 = vadd.f32 %v3861_v60, %v7178_v42  ;;  %v5501_v18 = vpop.f32.mrb[18].mxu0  ;;  %v4075_v14 = vmax.f32 %v4039_v23, 0.0 }
 0x21d   : > { %v4001_v11 = vmul.f32 %v5573_v44, %v7195_v15  ;;  %v5575_v29 = vadd.f32 %v5501_v18, %v7180_v41  ;;  %v3864_v4 = vpop.f32.mrb[19].mxu0  ;;  %v4372_v1 = vadd.f32 %v4371_v7, %v4370_v43  ;;  %v4329_v28 = vmul.f32 %v7233_v27, %v4077_v30  ;;  %v7311_v27 = vpop.permute.xlu1 %4251 }
 0x21e   : > { %v4373_v9 = vsel %vm597_vm0, %v4326_v31, 0.0  ;;  %v3999_v63 = vmul.f32 %v5574_v12, %v7195_v15  ;;  %v4327_v42 = vmul.f32 %v7217_v62, %v4075_v14  ;;  %v5576_v38 = vadd.f32 %v3864_v4, %v7182_v0  ;;  %v4257_v31 = vpop.permute.xlu0 %4256 }
 0x21f   : > { %v4044_v35 = vadd.f32 %v7200_v55, %v4001_v11  ;;  %v4002_v2 = vmul.f32 %v5575_v29, %v7195_v15  ;;  %v4374_v25 = vadd.f32 %v4373_v9, %v4372_v1  ;;  %v4377_v0 = vsel %vm597_vm0, %v4328_v17, 0.0 }
 0x220   : > { %v5332_v34 = vpop.f32.mrb[24].mxu1  ;;  %v4042_v5 = vadd.f32 %v7200_v55, %v3999_v63  ;;  %v4375_v61 = vsel %vm597_vm0, %v4327_v42, 0.0  ;;  %v4000_v22 = vmul.f32 %v5576_v38, %v7195_v15  ;;  %v4379_v59 = vsel %vm597_vm0, %v4329_v28, 0.0 }
 0x221   : > { %v2267_v41 = vpop.f32.mrb[25].mxu1  ;;  %v4045_v33 = vadd.f32 %v7200_v55, %v4002_v2  ;;  %v4376_v8 = vadd.f32 %v4375_v61, %v4374_v25  ;;  %v4080_v32 = vmax.f32 %v4044_v35, 0.0  ;;  %v7332_v29 = vpop.permute.xlu1 %4261 }
 0x222   : > { %v5333_v46 = vpop.f32.mrb[26].mxu1  ;;  %v4078_v16 = vmax.f32 %v4042_v5, 0.0  ;;  %v5504_v53 = vpop.f32.mrb[20].mxu0  ;;  %v4043_v57 = vadd.f32 %v7200_v55, %v4000_v22 }
 0x223   : > { %v7307_v62 = vpop.f32.mrb[27].mxu1  ;;  %v5577_v36 = vadd.f32 %v5504_v53, %v5328_v47  ;;  %v3877_v48 = vpop.f32.mrb[21].mxu0  ;;  %v4378_v50 = vadd.f32 %v4377_v0, %v4376_v8  ;;  %v4081_v58 = vmax.f32 %v4045_v33, 0.0  ;;  %v4332_v60 = vmul.f32 %v7262_v37, %v4080_v32 }
 0x224   : > { %v4330_v49 = vmul.f32 %v7245_v20, %v4078_v16  ;;  %v5578_v19 = vadd.f32 %v3877_v48, %v2251_v21  ;;  %v5505_v56 = vpop.f32.mrb[22].mxu0  ;;  %v4079_v51 = vmax.f32 %v4043_v57, 0.0  ;;  %v4267_v53 = vpop.permute.xlu0 %4266 }
 0x225   : > { %v4005_v39 = vmul.f32 %v5577_v36, %v7195_v15  ;;  %v3880_v13 = vpop.f32.mrb[23].mxu0  ;;  %v4380_v52 = vadd.f32 %v4379_v59, %v4378_v50  ;;  %v5579_v23 = vadd.f32 %v5505_v56, %v7276_v54  ;;  %v4333_v18 = vmul.f32 %v7271_v24, %v4081_v58  ;;  %v4272_v58 = vpop.permute.xlu1 %4271 }
 0x226   : > { %v4381_v40 = vsel %vm597_vm0, %v4330_v49, 0.0  ;;  %v4003_v47 = vmul.f32 %v5578_v19, %v7195_v15  ;;  %v4331_v20 = vmul.f32 %v7252_v6, %v4079_v51  ;;  %v5580_v7 = vadd.f32 %v3880_v13, %v7280_v26 }
 0x227   : > { %v4048_v21 = vadd.f32 %v7200_v55, %v4005_v39  ;;  %v4382_v12 = vadd.f32 %v4381_v40, %v4380_v52  ;;  %v4006_v14 = vmul.f32 %v5579_v23, %v7195_v15  ;;  %v4385_v9 = vsel %vm597_vm0, %v4332_v60, 0.0 }
 0x228   : > { %v5336_v44 = vpop.f32.mrb[28].mxu1  ;;  %v4046_v30 = vadd.f32 %v7200_v55, %v4003_v47  ;;  %v4383_v54 = vsel %vm597_vm0, %v4331_v20, 0.0  ;;  %v4004_v37 = vmul.f32 %v5580_v7, %v7195_v15  ;;  %v4387_v2 = vsel %vm597_vm0, %v4333_v18, 0.0 }
 0x229   : > { %v2283_v43 = vpop.f32.mrb[29].mxu1  ;;  %v4384_v26 = vadd.f32 %v4383_v54, %v4382_v12  ;;  %v4084_v4 = vmax.f32 %v4048_v21, 0.0  ;;  %v4049_v1 = vadd.f32 %v7200_v55, %v4006_v14  ;;  %v4277_v21 = vpop.permute.xlu0 %4276 }
 0x22a   : > { %v7326_v11 = vpop.f32.mrb[30].mxu1  ;;  %v4082_v17 = vmax.f32 %v4046_v30, 0.0  ;;  %v5508_v24 = vpop.f32.mrb[24].mxu0  ;;  %v4047_v63 = vadd.f32 %v7200_v55, %v4004_v37 }
 0x22b   : > { %v7330_v6 = vpop.f32.mrb[31].mxu1  ;;  %v5581_v42 = vadd.f32 %v5508_v24, %v5332_v34  ;;  %v3893_v35 = vpop.f32.mrb[25].mxu0  ;;  %v4386_v38 = vadd.f32 %v4385_v9, %v4384_v26  ;;  %v4085_v61 = vmax.f32 %v4049_v1, 0.0  ;;  %v4336_v0 = vmul.f32 %v4247_v10, %v4084_v4 }
 0x22c   : > { %v4334_v25 = vmul.f32 %v7286_v45, %v4082_v17  ;;  %v5582_v5 = vadd.f32 %v3893_v35, %v2267_v41  ;;  %v5509_v28 = vpop.f32.mrb[26].mxu0  ;;  %v4083_v33 = vmax.f32 %v4047_v63, 0.0  ;;  %v4282_v4 = vpop.permute.xlu1 %4281 }
 0x22d   : > { %v4009_v22 = vmul.f32 %v5581_v42, %v7195_v15  ;;  %v5583_v8 = vadd.f32 %v5509_v28, %v5333_v46  ;;  %v3896_v16 = vpop.f32.mrb[27].mxu0  ;;  %v4388_v32 = vadd.f32 %v4387_v2, %v4386_v38  ;;  %v4337_v56 = vmul.f32 %v7311_v27, %v4085_v61  ;;  %v4287_v28 = vpop.permute.xlu0 %4286 }
 0x22e   : > { %v4389_v57 = vsel %vm597_vm0, %v4334_v25, 0.0  ;;  %v4007_v34 = vmul.f32 %v5582_v5, %v7195_v15  ;;  %v4335_v48 = vmul.f32 %v7293_v3, %v4083_v33  ;;  %v5584_v50 = vadd.f32 %v3896_v16, %v7307_v62 }
 0x22f   : > { %v4052_v45 = vadd.f32 %v7200_v55, %v4009_v22  ;;  %v4010_v41 = vmul.f32 %v5583_v8, %v7195_v15  ;;  %v4390_v46 = vadd.f32 %v4389_v57, %v4388_v32  ;;  %v4393_v62 = vsel %vm597_vm0, %v4336_v0, 0.0 }
 0x230   : > { %v5340_v36 = vpop.f32.mrb[32].mxu1  ;;  %v4050_v19 = vadd.f32 %v7200_v55, %v4007_v34  ;;  %v4391_v59 = vsel %vm597_vm0, %v4335_v48, 0.0  ;;  %v4008_v3 = vmul.f32 %v5584_v50, %v7195_v15  ;;  %v4395_v14 = vsel %vm597_vm0, %v4337_v56, 0.0  ;;  %v4292_v0 = vpop.permute.xlu1 %4291 }
 0x231   : > { %v2299_v49 = vpop.f32.mrb[33].mxu1  ;;  %v4053_v51 = vadd.f32 %v7200_v55, %v4010_v41  ;;  %v4392_v13 = vadd.f32 %v4391_v59, %v4390_v46  ;;  %v4088_v47 = vmax.f32 %v4052_v45, 0.0 }
 0x232   : > { %v5341_v10 = vpop.f32.mrb[34].mxu1  ;;  %v4086_v52 = vmax.f32 %v4050_v19, 0.0  ;;  %v5512_v40 = vpop.f32.mrb[28].mxu0  ;;  %v4051_v23 = vadd.f32 %v7200_v55, %v4008_v3 }
 0x233   : > { %v2302_v39 = vpop.f32.mrb[35].mxu1  ;;  %v5585_v60 = vadd.f32 %v5512_v40, %v5336_v44  ;;  %v3909_v20 = vpop.f32.mrb[29].mxu0  ;;  %v4394_v7 = vadd.f32 %v4393_v62, %v4392_v13  ;;  %v4089_v12 = vmax.f32 %v4053_v51, 0.0  ;;  %v4340_v9 = vmul.f32 %v4267_v53, %v4088_v47 }
 0x234   : > { %v4338_v27 = vmul.f32 %v4257_v31, %v4086_v52  ;;  %v5586_v18 = vadd.f32 %v3909_v20, %v2283_v43  ;;  %v5513_v30 = vpop.f32.mrb[30].mxu0  ;;  %v4087_v54 = vmax.f32 %v4051_v23, 0.0 }
 0x235   : > { %v4013_v37 = vmul.f32 %v5585_v60, %v7195_v15  ;;  %v3912_v26 = vpop.f32.mrb[31].mxu0  ;;  %v4396_v17 = vadd.f32 %v4395_v14, %v4394_v7  ;;  %v5587_v44 = vadd.f32 %v5513_v30, %v7326_v11  ;;  %v4341_v35 = vmul.f32 %v4272_v58, %v4089_v12 }
 0x236   : > { %v4397_v1 = vsel %vm597_vm0, %v4338_v27, 0.0  ;;  %v4011_v24 = vmul.f32 %v5586_v18, %v7195_v15  ;;  %v4339_v31 = vmul.f32 %v7332_v29, %v4087_v54  ;;  %v5588_v63 = vadd.f32 %v3912_v26, %v7330_v6 }
 0x237   : > { %v4056_v43 = vadd.f32 %v7200_v55, %v4013_v37  ;;  %v4398_v42 = vadd.f32 %v4397_v1, %v4396_v17  ;;  %v4014_v38 = vmul.f32 %v5587_v44, %v7195_v15  ;;  %v4401_v8 = vsel %vm597_vm0, %v4340_v9, 0.0 }
 0x238   : > { %v4054_v2 = vadd.f32 %v7200_v55, %v4011_v24  ;;  %v4399_v25 = vsel %vm597_vm0, %v4339_v31, 0.0  ;;  %v4012_v5 = vmul.f32 %v5588_v63, %v7195_v15  ;;  %v4403_v32 = vsel %vm597_vm0, %v4341_v35, 0.0 }
 0x239   : > { %v4400_v61 = vadd.f32 %v4399_v25, %v4398_v42  ;;  %v4092_v11 = vmax.f32 %v4056_v43, 0.0  ;;  %v4057_v29 = vadd.f32 %v7200_v55, %v4014_v38 }
 0x23a   : > { %v4090_v33 = vmax.f32 %v4054_v2, 0.0  ;;  %v5516_v22 = vpop.f32.mrb[32].mxu0  ;;  %v4055_v6 = vadd.f32 %v7200_v55, %v4012_v5 }
 0x23b   : > { %v5589_v16 = vadd.f32 %v5516_v22, %v5340_v36  ;;  %v3925_v53 = vpop.f32.mrb[33].mxu0  ;;  %v4402_v57 = vadd.f32 %v4401_v8, %v4400_v61  ;;  %v4093_v41 = vmax.f32 %v4057_v29, 0.0  ;;  %v4344_v56 = vmul.f32 %v4287_v28, %v4092_v11  ;;  %v4436_v29 = vld [vmem:[%s7442_s6] sm:$0x1] }
 0x23c   : > { %v4342_v34 = vmul.f32 %v4277_v21, %v4090_v33  ;;  %v5590_v48 = vadd.f32 %v3925_v53, %v2299_v49  ;;  %v5517_v45 = vpop.f32.mrb[34].mxu0  ;;  %v4091_v50 = vmax.f32 %v4055_v6, 0.0  ;;  %v4297_v49 = vpop.permute.xlu0 %4296 }
 0x23d   : > { %v4017_v58 = vmul.f32 %v5589_v16, %v7195_v15  ;;  %v5591_v46 = vadd.f32 %v5517_v45, %v5341_v10  ;;  %v3928_v19 = vpop.f32.mrb[35].mxu0  ;;  %v4404_v59 = vadd.f32 %v4403_v32, %v4402_v57  ;;  %v4345_v23 = vmul.f32 %v4292_v0, %v4093_v41  ;;  %v4302_v21 = vpop.permute.xlu1 %4301 }
 0x23e   : > { %v4405_v51 = vsel %vm597_vm0, %v4342_v34, 0.0  ;;  %v4015_v36 = vmul.f32 %v5590_v48, %v7195_v15  ;;  %v4343_v3 = vmul.f32 %v4282_v4, %v4091_v50  ;;  %v5592_v40 = vadd.f32 %v3928_v19, %v2302_v39 }
 0x23f   : > { %v4060_v13 = vadd.f32 %v7200_v55, %v4017_v58  ;;  %v4018_v52 = vmul.f32 %v5591_v46, %v7195_v15  ;;  %v4406_v62 = vadd.f32 %v4405_v51, %v4404_v59  ;;  %v4409_v12 = vsel %vm597_vm0, %v4344_v56, 0.0 }
 0x240   : > { %v4058_v47 = vadd.f32 %v7200_v55, %v4015_v36  ;;  %v4407_v10 = vsel %vm597_vm0, %v4343_v3, 0.0  ;;  %v4016_v20 = vmul.f32 %v5592_v40, %v7195_v15  ;;  %v4411_v54 = vsel %vm597_vm0, %v4345_v23, 0.0  ;;  %v4307_v4 = vpop.permute.xlu0 %4306 }
 0x241   : > { %v4061_v60 = vadd.f32 %v7200_v55, %v4018_v52  ;;  %v4408_v7 = vadd.f32 %v4407_v10, %v4406_v62  ;;  %v4096_v18 = vmax.f32 %v4060_v13, 0.0  ;;  %v4312_v44 = vpop.permute.xlu1 %4311 }
 0x242   : > { %v4094_v27 = vmax.f32 %v4058_v47, 0.0  ;;  %v4059_v30 = vadd.f32 %v7200_v55, %v4016_v20 }
 0x243   : > { %v4410_v39 = vadd.f32 %v4409_v12, %v4408_v7  ;;  %v4097_v37 = vmax.f32 %v4061_v60, 0.0  ;;  %v4348_v24 = vmul.f32 %v4307_v4, %v4096_v18 }
 0x244   : > { %v4346_v14 = vmul.f32 %v4297_v49, %v4094_v27  ;;  %v4095_v26 = vmax.f32 %v4059_v30, 0.0 }
 0x245   : > { %v4412_v17 = vadd.f32 %v4411_v54, %v4410_v39  ;;  %v4349_v31 = vmul.f32 %v4312_v44, %v4097_v37  ;;  %v4417_v63 = vsel %vm597_vm0, %v4348_v24, 0.0 }
 0x246   : > { %v4413_v1 = vsel %vm597_vm0, %v4346_v14, 0.0  ;;  %v4347_v15 = vmul.f32 %v4302_v21, %v4095_v26 }
 0x247   : > { %v4414_v9 = vadd.f32 %v4413_v1, %v4412_v17  ;;  %v4419_v35 = vsel %vm597_vm0, %v4349_v31, 0.0 }
 0x248   : > { %v4415_v43 = vsel %vm597_vm0, %v4347_v15, 0.0 }
 0x249   : > { %v4416_v55 = vadd.f32 %v4415_v43, %v4414_v9 }
 0x24b   : > { %v4418_v42 = vadd.f32 %v4417_v63, %v4416_v55 }
 0x24d   : > { %v4420_v2 = vadd.f32 %v4419_v35, %v4418_v42 }
 0x24f   : > { %v4421_v38 = vrot.slane %v4420_v2, 4 }
 0x251   : > { %v4422_v25 = vadd.f32 %v4421_v38, %v4420_v2 }
 0x253   : > { %v4423_v5 = vrot.slane %v4422_v25, 2 }
 0x255   : > { %v4424_v28 = vadd.f32 %v4423_v5, %v4422_v25 }
 0x257   : > { %v4425_v61 = vrot.slane %v4424_v28, 1 }
 0x259   : > { %v4426_v11 = vadd.f32 %v4425_v61, %v4424_v28 }
 0x25b   : > { %v4427_v33 = vmul.f32 0.00390625, %v4426_v11 }
 0x25d   : > { %5535 = vmatmul.mubr.msk.f32.vlgmr.msra.gmra.mrb[36].mxu1 %vm597_vm0, %v4427_v33 }
 0x330   : > { %v4506_v22 = vpop.f32.mrb[36].mxu1 }
 0x331   : > { %v4507_v8 = vadd.f32 %v4506_v22, %v4436_v29  ;;  %v5536_v6 = vpop.f32.mrb[37].mxu1 }
 0x333   : > { %4511 = vst.msk [vmem:[%s270_s22] sm:$0x1] %vm4510_vm8, %v4507_v8 }
 0x334   : > { %6029 = shalt.err (!%p6026_p3)
}
 0x335   : > { %s6030_s16 = scalar_lea.hbm %s7394_s17, 16  ;;  %s6034_s20 = scalar_lea.hbm %s7443_s7, 32 }
 0x336   : > { %p6031_p4 = scmp.ne.s32.totalorder %s7394_s17, %s6030_s16  ;;  %p6035_p9 = scmp.lt.u32.totalorder %s7394_s17, %s7443_s7 }
 0x337   : > { %p6036_p10 = scmp.lt.u32.totalorder %s6034_s20, %s6030_s16  ;;  %p6038_p12 = scmp.lt.u32.totalorder %s6030_s16, %s7394_s17 }
 0x338   : > { %p6032_p7 = pnand %p6031_p4, %p6163_p5 }
 0x339   : > { %p6037_p11 = por %p6036_p10, %p6035_p9 }
 0x33a   : > { %p6033_p8 = pneg %p6032_p7 }
 0x33b   : > { %p6039_p13 = por %p6038_p12, %p6037_p11 }
 0x33d   : > { %p6040_p0 = pnand %p6039_p13, %p6033_p8 }
 0x33f   : > { %6043 = shalt.err (!%p6040_p0)
}
 0x340   : > { %5846 = dma.vmem_to_hbm [thread:$0]  (%p6163_p5), %s7396_s23, 16, %s7394_s17, %s4513_s9  }
 0x341 PF: > { %p5852_p1 = scmp.ge.s32.totalorder %s6078_s27, 2  ;;  %s4537_s29 = sand.u32 1, %s6066_s24  }
 0x342   : > { %s4538_s8 = scalar_lea.sflag [#allocation3], %s4537_s29 }
 0x343   : > { %p5849_p2 = pnand %p5852_p1, %p6167_p6 }
 0x345   : > { %6061 = dma.done.wait (!%p5849_p2), %s4538_s8, 16  }
 0x346   : > { %6063 = vsyncadd (!%p5849_p2), %s4538_s8, 4294967280  ;;  %p17_p3 = scmp.ge.s32.totalorder %s6150_s30, 4   ;;  %s7446_s24 = smov %s6070_s25 }
 0x347   : > { %s7447_s25 = smov %s6074_s26  ;;  %s7448_s26 = smov %s6161_s10 }
 0x348   : > { %s7449_s27 = smov %s6150_s30  ;;  %19 = sbr.rel (!%p17_p3) target bundleno = 3 (0x3), region = 91 }
 0x34f   :  { %4542 = vsyncpa [#allocation3], 1 }
 0x350   :  { %4544 = vsyncpa [#allocation3 + $0x1], 1 }

</bundles_post_ra>
